<compile_context>
chip_gen: v7x
topology: tpu7x:2x2x1
jax: 0.10.0
libtpu: 0.0.40
codegen_flags: <defaults>
</compile_context>

<pallas_src>
import functools

import jax
import jax.numpy as jnp
from jax.experimental import pallas as pl
from jax.experimental.pallas import tpu as pltpu


# ----------------------------------------------------------------------------
# Helpers
# ----------------------------------------------------------------------------
def _pick_tco(cout):
    # v6e: 256 fills the 2x256^2 MXU; v5e: 128 matches its 4x128^2 MXU; v7x: 128 also
    # keeps tiles small under 64 MiB VMEM.  Keep a multiple of 128 for lane-dense
    # output stores whenever possible.
    if cout % 256 == 0:
        return 256
    if cout % 128 == 0:
        return 128
    return cout


def _vmem_limit(tile_bytes, scratch_bytes):
    # Scoped-VMEM request: 2x (double buffering) of the pipelined tiles + scratch +
    # a little slack, clamped to the chip's physical VMEM minus 8 MiB headroom.
    try:
        cap = int(pltpu.get_tpu_info().vmem_capacity_bytes)
    except Exception:  # pragma: no cover - conservative fallback (v7x per-TC VMEM)
        cap = 64 << 20
    want = int(2 * tile_bytes + scratch_bytes + (4 << 20))
    return max(16 << 20, min(want, cap - (8 << 20)))


# ----------------------------------------------------------------------------
# Kernel 1: plain GEMM (pre-built im2col) + BatchNorm(train stats) + ReLU
# Used for conv1, whose pool/pad/im2col is done lane-densely in the XLA wrapper
# because Cin << 128 (lane-sparse prologue work would dominate in-kernel).
# ----------------------------------------------------------------------------
def _gemm_bn_relu_kernel(col_ref, w_ref, g_ref, b_ref, o_ref, acc_ref):
    # col_ref: (M, Kp) bf16   w_ref: (Kp, TCO) bf16   g/b: (1, TCO) f32
    # o_ref:   (M, TCO) out dtype                     acc_ref: (M, TCO) f32
    M = col_ref.shape[0]
    acc_ref[...] = jnp.dot(col_ref[...], w_ref[...],
                           preferred_element_type=jnp.float32)
    acc = acc_ref[...]
    # Single-pass BN stats (f32): var = E[x^2] - mean^2, clamped at 0.
    s1 = jnp.sum(acc, axis=0, keepdims=True)
    s2 = jnp.sum(acc * acc, axis=0, keepdims=True)
    mean = s1 * (1.0 / M)
    var = jnp.maximum(s2 * (1.0 / M) - mean * mean, 0.0)
    scale = jax.lax.rsqrt(var + 1e-5) * g_ref[...]
    shift = b_ref[...] - mean * scale
    o_ref[...] = jnp.maximum(acc * scale + shift, 0.0).astype(o_ref.dtype)


def gemm_bn_relu(col, wk, gamma, beta, *, out_dtype):
    # col: (M, K) ; wk: (K, Cout) ; gamma/beta: (Cout,)
    M, K = col.shape
    Cout = wk.shape[-1]
    # Zero-pad K up to a multiple of 128: lane-aligned col, sublane-aligned weights,
    # no effect on the GEMM result.
    Kp = ((K + 127) // 128) * 128
    if Kp != K:
        col = jnp.pad(col, ((0, 0), (0, Kp - K)))
        wk = jnp.pad(wk, ((0, Kp - K), (0, 0)))
    col = col.astype(jnp.bfloat16)
    wk = wk.astype(jnp.bfloat16)

    tco = _pick_tco(Cout)
    out_item = jnp.dtype(out_dtype).itemsize
    tile_b = M * Kp * 2 + Kp * tco * 2 + 2 * tco * 4 + M * tco * out_item
    vmem = _vmem_limit(tile_b, M * tco * 4)

    return pl.pallas_call(
        _gemm_bn_relu_kernel,
        out_shape=jax.ShapeDtypeStruct((M, Cout), out_dtype),
        grid_spec=pltpu.PrefetchScalarGridSpec(
            num_scalar_prefetch=0,
            grid=(Cout // tco,),
            in_specs=[
                pl.BlockSpec((M, Kp), lambda j: (0, 0)),
                pl.BlockSpec((Kp, tco), lambda j: (0, j)),
                pl.BlockSpec((1, tco), lambda j: (0, j)),
                pl.BlockSpec((1, tco), lambda j: (0, j)),
            ],
            out_specs=pl.BlockSpec((M, tco), lambda j: (0, j)),
            scratch_shapes=[pltpu.VMEM((M, tco), jnp.float32)],
        ),
        compiler_params=pltpu.CompilerParams(
            dimension_semantics=("parallel",),
            vmem_limit_bytes=vmem),
    )(col, wk, gamma.reshape(1, Cout), beta.reshape(1, Cout))


# ----------------------------------------------------------------------------
# Kernel 2: fused zero-pad + im2col + deep-K GEMM + BatchNorm(train) + ReLU
# Used for conv2 (Cin = out_ch, lane-dense): keeps the 9x im2col expansion in VMEM.
# ----------------------------------------------------------------------------
def _conv3x3_bn_relu_kernel(x_ref, w_ref, g_ref, b_ref, o_ref,
                            xpad_ref, col_ref, acc_ref):
    # x_ref : (N, Ho, Wo, C) bf16          w_ref : (9C, TCO) bf16, K = (dy, dx, ci)
    # g/b   : (1, TCO) f32                 o_ref : (N, Ho, Wo, TCO) f32
    # xpad_ref : (N, Ho+2, (Wo+2)*C) bf16  (W folded into the lane axis)
    # col_ref  : (M, 9C) bf16              acc_ref : (M, TCO) f32
    N, Ho, Wo, C = x_ref.shape
    TCO = o_ref.shape[-1]
    M = N * Ho * Wo

    # j-invariant prologue: scratch persists across the (sequential) Cout grid, so do
    # the pad + im2col only once.  Safe because the grid axis is "arbitrary".
    @pl.when(pl.program_id(0) == 0)
    def _prologue():
        # Zero only the halo; the interior is fully overwritten below.
        zrow = jnp.zeros((N, 1, (Wo + 2) * C), jnp.bfloat16)
        xpad_ref[:, 0:1, :] = zrow
        xpad_ref[:, Ho + 1:Ho + 2, :] = zrow
        zcol = jnp.zeros((N, Ho, C), jnp.bfloat16)
        xpad_ref[:, 1:Ho + 1, 0:C] = zcol
        xpad_ref[:, 1:Ho + 1, (Wo + 1) * C:(Wo + 2) * C] = zcol
        # Interior (W folded into lanes; lane offset C is 128-aligned for C % 128 == 0).
        xpad_ref[:, 1:Ho + 1, C:(Wo + 1) * C] = x_ref[...].reshape(N, Ho, Wo * C)

        # im2col: 3 dy row-window reads; per dy the 3 dx taps are lane-aligned slices.
        for dy in range(3):
            rows = xpad_ref[:, dy:dy + Ho, :]                 # (N, Ho, (Wo+2)*C)
            for dx in range(3):
                t = dy * 3 + dx
                col_ref[:, t * C:(t + 1) * C] = (
                    rows[:, :, dx * C:(dx + Wo) * C].reshape(M, C))

    # ONE deep-K bf16 MXU matmul (K = 9*C), f32 accumulate in VMEM scratch.
    acc_ref[...] = jnp.dot(col_ref[...], w_ref[...],
                           preferred_element_type=jnp.float32)

    # BatchNorm2d (training-mode batch stats, biased var, eps=1e-5) + ReLU in f32.
    # Conv bias omitted on purpose: mean subtraction cancels it exactly.
    acc = acc_ref[...]
    s1 = jnp.sum(acc, axis=0, keepdims=True)
    s2 = jnp.sum(acc * acc, axis=0, keepdims=True)
    mean = s1 * (1.0 / M)
    var = jnp.maximum(s2 * (1.0 / M) - mean * mean, 0.0)
    scale = jax.lax.rsqrt(var + 1e-5) * g_ref[...]
    shift = b_ref[...] - mean * scale
    y = jnp.maximum(acc * scale + shift, 0.0)
    o_ref[...] = y.reshape(N, Ho, Wo, TCO)


def conv3x3_bn_relu(x, wk, gamma, beta):
    # x: (N, Ho, Wo, C) bf16 ; wk: (9*C, Cout) ; gamma/beta: (Cout,)
    N, Ho, Wo, C = x.shape
    Cout = wk.shape[-1]
    assert wk.shape[0] == 9 * C
    M = N * Ho * Wo
    tco = _pick_tco(Cout)

    x = x.astype(jnp.bfloat16)
    wk = wk.astype(jnp.bfloat16)

    tile_b = (x.size * 2 + 9 * C * tco * 2 + 2 * tco * 4 + M * tco * 4)
    scratch_b = (N * (Ho + 2) * (Wo + 2) * C * 2    # folded, padded input (bf16)
                 + M * 9 * C * 2                    # im2col (bf16)
                 + M * tco * 4)                     # accumulator (f32)
    vmem = _vmem_limit(tile_b, scratch_b)

    return pl.pallas_call(
        _conv3x3_bn_relu_kernel,
        out_shape=jax.ShapeDtypeStruct((N, Ho, Wo, Cout), jnp.float32),
        grid_spec=pltpu.PrefetchScalarGridSpec(
            num_scalar_prefetch=0,
            grid=(Cout // tco,),
            in_specs=[
                pl.BlockSpec((N, Ho, Wo, C), lambda j: (0, 0, 0, 0)),
                pl.BlockSpec((9 * C, tco), lambda j: (0, j)),
                pl.BlockSpec((1, tco), lambda j: (0, j)),
                pl.BlockSpec((1, tco), lambda j: (0, j)),
            ],
            out_specs=pl.BlockSpec((N, Ho, Wo, tco), lambda j: (0, 0, 0, j)),
            scratch_shapes=[
                pltpu.VMEM((N, Ho + 2, (Wo + 2) * C), jnp.bfloat16),
                pltpu.VMEM((M, 9 * C), jnp.bfloat16),
                pltpu.VMEM((M, tco), jnp.float32),
            ],
        ),
        compiler_params=pltpu.CompilerParams(
            # "arbitrary": the hoisted prologue (program_id == 0) must see every grid
            # step on the same core; megacore-splitting this axis would skip it.
            dimension_semantics=("arbitrary",),
            vmem_limit_bytes=vmem),
    )(x, wk, gamma.reshape(1, Cout), beta.reshape(1, Cout))


# ----------------------------------------------------------------------------
# conv1 prologue in the XLA wrapper (Cin << 128: keep lane-sparse work out of Pallas)
# ----------------------------------------------------------------------------
def _pool_pad_im2col(x_nhwc):
    N, H, W, C = x_nhwc.shape
    Ho, Wo = H // 2, W // 2
    pooled = x_nhwc.reshape(N, Ho, 2, Wo, 2, C).max(axis=(2, 4))   # MaxPool2d(2)
    pp = jnp.pad(pooled, ((0, 0), (1, 1), (1, 1), (0, 0)))         # SAME pad
    taps = [pp[:, dy:dy + Ho, dx:dx + Wo, :]                       # K = (dy, dx, ci)
            for dy in range(3) for dx in range(3)]
    col = jnp.concatenate(taps, axis=-1).reshape(N * Ho * Wo, 9 * C)
    return col.astype(jnp.bfloat16)


# ----------------------------------------------------------------------------
# Parameters (deterministic, synthetic; conv bias omitted — cancelled by train-mode BN)
# ----------------------------------------------------------------------------
def init_down_params(key, in_ch, out_ch):
    ks = jax.random.split(key, 6)

    def convw(k, ci, co):
        w = jax.random.normal(k, (co, ci, 3, 3), jnp.float32) / jnp.sqrt(9.0 * ci)
        # torch (co,ci,3,3) -> (3,3,ci,co) -> (9*ci, co); K ordered (dy, dx, ci).
        return jnp.transpose(w, (2, 3, 1, 0)).reshape(9 * ci, co).astype(jnp.bfloat16)

    return dict(
        w1=convw(ks[0], in_ch, out_ch),
        g1=1.0 + 0.1 * jax.random.normal(ks[1], (out_ch,), jnp.float32),
        be1=0.1 * jax.random.normal(ks[2], (out_ch,), jnp.float32),
        w2=convw(ks[3], out_ch, out_ch),
        g2=1.0 + 0.1 * jax.random.normal(ks[4], (out_ch,), jnp.float32),
        be2=0.1 * jax.random.normal(ks[5], (out_ch,), jnp.float32),
    )


# ----------------------------------------------------------------------------
# Forward pass: down(x) = double_conv(maxpool2(x))
# ----------------------------------------------------------------------------
def down_forward(params, x_nchw):
    x = jnp.transpose(x_nchw, (0, 2, 3, 1))                        # NCHW -> NHWC
    N, H, W, _ = x.shape
    Ho, Wo = H // 2, W // 2
    Cout = params["w1"].shape[-1]

    # conv1: pool/pad/im2col in XLA (lane-dense), Pallas GEMM + BN + ReLU, bf16 out.
    col1 = _pool_pad_im2col(x)
    y1 = gemm_bn_relu(col1, params["w1"], params["g1"], params["be1"],
                      out_dtype=jnp.bfloat16)
    y1 = y1.reshape(N, Ho, Wo, Cout)                               # metadata reshape

    # conv2: fused in-kernel pad + im2col + deep-K GEMM + BN + ReLU, f32 out.
    y2 = conv3x3_bn_relu(y1, params["w2"], params["g2"], params["be2"])
    return jnp.transpose(y2, (0, 3, 1, 2))                         # NHWC -> NCHW


# Pure-JAX reference (matching numerics: bf16 activations into each conv, f32 math).
def _ref_down(params, x_nchw):
    x = jnp.transpose(x_nchw, (0, 2, 3, 1))
    N, H, W, C = x.shape
    x = x.reshape(N, H // 2, 2, W // 2, 2, C).max(axis=(2, 4))     # MaxPool2d(2)

    def cbr(x, w9, g, b):
        x = x.astype(jnp.bfloat16).astype(jnp.float32)
        ci = x.shape[-1]
        w = w9.astype(jnp.float32).reshape(3, 3, ci, -1)           # HWIO
        y = jax.lax.conv_general_dilated(
            x, w, window_strides=(1, 1), padding="SAME",
            dimension_numbers=("NHWC", "HWIO", "NHWC"))
        mean = y.mean(axis=(0, 1, 2), keepdims=True)
        var = ((y - mean) ** 2).mean(axis=(0, 1, 2), keepdims=True)
        y = (y - mean) * jax.lax.rsqrt(var + 1e-5) * g + b
        return jnp.maximum(y, 0.0)

    x = cbr(x, params["w1"], params["g1"], params["be1"])
    x = cbr(x, params["w2"], params["g2"], params["be2"])
    return jnp.transpose(x, (0, 3, 1, 2))


if __name__ == "__main__":
    key = jax.random.PRNGKey(0)
    pkey, xkey = jax.random.split(key)
    IN_CH, OUT_CH = 4, 128            # out_ch multiple of 128 -> lane-dense stores
    params = init_down_params(pkey, IN_CH, OUT_CH)
    x = jax.random.normal(xkey, (2, IN_CH, 16, 16), jnp.float32)   # NCHW like PyTorch

    fwd = jax.jit(functools.partial(down_forward, params))
    out = jax.block_until_ready(fwd(x))
    assert out.shape == (2, OUT_CH, 8, 8), out.shape
    assert bool(jnp.isfinite(out).all())

    ref = jax.block_until_ready(jax.jit(functools.partial(_ref_down, params))(x))
    err = float(jnp.max(jnp.abs(out - ref)))
    assert err < 5e-2, f"max abs err vs reference = {err}"
    print("KERNEL_OK")
</pallas_src>

<mosaic_0001>
module attributes {stable_mosaic.version = 11 : i64} {
  func.func @_gemm_bn_relu_kernel(%arg0: i32, %arg1: memref<128x128xbf16, #tpu.memory_space<vmem>>, %arg2: memref<128x128xbf16, #tpu.memory_space<vmem>>, %arg3: memref<1x128xf32, #tpu.memory_space<vmem>>, %arg4: memref<1x128xf32, #tpu.memory_space<vmem>>, %arg5: memref<128x128xbf16, #tpu.memory_space<vmem>>, %arg6: memref<128x128xf32, #tpu.memory_space<vmem>>) attributes {dimension_semantics = [#tpu.dimension_semantics<parallel>], iteration_bounds = array<i64: 1>, scalar_prefetch = 0 : i64, scratch_operands = 1 : i64, tpu.core_type = #tpu.core_type<tc>, window_params = [{pipeline_mode = #tpu.pipeline_mode<synchronous>, transform_indices = @transform_0, window_bounds = array<i64: 128, 128>}, {transform_indices = @transform_1, window_bounds = array<i64: 128, 128>}, {transform_indices = @transform_2, window_bounds = array<i64: 1, 128>}, {transform_indices = @transform_3, window_bounds = array<i64: 1, 128>}, {transform_indices = @transform_4, window_bounds = array<i64: 128, 128>}]} {
    %c0 = arith.constant 0 : index
    %c0_0 = arith.constant 0 : index
    %0 = vector.load %arg1[%c0, %c0_0] : memref<128x128xbf16, #tpu.memory_space<vmem>>, vector<128x128xbf16>
    %c0_1 = arith.constant 0 : index
    %c0_2 = arith.constant 0 : index
    %1 = vector.load %arg2[%c0_1, %c0_2] : memref<128x128xbf16, #tpu.memory_space<vmem>>, vector<128x128xbf16>
    %cst = arith.constant dense<0.000000e+00> : vector<128x128xf32>
    %2 = tpu.matmul %0, %1, %cst {dimension_numbers = #tpu.dot_dimension_numbers<[1], [0], [0], [1], [0, 0, 1, 1], [], []>} : vector<128x128xbf16>, vector<128x128xbf16>, vector<128x128xf32> -> vector<128x128xf32>
    %c0_3 = arith.constant 0 : index
    %c0_4 = arith.constant 0 : index
    %3 = vector.load %arg6[%c0_3, %c0_4] : memref<128x128xf32, #tpu.memory_space<vmem>>, vector<128x128xf32>
    tpu.vector_store %arg6[%c0_3, %c0_4], %2 {strides = array<i32>} : memref<128x128xf32, #tpu.memory_space<vmem>>, vector<128x128xf32>,
    %c0_5 = arith.constant 0 : index
    %c0_6 = arith.constant 0 : index
    %4 = vector.load %arg6[%c0_5, %c0_6] : memref<128x128xf32, #tpu.memory_space<vmem>>, vector<128x128xf32>
    %cst_7 = arith.constant dense<0.000000e+00> : vector<128xf32>
    %5 = vector.multi_reduction <add>, %4, %cst_7 [0] : vector<128x128xf32> to vector<128xf32>
    %6 = vector.shape_cast %5 : vector<128xf32> to vector<1x128xf32>
    %7 = arith.mulf %4, %4 : vector<128x128xf32>
    %cst_8 = arith.constant dense<0.000000e+00> : vector<128xf32>
    %8 = vector.multi_reduction <add>, %7, %cst_8 [0] : vector<128x128xf32> to vector<128xf32>
    %9 = vector.shape_cast %8 : vector<128xf32> to vector<1x128xf32>
    %cst_9 = arith.constant 7.812500e-03 : f32
    %10 = vector.broadcast %cst_9 : f32 to vector<1x128xf32>
    %11 = arith.mulf %6, %10 : vector<1x128xf32>
    %cst_10 = arith.constant 7.812500e-03 : f32
    %12 = vector.broadcast %cst_10 : f32 to vector<1x128xf32>
    %13 = arith.mulf %9, %12 : vector<1x128xf32>
    %14 = arith.mulf %11, %11 : vector<1x128xf32>
    %15 = arith.subf %13, %14 : vector<1x128xf32>
    %cst_11 = arith.constant 0.000000e+00 : f32
    %16 = vector.broadcast %cst_11 : f32 to vector<1x128xf32>
    %17 = arith.maximumf %15, %16 : vector<1x128xf32>
    %cst_12 = arith.constant 9.99999974E-6 : f32
    %18 = vector.broadcast %cst_12 : f32 to vector<1x128xf32>
    %19 = arith.addf %17, %18 : vector<1x128xf32>
    %20 = math.rsqrt %19 : vector<1x128xf32>
    %c0_13 = arith.constant 0 : index
    %c0_14 = arith.constant 0 : index
    %21 = vector.load %arg3[%c0_13, %c0_14] : memref<1x128xf32, #tpu.memory_space<vmem>>, vector<1x128xf32>
    %22 = arith.mulf %20, %21 : vector<1x128xf32>
    %c0_15 = arith.constant 0 : index
    %c0_16 = arith.constant 0 : index
    %23 = vector.load %arg4[%c0_15, %c0_16] : memref<1x128xf32, #tpu.memory_space<vmem>>, vector<1x128xf32>
    %24 = arith.mulf %11, %22 : vector<1x128xf32>
    %25 = arith.subf %23, %24 : vector<1x128xf32>
    %26 = vector.broadcast %22 : vector<1x128xf32> to vector<128x128xf32>
    %27 = arith.mulf %4, %26 : vector<128x128xf32>
    %28 = vector.broadcast %25 : vector<1x128xf32> to vector<128x128xf32>
    %29 = arith.addf %27, %28 : vector<128x128xf32>
    %cst_17 = arith.constant 0.000000e+00 : f32
    %30 = vector.broadcast %cst_17 : f32 to vector<128x128xf32>
    %31 = arith.maximumf %29, %30 : vector<128x128xf32>
    %32 = arith.truncf %31 : vector<128x128xf32> to vector<128x128xbf16>
    %c0_18 = arith.constant 0 : index
    %c0_19 = arith.constant 0 : index
    %33 = vector.load %arg5[%c0_18, %c0_19] : memref<128x128xbf16, #tpu.memory_space<vmem>>, vector<128x128xbf16>
    tpu.vector_store %arg5[%c0_18, %c0_19], %32 {strides = array<i32>} : memref<128x128xbf16, #tpu.memory_space<vmem>>, vector<128x128xbf16>,
    return
  }
  func.func @transform_0(%arg0: i32) -> (i32, i32) {
    %c0_i32 = arith.constant 0 : i32
    %c0_i32_0 = arith.constant 0 : i32
    %c0_i32_1 = arith.constant 0 : i32
    return %c0_i32, %c0_i32_0 : i32, i32
  }
  func.func @transform_1(%arg0: i32) -> (i32, i32) {
    %c0_i32 = arith.constant 0 : i32
    %c0_i32_0 = arith.constant 0 : i32
    return %c0_i32, %arg0 : i32, i32
  }
  func.func @transform_2(%arg0: i32) -> (i32, i32) {
    %c0_i32 = arith.constant 0 : i32
    %c0_i32_0 = arith.constant 0 : i32
    return %c0_i32, %arg0 : i32, i32
  }
  func.func @transform_3(%arg0: i32) -> (i32, i32) {
    %c0_i32 = arith.constant 0 : i32
    %c0_i32_0 = arith.constant 0 : i32
    return %c0_i32, %arg0 : i32, i32
  }
  func.func @transform_4(%arg0: i32) -> (i32, i32) {
    %c0_i32 = arith.constant 0 : i32
    %c0_i32_0 = arith.constant 0 : i32
    return %c0_i32, %arg0 : i32, i32
  }
}

module attributes {stable_mosaic.version = 11 : i64} {
  func.func @_conv3x3_bn_relu_kernel(%arg0: i32, %arg1: memref<2x8x8x128xbf16, #tpu.memory_space<vmem>>, %arg2: memref<1152x128xbf16, #tpu.memory_space<vmem>>, %arg3: memref<1x128xf32, #tpu.memory_space<vmem>>, %arg4: memref<1x128xf32, #tpu.memory_space<vmem>>, %arg5: memref<2x8x8x128xf32, #tpu.memory_space<vmem>>, %arg6: memref<2x10x1280xbf16, #tpu.memory_space<vmem>>, %arg7: memref<128x1152xbf16, #tpu.memory_space<vmem>>, %arg8: memref<128x128xf32, #tpu.memory_space<vmem>>) attributes {dimension_semantics = [#tpu.dimension_semantics<arbitrary>], iteration_bounds = array<i64: 1>, scalar_prefetch = 0 : i64, scratch_operands = 3 : i64, tpu.core_type = #tpu.core_type<tc>, window_params = [{pipeline_mode = #tpu.pipeline_mode<synchronous>, transform_indices = @transform_0, window_bounds = array<i64: 2, 8, 8, 128>}, {transform_indices = @transform_1, window_bounds = array<i64: 1152, 128>}, {transform_indices = @transform_2, window_bounds = array<i64: 1, 128>}, {transform_indices = @transform_3, window_bounds = array<i64: 1, 128>}, {transform_indices = @transform_4, window_bounds = array<i64: 2, 8, 8, 128>}]} {
    %c0_i32 = arith.constant 0 : i32
    %0 = arith.cmpi eq, %arg0, %c0_i32 : i32
    %1 = arith.extui %0 : i1 to i32
    %c0_i32_0 = arith.constant 0 : i32
    %2 = arith.cmpi ne, %1, %c0_i32_0 : i32
    scf.if %2 {
      %cst_23 = arith.constant 0.000000e+00 : bf16
      %37 = vector.broadcast %cst_23 : bf16 to vector<2x1x1280xbf16>
      %c0_24 = arith.constant 0 : index
      %c0_25 = arith.constant 0 : index
      %c0_26 = arith.constant 0 : index
      %38 = vector.load %arg6[%c0_24, %c0_25, %c0_26] : memref<2x10x1280xbf16, #tpu.memory_space<vmem>>, vector<2x1x1280xbf16>
      tpu.vector_store %arg6[%c0_24, %c0_25, %c0_26], %37 {strides = array<i32>} : memref<2x10x1280xbf16, #tpu.memory_space<vmem>>, vector<2x1x1280xbf16>,
      %c0_27 = arith.constant 0 : index
      %c9 = arith.constant 9 : index
      %c0_28 = arith.constant 0 : index
      %39 = vector.load %arg6[%c0_27, %c9, %c0_28] : memref<2x10x1280xbf16, #tpu.memory_space<vmem>>, vector<2x1x1280xbf16>
      tpu.vector_store %arg6[%c0_27, %c9, %c0_28], %37 {strides = array<i32>} : memref<2x10x1280xbf16, #tpu.memory_space<vmem>>, vector<2x1x1280xbf16>,
      %cst_29 = arith.constant 0.000000e+00 : bf16
      %40 = vector.broadcast %cst_29 : bf16 to vector<2x8x128xbf16>
      %c0_30 = arith.constant 0 : index
      %c1 = arith.constant 1 : index
      %c0_31 = arith.constant 0 : index
      %41 = vector.load %arg6[%c0_30, %c1, %c0_31] : memref<2x10x1280xbf16, #tpu.memory_space<vmem>>, vector<2x8x128xbf16>
      tpu.vector_store %arg6[%c0_30, %c1, %c0_31], %40 {strides = array<i32>} : memref<2x10x1280xbf16, #tpu.memory_space<vmem>>, vector<2x8x128xbf16>,
      %c0_32 = arith.constant 0 : index
      %c1_33 = arith.constant 1 : index
      %c1152 = arith.constant 1152 : index
      %42 = vector.load %arg6[%c0_32, %c1_33, %c1152] : memref<2x10x1280xbf16, #tpu.memory_space<vmem>>, vector<2x8x128xbf16>
      tpu.vector_store %arg6[%c0_32, %c1_33, %c1152], %40 {strides = array<i32>} : memref<2x10x1280xbf16, #tpu.memory_space<vmem>>, vector<2x8x128xbf16>,
      %c0_34 = arith.constant 0 : index
      %c0_35 = arith.constant 0 : index
      %c0_36 = arith.constant 0 : index
      %c0_37 = arith.constant 0 : index
      %43 = vector.load %arg1[%c0_34, %c0_35, %c0_36, %c0_37] : memref<2x8x8x128xbf16, #tpu.memory_space<vmem>>, vector<2x8x8x128xbf16>
      %44 = vector.shape_cast %43 : vector<2x8x8x128xbf16> to vector<2x8x1024xbf16>
      %c0_38 = arith.constant 0 : index
      %c1_39 = arith.constant 1 : index
      %c128 = arith.constant 128 : index
      %45 = vector.load %arg6[%c0_38, %c1_39, %c128] : memref<2x10x1280xbf16, #tpu.memory_space<vmem>>, vector<2x8x1024xbf16>
      tpu.vector_store %arg6[%c0_38, %c1_39, %c128], %44 {strides = array<i32>} : memref<2x10x1280xbf16, #tpu.memory_space<vmem>>, vector<2x8x1024xbf16>,
      %c0_40 = arith.constant 0 : index
      %c0_41 = arith.constant 0 : index
      %c0_42 = arith.constant 0 : index
      %46 = vector.load %arg6[%c0_40, %c0_41, %c0_42] : memref<2x10x1280xbf16, #tpu.memory_space<vmem>>, vector<2x8x1280xbf16>
      %47 = vector.extract_strided_slice %46 {offsets = [0, 0, 0], sizes = [2, 8, 1024], strides = [1, 1, 1]} : vector<2x8x1280xbf16> to vector<2x8x1024xbf16>
      %48 = vector.shape_cast %47 : vector<2x8x1024xbf16> to vector<128x128xbf16>
      %c0_43 = arith.constant 0 : index
      %c0_44 = arith.constant 0 : index
      %49 = vector.load %arg7[%c0_43, %c0_44] : memref<128x1152xbf16, #tpu.memory_space<vmem>>, vector<128x128xbf16>
      tpu.vector_store %arg7[%c0_43, %c0_44], %48 {strides = array<i32>} : memref<128x1152xbf16, #tpu.memory_space<vmem>>, vector<128x128xbf16>,
      %50 = vector.extract_strided_slice %46 {offsets = [0, 0, 128], sizes = [2, 8, 1024], strides = [1, 1, 1]} : vector<2x8x1280xbf16> to vector<2x8x1024xbf16>
      %51 = vector.shape_cast %50 : vector<2x8x1024xbf16> to vector<128x128xbf16>
      %c0_45 = arith.constant 0 : index
      %c128_46 = arith.constant 128 : index
      %52 = vector.load %arg7[%c0_45, %c128_46] : memref<128x1152xbf16, #tpu.memory_space<vmem>>, vector<128x128xbf16>
      tpu.vector_store %arg7[%c0_45, %c128_46], %51 {strides = array<i32>} : memref<128x1152xbf16, #tpu.memory_space<vmem>>, vector<128x128xbf16>,
      %53 = vector.extract_strided_slice %46 {offsets = [0, 0, 256], sizes = [2, 8, 1024], strides = [1, 1, 1]} : vector<2x8x1280xbf16> to vector<2x8x1024xbf16>
      %54 = vector.shape_cast %53 : vector<2x8x1024xbf16> to vector<128x128xbf16>
      %c0_47 = arith.constant 0 : index
      %c256 = arith.constant 256 : index
      %55 = vector.load %arg7[%c0_47, %c256] : memref<128x1152xbf16, #tpu.memory_space<vmem>>, vector<128x128xbf16>
      tpu.vector_store %arg7[%c0_47, %c256], %54 {strides = array<i32>} : memref<128x1152xbf16, #tpu.memory_space<vmem>>, vector<128x128xbf16>,
      %c0_48 = arith.constant 0 : index
      %c1_49 = arith.constant 1 : index
      %c0_50 = arith.constant 0 : index
      %56 = vector.load %arg6[%c0_48, %c1_49, %c0_50] : memref<2x10x1280xbf16, #tpu.memory_space<vmem>>, vector<2x8x1280xbf16>
      %57 = vector.extract_strided_slice %56 {offsets = [0, 0, 0], sizes = [2, 8, 1024], strides = [1, 1, 1]} : vector<2x8x1280xbf16> to vector<2x8x1024xbf16>
      %58 = vector.shape_cast %57 : vector<2x8x1024xbf16> to vector<128x128xbf16>
      %c0_51 = arith.constant 0 : index
      %c384 = arith.constant 384 : index
      %59 = vector.load %arg7[%c0_51, %c384] : memref<128x1152xbf16, #tpu.memory_space<vmem>>, vector<128x128xbf16>
      tpu.vector_store %arg7[%c0_51, %c384], %58 {strides = array<i32>} : memref<128x1152xbf16, #tpu.memory_space<vmem>>, vector<128x128xbf16>,
      %60 = vector.extract_strided_slice %56 {offsets = [0, 0, 128], sizes = [2, 8, 1024], strides = [1, 1, 1]} : vector<2x8x1280xbf16> to vector<2x8x1024xbf16>
      %61 = vector.shape_cast %60 : vector<2x8x1024xbf16> to vector<128x128xbf16>
      %c0_52 = arith.constant 0 : index
      %c512 = arith.constant 512 : index
      %62 = vector.load %arg7[%c0_52, %c512] : memref<128x1152xbf16, #tpu.memory_space<vmem>>, vector<128x128xbf16>
      tpu.vector_store %arg7[%c0_52, %c512], %61 {strides = array<i32>} : memref<128x1152xbf16, #tpu.memory_space<vmem>>, vector<128x128xbf16>,
      %63 = vector.extract_strided_slice %56 {offsets = [0, 0, 256], sizes = [2, 8, 1024], strides = [1, 1, 1]} : vector<2x8x1280xbf16> to vector<2x8x1024xbf16>
      %64 = vector.shape_cast %63 : vector<2x8x1024xbf16> to vector<128x128xbf16>
      %c0_53 = arith.constant 0 : index
      %c640 = arith.constant 640 : index
      %65 = vector.load %arg7[%c0_53, %c640] : memref<128x1152xbf16, #tpu.memory_space<vmem>>, vector<128x128xbf16>
      tpu.vector_store %arg7[%c0_53, %c640], %64 {strides = array<i32>} : memref<128x1152xbf16, #tpu.memory_space<vmem>>, vector<128x128xbf16>,
      %c0_54 = arith.constant 0 : index
      %c2 = arith.constant 2 : index
      %c0_55 = arith.constant 0 : index
      %66 = vector.load %arg6[%c0_54, %c2, %c0_55] : memref<2x10x1280xbf16, #tpu.memory_space<vmem>>, vector<2x8x1280xbf16>
      %67 = vector.extract_strided_slice %66 {offsets = [0, 0, 0], sizes = [2, 8, 1024], strides = [1, 1, 1]} : vector<2x8x1280xbf16> to vector<2x8x1024xbf16>
      %68 = vector.shape_cast %67 : vector<2x8x1024xbf16> to vector<128x128xbf16>
      %c0_56 = arith.constant 0 : index
      %c768 = arith.constant 768 : index
      %69 = vector.load %arg7[%c0_56, %c768] : memref<128x1152xbf16, #tpu.memory_space<vmem>>, vector<128x128xbf16>
      tpu.vector_store %arg7[%c0_56, %c768], %68 {strides = array<i32>} : memref<128x1152xbf16, #tpu.memory_space<vmem>>, vector<128x128xbf16>,
      %70 = vector.extract_strided_slice %66 {offsets = [0, 0, 128], sizes = [2, 8, 1024], strides = [1, 1, 1]} : vector<2x8x1280xbf16> to vector<2x8x1024xbf16>
      %71 = vector.shape_cast %70 : vector<2x8x1024xbf16> to vector<128x128xbf16>
      %c0_57 = arith.constant 0 : index
      %c896 = arith.constant 896 : index
      %72 = vector.load %arg7[%c0_57, %c896] : memref<128x1152xbf16, #tpu.memory_space<vmem>>, vector<128x128xbf16>
      tpu.vector_store %arg7[%c0_57, %c896], %71 {strides = array<i32>} : memref<128x1152xbf16, #tpu.memory_space<vmem>>, vector<128x128xbf16>,
      %73 = vector.extract_strided_slice %66 {offsets = [0, 0, 256], sizes = [2, 8, 1024], strides = [1, 1, 1]} : vector<2x8x1280xbf16> to vector<2x8x1024xbf16>
      %74 = vector.shape_cast %73 : vector<2x8x1024xbf16> to vector<128x128xbf16>
      %c0_58 = arith.constant 0 : index
      %c1024 = arith.constant 1024 : index
      %75 = vector.load %arg7[%c0_58, %c1024] : memref<128x1152xbf16, #tpu.memory_space<vmem>>, vector<128x128xbf16>
      tpu.vector_store %arg7[%c0_58, %c1024], %74 {strides = array<i32>} : memref<128x1152xbf16, #tpu.memory_space<vmem>>, vector<128x128xbf16>,
    } else {
    }
    %c0 = arith.constant 0 : index
    %c0_1 = arith.constant 0 : index
    %3 = vector.load %arg7[%c0, %c0_1] : memref<128x1152xbf16, #tpu.memory_space<vmem>>, vector<128x1152xbf16>
    %c0_2 = arith.constant 0 : index
    %c0_3 = arith.constant 0 : index
    %4 = vector.load %arg2[%c0_2, %c0_3] : memref<1152x128xbf16, #tpu.memory_space<vmem>>, vector<1152x128xbf16>
    %cst = arith.constant dense<0.000000e+00> : vector<128x128xf32>
    %5 = tpu.matmul %3, %4, %cst {dimension_numbers = #tpu.dot_dimension_numbers<[1], [0], [0], [1], [0, 0, 1, 1], [], []>} : vector<128x1152xbf16>, vector<1152x128xbf16>, vector<128x128xf32> -> vector<128x128xf32>
    %c0_4 = arith.constant 0 : index
    %c0_5 = arith.constant 0 : index
    %6 = vector.load %arg8[%c0_4, %c0_5] : memref<128x128xf32, #tpu.memory_space<vmem>>, vector<128x128xf32>
    tpu.vector_store %arg8[%c0_4, %c0_5], %5 {strides = array<i32>} : memref<128x128xf32, #tpu.memory_space<vmem>>, vector<128x128xf32>,
    %c0_6 = arith.constant 0 : index
    %c0_7 = arith.constant 0 : index
    %7 = vector.load %arg8[%c0_6, %c0_7] : memref<128x128xf32, #tpu.memory_space<vmem>>, vector<128x128xf32>
    %cst_8 = arith.constant dense<0.000000e+00> : vector<128xf32>
    %8 = vector.multi_reduction <add>, %7, %cst_8 [0] : vector<128x128xf32> to vector<128xf32>
    %9 = vector.shape_cast %8 : vector<128xf32> to vector<1x128xf32>
    %10 = arith.mulf %7, %7 : vector<128x128xf32>
    %cst_9 = arith.constant dense<0.000000e+00> : vector<128xf32>
    %11 = vector.multi_reduction <add>, %10, %cst_9 [0] : vector<128x128xf32> to vector<128xf32>
    %12 = vector.shape_cast %11 : vector<128xf32> to vector<1x128xf32>
    %cst_10 = arith.constant 7.812500e-03 : f32
    %13 = vector.broadcast %cst_10 : f32 to vector<1x128xf32>
    %14 = arith.mulf %9, %13 : vector<1x128xf32>
    %cst_11 = arith.constant 7.812500e-03 : f32
    %15 = vector.broadcast %cst_11 : f32 to vector<1x128xf32>
    %16 = arith.mulf %12, %15 : vector<1x128xf32>
    %17 = arith.mulf %14, %14 : vector<1x128xf32>
    %18 = arith.subf %16, %17 : vector<1x128xf32>
    %cst_12 = arith.constant 0.000000e+00 : f32
    %19 = vector.broadcast %cst_12 : f32 to vector<1x128xf32>
    %20 = arith.maximumf %18, %19 : vector<1x128xf32>
    %cst_13 = arith.constant 9.99999974E-6 : f32
    %21 = vector.broadcast %cst_13 : f32 to vector<1x128xf32>
    %22 = arith.addf %20, %21 : vector<1x128xf32>
    %23 = math.rsqrt %22 : vector<1x128xf32>
    %c0_14 = arith.constant 0 : index
    %c0_15 = arith.constant 0 : index
    %24 = vector.load %arg3[%c0_14, %c0_15] : memref<1x128xf32, #tpu.memory_space<vmem>>, vector<1x128xf32>
    %25 = arith.mulf %23, %24 : vector<1x128xf32>
    %c0_16 = arith.constant 0 : index
    %c0_17 = arith.constant 0 : index
    %26 = vector.load %arg4[%c0_16, %c0_17] : memref<1x128xf32, #tpu.memory_space<vmem>>, vector<1x128xf32>
    %27 = arith.mulf %14, %25 : vector<1x128xf32>
    %28 = arith.subf %26, %27 : vector<1x128xf32>
    %29 = vector.broadcast %25 : vector<1x128xf32> to vector<128x128xf32>
    %30 = arith.mulf %7, %29 : vector<128x128xf32>
    %31 = vector.broadcast %28 : vector<1x128xf32> to vector<128x128xf32>
    %32 = arith.addf %30, %31 : vector<128x128xf32>
    %cst_18 = arith.constant 0.000000e+00 : f32
    %33 = vector.broadcast %cst_18 : f32 to vector<128x128xf32>
    %34 = arith.maximumf %32, %33 : vector<128x128xf32>
    %35 = vector.shape_cast %34 : vector<128x128xf32> to vector<2x8x8x128xf32>
    %c0_19 = arith.constant 0 : index
    %c0_20 = arith.constant 0 : index
    %c0_21 = arith.constant 0 : index
    %c0_22 = arith.constant 0 : index
    %36 = vector.load %arg5[%c0_19, %c0_20, %c0_21, %c0_22] : memref<2x8x8x128xf32, #tpu.memory_space<vmem>>, vector<2x8x8x128xf32>
    tpu.vector_store %arg5[%c0_19, %c0_20, %c0_21, %c0_22], %35 {strides = array<i32>} : memref<2x8x8x128xf32, #tpu.memory_space<vmem>>, vector<2x8x8x128xf32>,
    return
  }
  func.func @transform_0(%arg0: i32) -> (i32, i32, i32, i32) {
    %c0_i32 = arith.constant 0 : i32
    %c0_i32_0 = arith.constant 0 : i32
    %c0_i32_1 = arith.constant 0 : i32
    %c0_i32_2 = arith.constant 0 : i32
    %c0_i32_3 = arith.constant 0 : i32
    return %c0_i32, %c0_i32_0, %c0_i32_1, %c0_i32_2 : i32, i32, i32, i32
  }
  func.func @transform_1(%arg0: i32) -> (i32, i32) {
    %c0_i32 = arith.constant 0 : i32
    %c0_i32_0 = arith.constant 0 : i32
    return %c0_i32, %arg0 : i32, i32
  }
  func.func @transform_2(%arg0: i32) -> (i32, i32) {
    %c0_i32 = arith.constant 0 : i32
    %c0_i32_0 = arith.constant 0 : i32
    return %c0_i32, %arg0 : i32, i32
  }
  func.func @transform_3(%arg0: i32) -> (i32, i32) {
    %c0_i32 = arith.constant 0 : i32
    %c0_i32_0 = arith.constant 0 : i32
    return %c0_i32, %arg0 : i32, i32
  }
  func.func @transform_4(%arg0: i32) -> (i32, i32, i32, i32) {
    %c0_i32 = arith.constant 0 : i32
    %c0_i32_0 = arith.constant 0 : i32
    %c0_i32_1 = arith.constant 0 : i32
    %c0_i32_2 = arith.constant 0 : i32
    return %c0_i32, %c0_i32_0, %c0_i32_1, %arg0 : i32, i32, i32, i32
  }
}

</mosaic_0001>

<bundles_post_ra>
// kernel: down_forward.2
= control target key start
LH: loop header
LB: loop body
LE: loop exit
PB: predicated region body
PF: predicated region fallthrough
CT: control target
= control target key end

     0   :  { %s863_s1 = inlined_call_operand.vmem [shape: bf16[128,128], index: 1, kind: input, shape index: {}]   ;;  %s864_s0 = inlined_call_operand.vmem [shape: bf16[128,128], index: 0, kind: input, shape index: {}]   ;;  %s865_s2 = inlined_call_operand.vmem [shape: f32[1,128], index: 2, kind: input, shape index: {}]   ;;  %s866_s3 = inlined_call_operand.vmem [shape: f32[1,128], index: 3, kind: input, shape index: {}]   ;;  %s867_s4 = inlined_call_operand.vmem [shape: bf16[128,128], index: 4, kind: output, shape index: {}]  }
   0x1   :  { %v646_v0 = vld [vmem:[%s863_s1] sm:$0xff]   ;;  %v647_v1 = vld [vmem:[%s863_s1 + $0x8] sm:$0xff]   ;;  %v648_v2 = vld [vmem:[%s863_s1 + $0x10] sm:$0xff]  }
   0x2   :  { %598 = vmatprep.subr.bf16.mxu0 %v646_v0  ;;  %630 = vmatprep.subr.bf16.mxu1 %v646_v0  ;;  %v649_v3 = vld [vmem:[%s863_s1 + $0x18] sm:$0xff]   ;;  %v654_v4 = vld [vmem:[%s864_s0] sm:$0xff]   ;;  %v651_v7 = vld [vmem:[%s863_s1 + $0x28] sm:$0xff]  }
   0x3   :  { %599 = vmatpush3.bf16.msra.mxu0 %v646_v0  ;;  %638 = vmatpush3.bf16.msra.mxu1 %v646_v0  ;;  %v650_v5 = vld [vmem:[%s863_s1 + $0x20] sm:$0xff]   ;;  %v652_v8 = vld [vmem:[%s863_s1 + $0x30] sm:$0xff]   ;;  %v653_v9 = vld [vmem:[%s863_s1 + $0x38] sm:$0xff]  }
   0x4   :  { %600 = vmatprep.subr.bf16.mxu0 %v647_v1  ;;  %631 = vmatprep.subr.bf16.mxu1 %v647_v1  ;;  %v658_v6 = vld [vmem:[%s864_s0 + $0x20] sm:$0xff]   ;;  %v655_v10 = vld [vmem:[%s864_s0 + $0x8] sm:$0xff]   ;;  %v656_v12 = vld [vmem:[%s864_s0 + $0x10] sm:$0xff]  }
   0x5   :  { %614 = vmatprep.mubr.bf16.mxu0 %v654_v4  ;;  %622 = vmatprep.mubr.bf16.mxu1 %v658_v6  ;;  %v659_v11 = vld [vmem:[%s864_s0 + $0x28] sm:$0xff]   ;;  %v660_v13 = vld [vmem:[%s864_s0 + $0x30] sm:$0xff]   ;;  %v657_v14 = vld [vmem:[%s864_s0 + $0x18] sm:$0xff]  }
   0x6   :  { %v661_v15 = vld [vmem:[%s864_s0 + $0x38] sm:$0xff]  }
   0x7   :  { %601 = vmatpush3.bf16.msra.mxu0 %v647_v1  ;;  %639 = vmatpush3.bf16.msra.mxu1 %v647_v1 }
   0x8   :  { %602 = vmatprep.subr.bf16.mxu0 %v648_v2  ;;  %632 = vmatprep.subr.bf16.mxu1 %v648_v2 }
   0xb   :  { %603 = vmatpush3.bf16.msra.mxu0 %v648_v2  ;;  %640 = vmatpush3.bf16.msra.mxu1 %v648_v2 }
   0xc   :  { %604 = vmatprep.subr.bf16.mxu0 %v649_v3  ;;  %633 = vmatprep.subr.bf16.mxu1 %v649_v3 }
   0xf   :  { %605 = vmatpush3.bf16.msra.mxu0 %v649_v3  ;;  %641 = vmatpush3.bf16.msra.mxu1 %v649_v3 }
  0x10   :  { %606 = vmatprep.subr.bf16.mxu0 %v650_v5  ;;  %634 = vmatprep.subr.bf16.mxu1 %v650_v5 }
  0x13   :  { %607 = vmatpush3.bf16.msra.mxu0 %v650_v5  ;;  %642 = vmatpush3.bf16.msra.mxu1 %v650_v5 }
  0x14   :  { %608 = vmatprep.subr.bf16.mxu0 %v651_v7  ;;  %635 = vmatprep.subr.bf16.mxu1 %v651_v7 }
  0x17   :  { %609 = vmatpush3.bf16.msra.mxu0 %v651_v7  ;;  %643 = vmatpush3.bf16.msra.mxu1 %v651_v7 }
  0x18   :  { %610 = vmatprep.subr.bf16.mxu0 %v652_v8  ;;  %636 = vmatprep.subr.bf16.mxu1 %v652_v8 }
  0x1b   :  { %611 = vmatpush3.bf16.msra.mxu0 %v652_v8  ;;  %644 = vmatpush3.bf16.msra.mxu1 %v652_v8 }
  0x1c   :  { %612 = vmatprep.subr.bf16.mxu0 %v653_v9  ;;  %637 = vmatprep.subr.bf16.mxu1 %v653_v9 }
  0x1f   :  { %613 = vmatpush3.bf16.msra.mxu0 %v653_v9  ;;  %645 = vmatpush3.bf16.msra.mxu1 %v653_v9 }
  0x22   :  { %615 = vmatmul.mubr.bf16.vlgmr.msra.gmra.mrb[0].mxu0 %v655_v10  ;;  %623 = vmatmul.mubr.bf16.vlgmr.msra.gmra.mrb[0].mxu1 %v659_v11 }
  0x23   :  { %618 = vmatprep.mubr.bf16.mxu0 %v656_v12  ;;  %626 = vmatprep.mubr.bf16.mxu1 %v660_v13 }
  0x2a   :  { %619 = vmatmul.mubr.bf16.gmra.mrb[4].mxu0 %v657_v14  ;;  %627 = vmatmul.mubr.bf16.gmra.mrb[4].mxu1 %v661_v15 }
  0xf5   :  { %v737_v16 = vpop.f32.mrb[0].mxu0  ;;  %v739_v17 = vpop.f32.mrb[0].mxu1 }
  0xf6   :  { %v741_v18 = vpop.f32.mrb[1].mxu0  ;;  %v743_v19 = vpop.f32.mrb[1].mxu1  ;;  %v298_v27 = vmul.f32 %v737_v16, %v737_v16  ;;  %v306_v59 = vmul.f32 %v739_v17, %v739_v17 }
  0xf7   :  { %v745_v20 = vpop.f32.mrb[2].mxu0  ;;  %v747_v21 = vpop.f32.mrb[2].mxu1  ;;  %v296_v24 = vmul.f32 %v741_v18, %v741_v18  ;;  %v304_v53 = vmul.f32 %v743_v19, %v743_v19 }
  0xf8   :  { %v749_v22 = vpop.f32.mrb[3].mxu0  ;;  %v751_v23 = vpop.f32.mrb[3].mxu1  ;;  %v299_v30 = vmul.f32 %v745_v20, %v745_v20  ;;  %v307_v62 = vmul.f32 %v747_v21, %v747_v21 }
  0xf9   :  { %v275_v25 = vadd.f32 %v749_v22, %v741_v18  ;;  %v297_v26 = vmul.f32 %v749_v22, %v749_v22  ;;  %v305_v58 = vmul.f32 %v751_v23, %v751_v23 }
  0xfb   :  { %v276_v28 = vadd.f32 %v737_v16, %v275_v25  ;;  %v312_v29 = vadd.f32 %v297_v26, %v296_v24 }
  0xfd   :  { %v313_v31 = vadd.f32 %v312_v29, %v298_v27  ;;  %v764_v32 = vpop.f32.mrb[4].mxu0  ;;  %v277_v33 = vadd.f32 %v745_v20, %v276_v28  ;;  %v767_v34 = vpop.f32.mrb[4].mxu1 }
  0xfe   :  { %v769_v35 = vpop.f32.mrb[5].mxu0  ;;  %v771_v36 = vpop.f32.mrb[5].mxu1  ;;  %v302_v47 = vmul.f32 %v764_v32, %v764_v32  ;;  %v310_v7 = vmul.f32 %v767_v34, %v767_v34 }
  0xff   :  { %v278_v37 = vadd.f32 %v277_v33, %v769_v35  ;;  %v300_v38 = vmul.f32 %v769_v35, %v769_v35  ;;  %v314_v39 = vadd.f32 %v313_v31, %v299_v30  ;;  %v776_v40 = vpop.f32.mrb[6].mxu0  ;;  %v778_v41 = vpop.f32.mrb[6].mxu1  ;;  %v308_v1 = vmul.f32 %v771_v36, %v771_v36 }
 0x100   :  { %v780_v42 = vpop.f32.mrb[7].mxu0  ;;  %v782_v43 = vpop.f32.mrb[7].mxu1  ;;  %v303_v50 = vmul.f32 %v776_v40, %v776_v40  ;;  %v311_v10 = vmul.f32 %v778_v41, %v778_v41 }
 0x101   :  { %v315_v44 = vadd.f32 %v314_v39, %v300_v38  ;;  %v279_v45 = vadd.f32 %v278_v37, %v780_v42  ;;  %v301_v46 = vmul.f32 %v780_v42, %v780_v42  ;;  %v309_v6 = vmul.f32 %v782_v43, %v782_v43 }
 0x103   :  { %v280_v48 = vadd.f32 %v764_v32, %v279_v45  ;;  %v316_v49 = vadd.f32 %v315_v44, %v301_v46 }
 0x105   :  { %v317_v51 = vadd.f32 %v316_v49, %v302_v47  ;;  %v281_v52 = vadd.f32 %v776_v40, %v280_v48  ;;  %v345_v48 = vlaneseq }
 0x107   :  { %v282_v54 = vadd.f32 %v281_v52, %v743_v19  ;;  %v318_v55 = vadd.f32 %v317_v51, %v303_v50  ;;  %v346_v49 = vshrl.u32 %v345_v48, 7  ;;  %v340_v50 = vld [vmem:[%s865_s2] sm:$0x1] }
 0x109   :  { %v319_v56 = vadd.f32 %v318_v55, %v304_v53  ;;  %v283_v57 = vadd.f32 %v282_v54, %v751_v23  ;;  %v347_v51 = vsub.s32 0, %v346_v49  ;;  %v342_v54 = vld [vmem:[%s866_s3] sm:$0x1] }
 0x10b   :  { %v284_v60 = vadd.f32 %v739_v17, %v283_v57  ;;  %v320_v61 = vadd.f32 %v319_v56, %v305_v58 }
 0x10d   :  { %v321_v63 = vadd.f32 %v320_v61, %v306_v59  ;;  %v285_v0 = vadd.f32 %v747_v21, %v284_v60 }
 0x10f   :  { %v286_v2 = vadd.f32 %v285_v0, %v771_v36  ;;  %v322_v3 = vadd.f32 %v321_v63, %v307_v62 }
 0x111   :  { %v323_v4 = vadd.f32 %v322_v3, %v308_v1  ;;  %v287_v5 = vadd.f32 %v286_v2, %v782_v43 }
 0x113   :  { %v288_v8 = vadd.f32 %v767_v34, %v287_v5  ;;  %v324_v9 = vadd.f32 %v323_v4, %v309_v6 }
 0x115   :  { %v289_v11 = vadd.f32 %v778_v41, %v288_v8  ;;  %v325_v12 = vadd.f32 %v324_v9, %v310_v7 }
 0x117   :  { %v290_v13 = vrot.slane %v289_v11, 4  ;;  %v326_v14 = vadd.f32 %v325_v12, %v311_v10 }
 0x119   :  { %v291_v15 = vadd.f32 %v290_v13, %v289_v11  ;;  %v327_v24 = vrot.slane %v326_v14, 4 }
 0x11b   :  { %v292_v25 = vrot.slane %v291_v15, 2  ;;  %v328_v26 = vadd.f32 %v327_v24, %v326_v14 }
 0x11d   :  { %v293_v27 = vadd.f32 %v292_v25, %v291_v15  ;;  %v329_v28 = vrot.slane %v328_v26, 2 }
 0x11f   :  { %v294_v29 = vrot.slane %v293_v27, 1  ;;  %v330_v30 = vadd.f32 %v329_v28, %v328_v26 }
 0x121   :  { %v295_v31 = vadd.f32 %v294_v29, %v293_v27  ;;  %v331_v33 = vrot.slane %v330_v30, 1 }
 0x123   :  { %v332_v37 = vadd.f32 %v331_v33, %v330_v30  ;;  %v333_v38 = vmul.f32 0.0078125, %v295_v31 }
 0x125   :  { %v334_v39 = vmul.f32 0.0078125, %v332_v37  ;;  %v335_v44 = vmul.f32 %v333_v38, %v333_v38 }
 0x127   :  { %v336_v45 = vsub.f32 %v334_v39, %v335_v44 }
 0x129   :  { %v337_v46 = vmax.f32 %v336_v45, 0.0 }
 0x12b   :  { %v338_v47 = vadd.f32 1e-05, %v337_v46 }
 0x12d   :  { %662 = vrsqrt.f32 %v338_v47 }
 0x137   :  { %v663_v52 = vpop.eup %662 }
 0x138   :  { %v341_v53 = vmul.f32 %v663_v52, %v340_v50 }
 0x13a   :  { %v343_v55 = vmul.f32 %v341_v53, %v333_v38  ;;  %v348_v56 = vrot.slane %v341_v53, %v347_v51 }
 0x13c   :  { %v344_v57 = vsub.f32 %v342_v54, %v343_v55  ;;  %v349_v58 = vmul.f32 %v348_v56, %v741_v18  ;;  %v350_v59 = vmul.f32 %v348_v56, %v749_v22  ;;  %v351_v60 = vmul.f32 %v737_v16, %v348_v56 }
 0x13d   :  { %v352_v61 = vmul.f32 %v745_v20, %v348_v56  ;;  %v353_v62 = vmul.f32 %v348_v56, %v769_v35  ;;  %v354_v63 = vmul.f32 %v348_v56, %v780_v42  ;;  %v355_v0 = vmul.f32 %v764_v32, %v348_v56 }
 0x13e   :  { %v356_v1 = vmul.f32 %v776_v40, %v348_v56  ;;  %v357_v2 = vmul.f32 %v348_v56, %v743_v19  ;;  %v358_v3 = vmul.f32 %v348_v56, %v751_v23  ;;  %v359_v18 = vmul.f32 %v739_v17, %v348_v56 }
 0x13f   :  { %v360_v22 = vmul.f32 %v747_v21, %v348_v56  ;;  %v361_v16 = vmul.f32 %v348_v56, %v771_v36  ;;  %v362_v20 = vmul.f32 %v348_v56, %v782_v43  ;;  %v363_v35 = vmul.f32 %v767_v34, %v348_v56 }
 0x140   :  { %v364_v42 = vmul.f32 %v778_v41, %v348_v56  ;;  %v369_v4 = vrot.slane %v344_v57, %v347_v51 }
 0x142   :  { %v371_v32 = vadd.f32 %v369_v4, %v349_v58  ;;  %v372_v5 = vadd.f32 %v369_v4, %v350_v59  ;;  %v373_v40 = vadd.f32 %v369_v4, %v351_v60  ;;  %v374_v6 = vadd.f32 %v369_v4, %v352_v61 }
 0x143   :  { %v375_v19 = vadd.f32 %v369_v4, %v353_v62  ;;  %v376_v7 = vadd.f32 %v369_v4, %v354_v63  ;;  %v377_v23 = vadd.f32 %v369_v4, %v355_v0  ;;  %v378_v8 = vadd.f32 %v369_v4, %v356_v1 }
 0x144   :  { %v379_v17 = vadd.f32 %v369_v4, %v357_v2  ;;  %v380_v9 = vadd.f32 %v369_v4, %v358_v3  ;;  %v381_v21 = vadd.f32 %v369_v4, %v359_v18  ;;  %v382_v10 = vadd.f32 %v369_v4, %v360_v22 }
 0x145   :  { %v383_v36 = vadd.f32 %v369_v4, %v361_v16  ;;  %v384_v11 = vadd.f32 %v369_v4, %v362_v20  ;;  %v385_v43 = vadd.f32 %v369_v4, %v363_v35  ;;  %v386_v12 = vadd.f32 %v369_v4, %v364_v42 }
 0x146   :  { %v387_v34 = vmax.f32 %v371_v32, 0.0  ;;  %v388_v13 = vmax.f32 %v372_v5, 0.0  ;;  %v389_v41 = vmax.f32 %v373_v40, 0.0  ;;  %v390_v14 = vmax.f32 %v374_v6, 0.0 }
 0x147   :  { %v391_v15 = vmax.f32 %v375_v19, 0.0  ;;  %v392_v24 = vmax.f32 %v376_v7, 0.0  ;;  %v393_v25 = vmax.f32 %v377_v23, 0.0  ;;  %v394_v26 = vmax.f32 %v378_v8, 0.0 }
 0x148   :  { %v395_v27 = vmax.f32 %v379_v17, 0.0  ;;  %v396_v28 = vmax.f32 %v380_v9, 0.0  ;;  %v397_v29 = vmax.f32 %v381_v21, 0.0  ;;  %v398_v30 = vmax.f32 %v382_v10, 0.0 }
 0x149   :  { %v399_v31 = vmax.f32 %v383_v36, 0.0  ;;  %v400_v33 = vmax.f32 %v384_v11, 0.0  ;;  %v401_v37 = vmax.f32 %v385_v43, 0.0  ;;  %v402_v38 = vmax.f32 %v386_v12, 0.0 }
 0x14a   :  { %v538_v39 = vpack.c.bf16 %v388_v13, %v387_v34  ;;  %v543_v44 = vpack.c.bf16 %v390_v14, %v389_v41  ;;  %v548_v45 = vpack.c.bf16 %v392_v24, %v391_v15  ;;  %v553_v46 = vpack.c.bf16 %v394_v26, %v393_v25 }
 0x14b   :  { %v558_v47 = vpack.c.bf16 %v396_v28, %v395_v27  ;;  %v563_v48 = vpack.c.bf16 %v398_v30, %v397_v29  ;;  %v568_v49 = vpack.c.bf16 %v400_v33, %v399_v31  ;;  %v573_v50 = vpack.c.bf16 %v402_v38, %v401_v37 }
 0x14c   :  { %539 = vst [vmem:[%s867_s4] sm:$0xff] %v538_v39   ;;  %575 = vst [vmem:[%s867_s4 + $0x8] sm:$0xff] %v543_v44  }
 0x14d   :  { %576 = vst [vmem:[%s867_s4 + $0x10] sm:$0xff] %v548_v45   ;;  %577 = vst [vmem:[%s867_s4 + $0x18] sm:$0xff] %v553_v46  }
 0x14e   :  { %578 = vst [vmem:[%s867_s4 + $0x20] sm:$0xff] %v558_v47   ;;  %579 = vst [vmem:[%s867_s4 + $0x28] sm:$0xff] %v563_v48  }
 0x14f   :  { %580 = vst [vmem:[%s867_s4 + $0x30] sm:$0xff] %v568_v49   ;;  %581 = vst [vmem:[%s867_s4 + $0x38] sm:$0xff] %v573_v50  }

// kernel: down_forward.3
= control target key start
LH: loop header
LB: loop body
LE: loop exit
PB: predicated region body
PF: predicated region fallthrough
CT: control target
= control target key end

     0   :  { %vm23_vm0 = vcmask 1040384   ;;  %vm26_vm1 = vcmask 1044484   ;;  %vm24_vm2 = vsmask.f32 256  ;;  %vm27_vm3 = vsmask.f32 4352  ;;  %s5852_s0 = inlined_call_operand.vmem [shape: bf16[2,8,8,128], index: 0, kind: input, shape index: {}]   ;;  %s5853_s1 = inlined_call_operand.vmem [shape: bf16[1152,128], index: 1, kind: input, shape index: {}]   ;;  %s5854_s2 = inlined_call_operand.vmem [shape: f32[1,128], index: 2, kind: input, shape index: {}]   ;;  %s5855_s3 = inlined_call_operand.vmem [shape: f32[1,128], index: 3, kind: input, shape index: {}]   ;;  %s5856_s4 = inlined_call_operand.hbm [shape: f32[2,8,8,128], index: 4, kind: output, shape index: {}]  }
   0x1   :  { %v4394_v0 = vld [vmem:[%s5853_s1 + $0x40] sm:$0xff]   ;;  %v4398_v4 = vld [vmem:[%s5853_s1 + $0x48] sm:$0xff]   ;;  %v4402_v8 = vld [vmem:[%s5853_s1 + $0x50] sm:$0xff]   ;;  %vm95_vm5 = vcmask 1043456   ;;  %vm296_vm6 = vcmask 1047556  }
   0x2   :  { %v4395_v1 = vld [vmem:[%s5853_s1] sm:$0xff]   ;;  %4070 = vmatprep.subr.bf16.mxu0 %v4394_v0  ;;  %v4399_v5 = vld [vmem:[%s5853_s1 + $0x8] sm:$0xff]   ;;  %v4403_v9 = vld [vmem:[%s5853_s1 + $0x10] sm:$0xff]   ;;  %vm60_vm8 = vsmask.f32 7938 }
   0x3   :  { %v4396_v2 = vld [vmem:[%s5853_s1 + $0xc0] sm:$0xff]   ;;  %4071 = vmatpush3.bf16.msra.mxu0 %v4395_v1  ;;  %v4400_v6 = vld [vmem:[%s5853_s1 + $0xc8] sm:$0xff]   ;;  %v4404_v10 = vld [vmem:[%s5853_s1 + $0xd0] sm:$0xff]   ;;  %vm62_vm10 = vsmask.f32 7954 }
   0x4   :  { %v4397_v3 = vld [vmem:[%s5853_s1 + $0x80] sm:$0xff]   ;;  %4134 = vmatprep.subr.bf16.mxu1 %v4396_v2  ;;  %4072 = vmatprep.subr.bf16.mxu0 %v4398_v4  ;;  %v4401_v7 = vld [vmem:[%s5853_s1 + $0x88] sm:$0xff]   ;;  %v4405_v11 = vld [vmem:[%s5853_s1 + $0x90] sm:$0xff]   ;;  %vm1158_vm12 = vsmask.f32 1284 }
   0x5   :  { %4135 = vmatpush3.bf16.msra.mxu1 %v4397_v3  ;;  %v4406_v12 = vld [vmem:[%s5853_s1 + $0x58] sm:$0xff]   ;;  %v4410_v16 = vld [vmem:[%s5853_s1 + $0x60] sm:$0xff]   ;;  %v4414_v20 = vld [vmem:[%s5853_s1 + $0x68] sm:$0xff]   ;;  %vm1160_vm14 = vsmask.f32 2312 }
   0x6   :  { %4136 = vmatprep.subr.bf16.mxu1 %v4400_v6  ;;  %v4407_v13 = vld [vmem:[%s5853_s1 + $0x18] sm:$0xff]   ;;  %v4411_v17 = vld [vmem:[%s5853_s1 + $0x20] sm:$0xff]   ;;  %v4415_v21 = vld [vmem:[%s5853_s1 + $0x28] sm:$0xff]  }
   0x7   :  { %4073 = vmatpush3.bf16.msra.mxu0 %v4399_v5  ;;  %v4408_v14 = vld [vmem:[%s5853_s1 + $0xd8] sm:$0xff]   ;;  %v4412_v18 = vld [vmem:[%s5853_s1 + $0xe0] sm:$0xff]   ;;  %v4416_v22 = vld [vmem:[%s5853_s1 + $0xe8] sm:$0xff]  }
   0x8   :  { %4074 = vmatprep.subr.bf16.mxu0 %v4402_v8  ;;  %v4409_v15 = vld [vmem:[%s5853_s1 + $0x98] sm:$0xff]   ;;  %v4413_v19 = vld [vmem:[%s5853_s1 + $0xa0] sm:$0xff]   ;;  %v4417_v23 = vld [vmem:[%s5853_s1 + $0xa8] sm:$0xff]  }
   0x9   :  { %4137 = vmatpush3.bf16.msra.mxu1 %v4401_v7  ;;  %v4418_v24 = vld [vmem:[%s5853_s1 + $0x70] sm:$0xff]   ;;  %v4422_v28 = vld [vmem:[%s5853_s1 + $0x78] sm:$0xff]   ;;  %v30_v32 = vld [vmem:[#allocation2] sm:$0x11] }
   0xa   :  { %4138 = vmatprep.subr.bf16.mxu1 %v4404_v10  ;;  %v4419_v25 = vld [vmem:[%s5853_s1 + $0x30] sm:$0xff]   ;;  %v4423_v29 = vld [vmem:[%s5853_s1 + $0x38] sm:$0xff]   ;;  %vm4625_vm4 = vmand %vm23_vm0, %vm24_vm2 }
   0xb   :  { %4075 = vmatpush3.bf16.msra.mxu0 %v4403_v9  ;;  %v4420_v26 = vld [vmem:[%s5853_s1 + $0xf0] sm:$0xff]   ;;  %v4424_v30 = vld [vmem:[%s5853_s1 + $0xf8] sm:$0xff]   ;;  %v33_v34 = vld [vmem:[#allocation2 + $0x8] sm:$0x11] }
   0xc   :  { %4076 = vmatprep.subr.bf16.mxu0 %v4406_v12  ;;  %v4421_v27 = vld [vmem:[%s5853_s1 + $0xb0] sm:$0xff]   ;;  %v4425_v31 = vld [vmem:[%s5853_s1 + $0xb8] sm:$0xff]   ;;  %vm28_vm7 = vmand %vm26_vm1, %vm27_vm3 }
   0xd   :  { %4139 = vmatpush3.bf16.msra.mxu1 %v4405_v11  ;;  %v36_v35 = vld [vmem:[#allocation2 + $0x10] sm:$0x11]  ;;  %v39_v36 = vld [vmem:[#allocation2 + $0x18] sm:$0x11]  ;;  %v42_v37 = vld [vmem:[#allocation2 + $0x20] sm:$0x11]  ;;  %v400_v11 = vlaneseq }
   0xe   :  { %4140 = vmatprep.subr.bf16.mxu1 %v4408_v14  ;;  %vm4632_vm9 = vmor %vm28_vm7, %vm4625_vm4  ;;  %v121_v39 = vld [vmem:[%s5852_s0] ss:$4 sm:$0xff]  ;;  %v3894_v40 = vld [vmem:[%s5852_s0 + $0x1] ss:$4 sm:$0xff] }
   0xf   :  { %4077 = vmatpush3.bf16.msra.mxu0 %v4407_v13  ;;  %v31_v41 = vsel %vm4632_vm9, 0, %v30_v32  ;;  %v34_v42 = vsel %vm4632_vm9, 0, %v33_v34  ;;  %v37_v43 = vsel %vm4632_vm9, 0, %v36_v35  ;;  %v40_v44 = vsel %vm4632_vm9, 0, %v39_v36  ;;  %v3896_v45 = vld [vmem:[%s5852_s0 + $0x2] ss:$4 sm:$0xff]  ;;  %vm4663_vm11 = vmand %vm95_vm5, %vm60_vm8 }
  0x10   :  { %4078 = vmatprep.subr.bf16.mxu0 %v4410_v16  ;;  %32 = vst [vmem:[#allocation2] sm:$0x11] %v31_v41  ;;  %35 = vst [vmem:[#allocation2 + $0x8] sm:$0x11] %v34_v42  ;;  %v43_v46 = vsel %vm4632_vm9, 0, %v42_v37  ;;  %v124_v47 = vshrl.u32 %v121_v39, 16 }
  0x11   :  { %4141 = vmatpush3.bf16.msra.mxu1 %v4409_v15  ;;  %38 = vst [vmem:[#allocation2 + $0x10] sm:$0x11] %v37_v43  ;;  %41 = vst [vmem:[#allocation2 + $0x18] sm:$0x11] %v40_v44  ;;  %v130_v48 = vshrl.u32 %v3894_v40, 16  ;;  %v136_v49 = vshrl.u32 %v3896_v45, 16 }
  0x12   :  { %4142 = vmatprep.subr.bf16.mxu1 %v4412_v18  ;;  %v3898_v50 = vld [vmem:[%s5852_s0 + $0x3] ss:$4 sm:$0xff]  ;;  %44 = vst [vmem:[#allocation2 + $0x20] sm:$0x11] %v43_v46  ;;  %v3916_v54 = vpack.c.b16 %v124_v47, %v121_v39  ;;  %vm297_vm13 = vmand %vm296_vm6, %vm62_vm10  ;;  %vm1162_vm6 = vsmask.f32 3340 }
  0x13   :  { %4079 = vmatpush3.bf16.msra.mxu0 %v4411_v17  ;;  %v142_v51 = vshrl.u32 %v3898_v50, 16  ;;  %v4426_v52 = vld [vmem:[%s5853_s1 + $0x140] sm:$0xff]   ;;  %v3917_v55 = vpack.c.b16 %v130_v48, %v3894_v40  ;;  %v3918_v56 = vpack.c.b16 %v136_v49, %v3896_v45  ;;  %vm4671_vm15 = vmor %vm297_vm13, %vm4663_vm11  ;;  %v4498_v18 = vmov 1966171168   ;;  %v65_v39 = vld [vmem:[#allocation2 + $0x28] sm:$0x11] }
  0x14   :  { %4080 = vmatprep.subr.bf16.mxu0 %v4414_v20  ;;  %v217_v58 = vshrl.u32 %v3916_v54, 16  ;;  %v220_v59 = vshll.u32 %v3916_v54, 16  ;;  %vm1159_vm3 = vmor %vm24_vm2, %vm1158_vm12  ;;  %vm1168_vm12 = vsmask.f32 6424  ;;  %v4431_v32 = vld [vmem:[%s5853_s1 + $0x1c0] sm:$0xff]  }
  0x15   :  { %4143 = vmatpush3.bf16.msra.mxu1 %v4413_v19  ;;  %v3919_v57 = vpack.c.b16 %v142_v51, %v3898_v50  ;;  %v224_v60 = vshrl.u32 %v3917_v55, 16  ;;  %v227_v61 = vshll.u32 %v3917_v55, 16  ;;  %v231_v63 = vshrl.u32 %v3918_v56, 16  ;;  %vm4680_vm5 = vmor %vm1159_vm3, %vm1160_vm14  ;;  %v68_v40 = vld [vmem:[#allocation2 + $0x30] sm:$0x11] }
  0x16   :  { %4144 = vmatprep.subr.bf16.mxu1 %v4416_v22  ;;  %v234_v0 = vshll.u32 %v3918_v56, 16  ;;  %v4676_v3 = vrot.slane %v217_v58, 7  ;;  %v398_v19 = vunpack.c.l.s4 %v4498_v18  ;;  %vm4694_vm2 = vmand %vm23_vm0, %vm60_vm8  ;;  %vm1166_vm8 = vsmask.f32 5396  ;;  %v71_v41 = vld [vmem:[#allocation2 + $0x38] sm:$0x11] }
  0x17   :  { %4081 = vmatpush3.bf16.msra.mxu0 %v4415_v21  ;;  %v238_v1 = vshrl.u32 %v3919_v57, 16  ;;  %v241_v2 = vshll.u32 %v3919_v57, 16  ;;  %v4678_v4 = vrot.slane %v224_v60, 7  ;;  %v97_v6 = vld [vmem:[#allocation2] sm:$0xf]  ;;  %v4684_v7 = vrot.slane %v231_v63, 7  ;;  %vm4704_vm7 = vmand %vm26_vm1, %vm62_vm10 }
  0x18   :  { %4082 = vmatprep.subr.bf16.mxu0 %v4418_v24  ;;  %v299_v9 = vld [vmem:[#allocation2 + $0x4] sm:$0xff]  ;;  %v302_v10 = vld [vmem:[#allocation2 + $0xc] sm:$0xff]  ;;  %v98_v12 = vsel %vm4663_vm11, 0, %v97_v6  ;;  %v222_v14 = vor.u32 %v220_v59, %v4676_v3  ;;  %v305_v16 = vld [vmem:[#allocation2 + $0x14] sm:$0xff]  ;;  %vm1164_vm1 = vsmask.f32 4368 }
  0x19   :  { %4145 = vmatpush3.bf16.msra.mxu1 %v4417_v23  ;;  %v4686_v8 = vrot.slane %v238_v1, 7  ;;  %v109_v13 = vld [vmem:[#allocation2 + $0x24] sm:$0xf]  ;;  %v229_v15 = vor.u32 %v227_v61, %v4678_v4  ;;  %v308_v17 = vld [vmem:[#allocation2 + $0x1c] sm:$0xff]  ;;  %99 = vst [vmem:[#allocation2] sm:$0xf] %v98_v12  ;;  %v236_v22 = vor.u32 %v234_v0, %v4684_v7  ;;  %vm1163_vm0 = vmor %vm4680_vm5, %vm1162_vm6 }
  0x1a   :  { %4146 = vmatprep.subr.bf16.mxu1 %v4420_v26  ;;  %v110_v21 = vsel %vm4663_vm11, 0, %v109_v13  ;;  %vm4725_vm10 = vmor %vm4704_vm7, %vm4694_vm2  ;;  %v244_v34 = vrot.slane %v4676_v3, 4  ;;  %vm1170_vm14 = vsmask.f32 7452  ;;  %v245_v36 = vrot.slane %v4678_v4, 4 }
  0x1b   :  { %4083 = vmatpush3.bf16.msra.mxu0 %v4419_v25  ;;  %v243_v23 = vor.u32 %v241_v2, %v4686_v8  ;;  %111 = vst [vmem:[#allocation2 + $0x24] sm:$0xf] %v110_v21  ;;  %v300_v25 = vsel %vm4671_vm15, %v222_v14, %v299_v9  ;;  %v303_v26 = vsel %vm4671_vm15, %v229_v15, %v302_v10  ;;  %vm1165_vm13 = vmor %vm1163_vm0, %vm1164_vm1  ;;  %v247_v35 = vrot.slane %v4686_v8, 4 }
  0x1c   :  { %4084 = vmatprep.subr.bf16.mxu0 %v4422_v28  ;;  %301 = vst [vmem:[#allocation2 + $0x4] sm:$0xff] %v300_v25  ;;  %304 = vst [vmem:[#allocation2 + $0xc] sm:$0xff] %v303_v26  ;;  %vm647_vm3 = vcmask 1046528   ;;  %v66_v43 = vsel %vm4725_vm10, 0, %v65_v39  ;;  %v69_v44 = vsel %vm4725_vm10, 0, %v68_v40  ;;  %v72_v45 = vsel %vm4725_vm10, 0, %v71_v41 }
  0x1d   :  { %4147 = vmatpush3.bf16.msra.mxu1 %v4421_v27  ;;  %v306_v27 = vsel %vm4671_vm15, %v236_v22, %v305_v16  ;;  %v309_v28 = vsel %vm4671_vm15, %v243_v23, %v308_v17  ;;  %vm4739_vm5 = vmor %vm1165_vm13, %vm1166_vm8  ;;  %v246_v46 = vrot.slane %v4684_v7, 4  ;;  %67 = vst [vmem:[#allocation2 + $0x28] sm:$0x11] %v66_v43 }
  0x1e   :  { %4148 = vmatprep.subr.bf16.mxu1 %v4424_v30  ;;  %307 = vst [vmem:[#allocation2 + $0x14] sm:$0xff] %v306_v27  ;;  %310 = vst [vmem:[#allocation2 + $0x1c] sm:$0xff] %v309_v28  ;;  %v4719_v30 = vshrl.u32 %v400_v11, 7 }
  0x1f   :  { %4085 = vmatpush3.bf16.msra.mxu0 %v4423_v29  ;;  %v399_v29 = vunpack.c.0.s8 %v398_v19  ;;  %70 = vst [vmem:[#allocation2 + $0x30] sm:$0x11] %v69_v44  ;;  %73 = vst [vmem:[#allocation2 + $0x38] sm:$0x11] %v72_v45 }
  0x20   :  { %4198 = vmatprep.subr.bf16.mxu0 %v4426_v52  ;;  %5875 = vst [vmem:[#allocation8_spill] sm:$0xff] %v4719_v30  ;;  %vm4765_vm6 = vmor %vm4739_vm5, %vm1168_vm12 }
  0x21   :  { %4149 = vmatpush3.bf16.msra.mxu1 %v4425_v31  ;;  %v4736_v37 = vsub.s32 %v399_v29, %v4719_v30  ;;  %vm4809_vm2 = vmor %vm4765_vm6, %vm1170_vm14 }
  0x22   :  { %4262 = vmatprep.subr.bf16.mxu1 %v4431_v32 }
  0x23   :  { %v3924_v47 = vld.sshfl [vmem:[#allocation2] sm:$0xff pattern:$0x75316420]  ;;  %v4750_v48 = vld.sshfl [vmem:[#allocation2 + $0x8] sm:$0xff pattern:$0x75316420] }
  0x24   :  { %v393_v51 = vcombine.low %v3924_v47, %v4750_v48  ;;  %v394_v52 = vcombine.high %v3924_v47, %v4750_v48 }
  0x25   :  { %v4752_v49 = vld.sshfl [vmem:[#allocation2 + $0x10] sm:$0xff pattern:$0x75316420]  ;;  %v4754_v50 = vld.sshfl [vmem:[#allocation2 + $0x18] sm:$0xff pattern:$0x75316420] }
  0x26   :  { %v4758_v54 = vld.sshfl [vmem:[#allocation2 + $0x20] sm:$0xff pattern:$0x75316420]  ;;  %v395_v55 = vcombine.low %v4752_v49, %v4754_v50  ;;  %v971_v57 = vcombine.high %v4752_v49, %v4754_v50  ;;  %v744_v58 = vcombine.low %v4750_v48, %v4752_v49  ;;  %v745_v59 = vcombine.high %v4750_v48, %v4752_v49  ;;  %v4429_v48 = vld [vmem:[%s5853_s1 + $0x108] sm:$0xff]  }
  0x27   :  { %v403_v60 = vrot.slane %v393_v51, %v4736_v37  ;;  %v597_v61 = vrot.slane %v4758_v54, %v4736_v37  ;;  %v4779_v63 = vrot.slane %v394_v52, %v4736_v37  ;;  %v1337_v0 = vcombine.high %v4758_v54, %v4758_v54 }
  0x28   :  { %v417_v1 = vrot.slane %v395_v55, %v4736_v37  ;;  %v4785_v2 = vrot.slane %v971_v57, %v4736_v37  ;;  %v746_v5 = vcombine.low %v4754_v50, %v4758_v54  ;;  %v4790_v6 = vrot.slane %v744_v58, %v4736_v37 }
  0x29   :  { %v4792_v9 = vcombine.high %v597_v61, %v597_v61  ;;  %v632_v10 = vrot.slane %v597_v61, 1  ;;  %v4795_v11 = vrot.slane %v1337_v0, %v4736_v37  ;;  %v1407_v12 = vshrl.u32 %v597_v61, 16 }
  0x2a   :  { %v425_v13 = vcombine.low %v403_v60, %v417_v1  ;;  %v4797_v14 = vcombine.high %v403_v60, %v417_v1  ;;  %v4801_v15 = vcombine.low %v4779_v63, %v4785_v2  ;;  %v4804_v16 = vrot.slane %v746_v5, %v4736_v37 }
  0x2b   :  { %v1412_v18 = vshll.u32 %v4795_v11, 16  ;;  %v634_v19 = vrot.slane %v4795_v11, 1  ;;  %v747_v20 = vcombine.high %v4754_v50, %v4758_v54  ;;  %v636_v54 = vrot.slane %v4792_v9, 1 }
  0x2c   :  { %v631_v21 = vrot.slane %v425_v13, 1  ;;  %v1173_v22 = vshrl.u32 %v425_v13, 16  ;;  %v1178_v23 = vshll.u32 %v4801_v15, 16  ;;  %v493_v24 = vunpack.c.l.b16 %v425_v13 }
  0x2d   :  { %v1414_v25 = vsel %vm4809_vm2, %v1407_v12, %v1412_v18  ;;  %v494_v26 = vunpack.c.h.b16 %v425_v13  ;;  %v4822_v27 = vcombine.low %v4790_v6, %v4804_v16  ;;  %v1181_v39 = vshrl.u32 %v4801_v15, 16 }
  0x2e   :  { %v648_v28 = vsel %vm647_vm3, %v631_v21, %v632_v10  ;;  %v1180_v29 = vsel %vm4809_vm2, %v1173_v22, %v1178_v23  ;;  %v1473_v32 = vrot.slane %v1414_v25, 1  ;;  %v633_v56 = vrot.slane %v4801_v15, 1 }
  0x2f   :  { %v656_v40 = vunpack.c.l.b16 %v648_v28  ;;  %v657_v41 = vunpack.c.h.b16 %v648_v28  ;;  %v1238_v42 = vunpack.c.l.b16 %v1180_v29  ;;  %v1239_v43 = vunpack.c.h.b16 %v1180_v29 }
  0x30   :  { %v1472_v44 = vrot.slane %v1180_v29, 1  ;;  %v495_v45 = vpack.i.b16 %v494_v26, %v493_v24  ;;  %v816_v47 = vunpack.c.l.b16 %v4822_v27  ;;  %v817_v51 = vunpack.c.h.b16 %v4822_v27 }
  0x31   :  { %v658_v52 = vpack.i.b16 %v657_v41, %v656_v40  ;;  %v1240_v55 = vpack.i.b16 %v1239_v43, %v1238_v42  ;;  %v1186_v57 = vshll.u32 %v4797_v14, 16  ;;  %v649_v26 = vsel %vm647_vm3, %v633_v56, %v634_v19  ;;  %v4427_v19 = vld [vmem:[%s5853_s1 + $0x100] sm:$0xff]  }
  0x32   :  { %v4833_v58 = vsel %vm647_vm3, %v1472_v44, %v1473_v32  ;;  %v496_v60 = vunpack.c.l.b16 %v495_v45  ;;  %v497_v61 = vunpack.c.h.b16 %v495_v45  ;;  %v818_v0 = vpack.i.b16 %v817_v51, %v816_v47 }
  0x33   :  { %v659_v1 = vunpack.c.l.b16 %v658_v52  ;;  %v660_v5 = vunpack.c.h.b16 %v658_v52  ;;  %v1241_v10 = vunpack.c.l.b16 %v1240_v55  ;;  %v1242_v12 = vunpack.c.h.b16 %v1240_v55 }
  0x34   :  { %v1496_v13 = vunpack.c.l.b16 %v4833_v58  ;;  %v1497_v18 = vunpack.c.h.b16 %v4833_v58  ;;  %v498_v21 = vpack.i.b16 %v497_v61, %v496_v60  ;;  %v819_v22 = vunpack.c.l.b16 %v818_v0 }
  0x35   :  { %v661_v23 = vpack.i.b16 %v660_v5, %v659_v1  ;;  %v1243_v24 = vpack.i.b16 %v1242_v12, %v1241_v10  ;;  %v820_v25 = vunpack.c.h.b16 %v818_v0  ;;  %v666_v32 = vunpack.c.l.b16 %v649_v26  ;;  %v4428_v12 = vld [vmem:[%s5853_s1 + $0x148] sm:$0xff]  }
  0x36   :  { %v499_v28 = vunpack.c.l.b16 %v498_v21  ;;  %v500_v29 = vunpack.c.h.b16 %v498_v21  ;;  %v667_v40 = vunpack.c.h.b16 %v649_v26  ;;  %v4840_v52 = vsel %vm4809_vm2, %v1181_v39, %v1186_v57 }
  0x37   :  { %v662_v41 = vunpack.c.l.b16 %v661_v23  ;;  %v663_v42 = vunpack.c.h.b16 %v661_v23  ;;  %v1244_v43 = vunpack.c.l.b16 %v1243_v24  ;;  %v1245_v44 = vunpack.c.h.b16 %v1243_v24  ;;  %v4433_v23 = vld [vmem:[%s5853_s1 + $0x180] sm:$0xff]  }
  0x38   :  { %v501_v45 = vpack.i.b16 %v500_v29, %v499_v28  ;;  %v821_v47 = vpack.i.b16 %v820_v25, %v819_v22  ;;  %v668_v51 = vpack.i.b16 %v667_v40, %v666_v32  ;;  %v1248_v56 = vunpack.c.l.b16 %v4840_v52 }
  0x39   :  { %v664_v55 = vpack.i.b16 %v663_v42, %v662_v41  ;;  %v1246_v60 = vpack.i.b16 %v1245_v44, %v1244_v43  ;;  %v1249_v61 = vunpack.c.h.b16 %v4840_v52  ;;  %v503_v21 = vunpack.c.l.b16 %v4801_v15 }
  0x3a   :  { %v822_v0 = vunpack.c.l.b16 %v821_v47  ;;  %v823_v1 = vunpack.c.h.b16 %v821_v47  ;;  %v669_v5 = vunpack.c.l.b16 %v668_v51  ;;  %v670_v10 = vunpack.c.h.b16 %v668_v51  ;;  %v4437_v47 = vld [vmem:[%s5853_s1 + $0x188] sm:$0xff]   ;;  %v4439_v51 = vld [vmem:[%s5853_s1 + $0x1d0] sm:$0xff]  }
  0x3b   :  { %3248 = vmatprep.mubr.bf16.mxu0 %v664_v55  ;;  %3345 = vmatprep.mubr.bf16.mxu1 %v1246_v60  ;;  %v1250_v39 = vpack.i.b16 %v1249_v61, %v1248_v56  ;;  %v504_v22 = vunpack.c.h.b16 %v4801_v15  ;;  %v4860_v26 = vrot.slane %v745_v59, %v4736_v37  ;;  %v4866_v28 = vrot.slane %v747_v20, %v4736_v37  ;;  %v4435_v15 = vld [vmem:[%s5853_s1 + $0x1c8] sm:$0xff]   ;;  %v4430_v20 = vld [vmem:[%s5853_s1 + $0x150] sm:$0xff]  }
  0x3c   :  { %3249 = vmatmul.mubr.bf16.vlgmr.msra.gmra.mrb[0].mxu0 %v501_v45  ;;  %v824_v24 = vpack.i.b16 %v823_v1, %v822_v0  ;;  %v671_v25 = vpack.i.b16 %v670_v10, %v669_v5  ;;  %v635_v44 = vrot.slane %v4797_v14, 1  ;;  %v4432_v45 = vld [vmem:[%s5853_s1 + $0x110] sm:$0xff]   ;;  %v4896_v56 = vcombine.high %v4779_v63, %v4785_v2 }
  0x3d   :  { %4199 = vmatpush3.bf16.msra.mxu0 %v4427_v19  ;;  %v1251_v29 = vunpack.c.l.b16 %v1250_v39  ;;  %v1252_v32 = vunpack.c.h.b16 %v1250_v39  ;;  %v505_v40 = vpack.i.b16 %v504_v22, %v503_v21  ;;  %v4876_v50 = vcombine.low %v4860_v26, %v4866_v28  ;;  %v4434_v22 = vld [vmem:[%s5853_s1 + $0x158] sm:$0xff]  }
  0x3e   :  { %3346 = vmatmul.mubr.bf16.vlgmr.msra.gmra.mrb[0].mxu1 %v824_v24  ;;  %v672_v49 = vunpack.c.l.b16 %v671_v25  ;;  %v673_v59 = vunpack.c.h.b16 %v671_v25  ;;  %4200 = vmatprep.subr.bf16.mxu0 %v4428_v12  ;;  %v650_v5 = vsel %vm647_vm3, %v635_v44, %v636_v54  ;;  %v1189_v21 = vshrl.u32 %v4797_v14, 16  ;;  %v4441_v25 = vld [vmem:[%s5853_s1 + $0x190] sm:$0xff]  }
  0x3f   :  { %v1253_v41 = vpack.i.b16 %v1252_v32, %v1251_v29  ;;  %v506_v42 = vunpack.c.l.b16 %v505_v40  ;;  %v507_v43 = vunpack.c.h.b16 %v505_v40  ;;  %4263 = vmatpush3.bf16.msra.mxu1 %v4433_v23  ;;  %v826_v60 = vunpack.c.l.b16 %v4876_v50 }
  0x40   :  { %v674_v55 = vpack.i.b16 %v673_v59, %v672_v49  ;;  %v827_v19 = vunpack.c.h.b16 %v4876_v50  ;;  %4264 = vmatprep.subr.bf16.mxu1 %v4435_v15  ;;  %v676_v12 = vunpack.c.l.b16 %v650_v5  ;;  %v677_v39 = vunpack.c.h.b16 %v650_v5 }
  0x41   :  { %v1254_v61 = vunpack.c.l.b16 %v1253_v41  ;;  %v1255_v0 = vunpack.c.h.b16 %v1253_v41  ;;  %v508_v1 = vpack.i.b16 %v507_v43, %v506_v42  ;;  %4201 = vmatpush3.bf16.msra.mxu0 %v4429_v48  ;;  %v1194_v24 = vshll.u32 %v4896_v56, 16  ;;  %v4443_v48 = vld [vmem:[%s5853_s1 + $0x1d8] sm:$0xff]  }
  0x42   :  { %3256 = vmatprep.mubr.bf16.mxu0 %v674_v55  ;;  %v828_v10 = vpack.i.b16 %v827_v19, %v826_v60  ;;  %4202 = vmatprep.subr.bf16.mxu0 %v4430_v20  ;;  %v678_v32 = vpack.i.b16 %v677_v39, %v676_v12  ;;  %v513_v40 = vunpack.c.l.b16 %v4797_v14  ;;  %v514_v54 = vunpack.c.h.b16 %v4797_v14  ;;  %v4436_v41 = vld [vmem:[%s5853_s1 + $0x118] sm:$0xff]   ;;  %v74_v39 = vld [vmem:[#allocation2 + $0x40] sm:$0x11] }
  0x43   :  { %v1256_v63 = vpack.i.b16 %v1255_v0, %v1254_v61  ;;  %v509_v2 = vunpack.c.l.b16 %v508_v1  ;;  %v510_v23 = vunpack.c.h.b16 %v508_v1  ;;  %4265 = vmatpush3.bf16.msra.mxu1 %v4437_v47  ;;  %v4913_v59 = vsel %vm4809_vm2, %v1189_v21, %v1194_v24  ;;  %v4445_v55 = vld [vmem:[%s5853_s1 + $0x198] sm:$0xff]   ;;  %v4447_v1 = vld [vmem:[%s5853_s1 + $0x1e0] sm:$0xff]   ;;  %v77_v21 = vld [vmem:[#allocation2 + $0x48] sm:$0x11] }
  0x44   :  { %v829_v15 = vunpack.c.l.b16 %v828_v10  ;;  %v830_v29 = vunpack.c.h.b16 %v828_v10  ;;  %4266 = vmatprep.subr.bf16.mxu1 %v4439_v51  ;;  %v4918_v20 = vcombine.high %v4790_v6, %v4804_v16  ;;  %v679_v43 = vunpack.c.l.b16 %v678_v32  ;;  %v4438_v51 = vld [vmem:[%s5853_s1 + $0x160] sm:$0xff]  }
  0x45   :  { %3353 = vmatprep.mubr.bf16.mxu1 %v1256_v63  ;;  %v511_v49 = vpack.i.b16 %v510_v23, %v509_v2  ;;  %4203 = vmatpush3.bf16.msra.mxu0 %v4432_v45  ;;  %v680_v44 = vunpack.c.h.b16 %v678_v32  ;;  %v1258_v47 = vunpack.c.l.b16 %v4913_v59  ;;  %v1259_v14 = vunpack.c.h.b16 %v4913_v59  ;;  %v4440_v63 = vld [vmem:[%s5853_s1 + $0x120] sm:$0xff]   ;;  %v4442_v2 = vld [vmem:[%s5853_s1 + $0x168] sm:$0xff]  }
  0x46   :  { %v831_v42 = vpack.i.b16 %v830_v29, %v829_v15  ;;  %4204 = vmatprep.subr.bf16.mxu0 %v4434_v22  ;;  %v515_v16 = vpack.i.b16 %v514_v54, %v513_v40  ;;  %v836_v45 = vunpack.c.l.b16 %v4918_v20  ;;  %v837_v0 = vunpack.c.h.b16 %v4918_v20  ;;  %v100_v22 = vld [vmem:[#allocation2 + $0x28] sm:$0x1] }
  0x47   :  { %3257 = vmatmul.mubr.bf16.gmra.mrb[4].mxu0 %v511_v49  ;;  %4267 = vmatpush3.bf16.msra.mxu1 %v4441_v25  ;;  %v681_v61 = vpack.i.b16 %v680_v44, %v679_v43  ;;  %v1260_v5 = vpack.i.b16 %v1259_v14, %v1258_v47  ;;  %v4449_v49 = vld [vmem:[%s5853_s1 + $0x1a0] sm:$0xff]   ;;  %v637_v43 = vrot.slane %v4896_v56, 1  ;;  %v311_v44 = vld [vmem:[#allocation2 + $0x2c] sm:$0x11]  ;;  %v314_v47 = vld [vmem:[#allocation2 + $0x34] sm:$0x11] }
  0x48   :  { %v832_v60 = vunpack.c.l.b16 %v831_v42  ;;  %v833_v19 = vunpack.c.h.b16 %v831_v42  ;;  %4268 = vmatprep.subr.bf16.mxu1 %v4443_v48  ;;  %v516_v10 = vunpack.c.l.b16 %v515_v16  ;;  %v517_v12 = vunpack.c.h.b16 %v515_v16 }
  0x49   :  { %4205 = vmatpush3.bf16.msra.mxu0 %v4436_v41  ;;  %v682_v24 = vunpack.c.l.b16 %v681_v61  ;;  %v683_v25 = vunpack.c.h.b16 %v681_v61  ;;  %v838_v15 = vpack.i.b16 %v837_v0, %v836_v45  ;;  %v1261_v29 = vunpack.c.l.b16 %v1260_v5 }
  0x4a   :  { %v834_v23 = vpack.i.b16 %v833_v19, %v832_v60  ;;  %4206 = vmatprep.subr.bf16.mxu0 %v4438_v51  ;;  %v1262_v32 = vunpack.c.h.b16 %v1260_v5  ;;  %v518_v40 = vpack.i.b16 %v517_v12, %v516_v10  ;;  %v4945_v48 = vcombine.high %v4795_v11, %v4795_v11  ;;  %v4450_v51 = vld [vmem:[%s5853_s1 + $0x1e8] sm:$0xff]   ;;  %v45_v5 = vld [vmem:[#allocation2 + $0x50] sm:$0x11] }
  0x4b   :  { %4269 = vmatpush3.bf16.msra.mxu1 %v4445_v55  ;;  %v684_v54 = vpack.i.b16 %v683_v25, %v682_v24  ;;  %v839_v41 = vunpack.c.l.b16 %v838_v15  ;;  %v840_v42 = vunpack.c.h.b16 %v838_v15  ;;  %v4444_v60 = vld [vmem:[%s5853_s1 + $0x128] sm:$0xff]   ;;  %v75_v61 = vsel %vm4725_vm10, 0, %v74_v39  ;;  %v4446_v10 = vld [vmem:[%s5853_s1 + $0x170] sm:$0xff]  }
  0x4c   :  { %3354 = vmatmul.mubr.bf16.gmra.mrb[4].mxu1 %v834_v23  ;;  %4270 = vmatprep.subr.bf16.mxu1 %v4447_v1  ;;  %v1263_v14 = vpack.i.b16 %v1262_v32, %v1261_v29  ;;  %v519_v16 = vunpack.c.l.b16 %v518_v40  ;;  %v520_v45 = vunpack.c.h.b16 %v518_v40  ;;  %v638_v55 = vrot.slane %v4945_v48, 1  ;;  %76 = vst [vmem:[#allocation2 + $0x40] sm:$0x11] %v75_v61  ;;  %v51_v29 = vld [vmem:[#allocation2 + $0x60] sm:$0x11] }
  0x4d   :  { %4207 = vmatpush3.bf16.msra.mxu0 %v4440_v63  ;;  %3264 = vmatprep.mubr.bf16.mxu0 %v684_v54  ;;  %v841_v19 = vpack.i.b16 %v840_v42, %v839_v41  ;;  %v78_v0 = vsel %vm4725_vm10, 0, %v77_v21  ;;  %v101_v1 = vsel %vm4625_vm4, 0, %v100_v22  ;;  %v48_v22 = vld [vmem:[#allocation2 + $0x58] sm:$0x11] }
  0x4e   :  { %4208 = vmatprep.subr.bf16.mxu0 %v4442_v2  ;;  %v1264_v12 = vunpack.c.l.b16 %v1263_v14  ;;  %v1265_v63 = vunpack.c.h.b16 %v1263_v14  ;;  %v521_v23 = vpack.i.b16 %v520_v45, %v519_v16  ;;  %v651_v24 = vsel %vm647_vm3, %v637_v43, %v638_v55  ;;  %79 = vst [vmem:[#allocation2 + $0x48] sm:$0x11] %v78_v0  ;;  %102 = vst [vmem:[#allocation2 + $0x28] sm:$0x1] %v101_v1 }
  0x4f   :  { %4271 = vmatpush3.bf16.msra.mxu1 %v4449_v49  ;;  %v842_v39 = vunpack.c.l.b16 %v841_v19  ;;  %v843_v21 = vunpack.c.h.b16 %v841_v19  ;;  %v686_v25 = vunpack.c.l.b16 %v651_v24  ;;  %v687_v15 = vunpack.c.h.b16 %v651_v24 }
  0x50   :  { %4272 = vmatprep.subr.bf16.mxu1 %v4450_v51 }
  0x51   :  { %9 = vsyncpa [#allocation6], 0  ;;  %v1266_v2 = vpack.i.b16 %v1265_v63, %v1264_v12  ;;  %3265 = vmatmul.mubr.bf16.gmra.mrb[8].mxu0 %v521_v23  ;;  %v312_v32 = vsel %vm4632_vm9, %v244_v34, %v311_v44  ;;  %v315_v40 = vsel %vm4632_vm9, %v245_v36, %v314_v47  ;;  %v1197_v49 = vshrl.u32 %v4896_v56, 16  ;;  %v54_v54 = vld [vmem:[#allocation2 + $0x68] sm:$0x11]  ;;  %v4448_v36 = vld [vmem:[%s5853_s1 + $0x130] sm:$0xff]  }
  0x52   :  { %v57_v41 = vld [vmem:[#allocation2 + $0x70] sm:$0x11]  ;;  %v4451_v42 = vld [vmem:[%s5853_s1 + $0x1a8] sm:$0xff]   ;;  %v844_v43 = vpack.i.b16 %v843_v21, %v842_v39  ;;  %v688_v51 = vpack.i.b16 %v687_v15, %v686_v25  ;;  %313 = vst [vmem:[#allocation2 + $0x2c] sm:$0x11] %v312_v32  ;;  %v523_v3 = vunpack.c.l.b16 %v4896_v56  ;;  %v524_v34 = vunpack.c.h.b16 %v4896_v56  ;;  %4209 = vmatpush3.bf16.msra.mxu0 %v4444_v60  ;;  %v4452_v60 = vld [vmem:[%s5853_s1 + $0x178] sm:$0xff]  }
  0x53   :  { %316 = vst [vmem:[#allocation2 + $0x34] sm:$0x11] %v315_v40  ;;  %v3893_v4 = vld [vmem:[%s5852_s0 + $0x20] ss:$4 sm:$0xff]  ;;  %3361 = vmatprep.mubr.bf16.mxu1 %v1266_v2  ;;  %v4993_v47 = vcombine.high %v4860_v26, %v4866_v28  ;;  %v46_v14 = vsel %vm4632_vm9, 0, %v45_v5  ;;  %v49_v16 = vsel %vm4632_vm9, 0, %v48_v22  ;;  %4210 = vmatprep.subr.bf16.mxu0 %v4446_v10  ;;  %v5117_v62 = vpack.i.b16 %v1497_v18, %v1496_v13 }
  0x54   :  { %v4454_v44 = vld [vmem:[%s5853_s1 + $0x1f0] sm:$0xff]   ;;  %v52_v45 = vsel %vm4632_vm9, 0, %v51_v29  ;;  %3362 = vmatmul.mubr.bf16.gmra.mrb[8].mxu1 %v844_v43  ;;  %v689_v26 = vunpack.c.l.b16 %v688_v51  ;;  %v690_v28 = vunpack.c.h.b16 %v688_v51  ;;  %v525_v19 = vpack.i.b16 %v524_v34, %v523_v3  ;;  %47 = vst [vmem:[#allocation2 + $0x50] sm:$0x11] %v46_v14  ;;  %50 = vst [vmem:[#allocation2 + $0x58] sm:$0x11] %v49_v16 }
  0x55   :  { %v3895_v55 = vld [vmem:[%s5852_s0 + $0x21] ss:$4 sm:$0xff]  ;;  %53 = vst [vmem:[#allocation2 + $0x60] sm:$0x11] %v52_v45  ;;  %v55_v61 = vsel %vm4632_vm9, 0, %v54_v54  ;;  %v846_v1 = vunpack.c.l.b16 %v4993_v47  ;;  %v847_v5 = vunpack.c.h.b16 %v4993_v47  ;;  %v58_v10 = vsel %vm4632_vm9, 0, %v57_v41  ;;  %4273 = vmatpush3.bf16.msra.mxu1 %v4451_v42 }
  0x56   :  { %v3897_v0 = vld [vmem:[%s5852_s0 + $0x22] ss:$4 sm:$0xff]  ;;  %56 = vst [vmem:[#allocation2 + $0x68] sm:$0x11] %v55_v61  ;;  %v125_v12 = vshrl.u32 %v3893_v4, 16  ;;  %v691_v39 = vpack.i.b16 %v690_v28, %v689_v26  ;;  %v526_v15 = vunpack.c.l.b16 %v525_v19  ;;  %v527_v22 = vunpack.c.h.b16 %v525_v19  ;;  %4211 = vmatpush3.bf16.msra.mxu0 %v4448_v36  ;;  %4274 = vmatprep.subr.bf16.mxu1 %v4454_v44 }
  0x57   :  { %v3899_v63 = vld [vmem:[%s5852_s0 + $0x23] ss:$4 sm:$0xff]  ;;  %v317_v21 = vld [vmem:[#allocation2 + $0x3c] sm:$0x11]  ;;  %v320_v25 = vld [vmem:[#allocation2 + $0x44] sm:$0x11]  ;;  %v848_v54 = vpack.i.b16 %v847_v5, %v846_v1  ;;  %4212 = vmatprep.subr.bf16.mxu0 %v4452_v60 }
  0x58   :  { %v4453_v23 = vld [vmem:[%s5853_s1 + $0x138] sm:$0xff]   ;;  %v4455_v24 = vld [vmem:[%s5853_s1 + $0x1b0] sm:$0xff]   ;;  %59 = vst [vmem:[#allocation2 + $0x70] sm:$0x11] %v58_v10  ;;  %v131_v29 = vshrl.u32 %v3895_v55, 16  ;;  %v318_v32 = vsel %vm4632_vm9, %v246_v46, %v317_v21  ;;  %v321_v40 = vsel %vm4632_vm9, %v247_v35, %v320_v25  ;;  %v137_v41 = vshrl.u32 %v3897_v0, 16 }
  0x59   :  { %v4456_v2 = vld [vmem:[%s5853_s1 + $0x1f8] sm:$0xff]   ;;  %v5039_v42 = vld [vmem:[%s5853_s1 + $0x200] sm:$0xff]   ;;  %v692_v43 = vunpack.c.l.b16 %v691_v39  ;;  %v693_v51 = vunpack.c.h.b16 %v691_v39  ;;  %319 = vst [vmem:[#allocation2 + $0x3c] sm:$0x11] %v318_v32  ;;  %322 = vst [vmem:[#allocation2 + $0x44] sm:$0x11] %v321_v40  ;;  %v528_v7 = vpack.i.b16 %v527_v22, %v526_v15  ;;  %v849_v34 = vunpack.c.l.b16 %v848_v54  ;;  %4275 = vmatpush3.bf16.msra.mxu1 %v4455_v24 }
  0x5a   :  { %v143_v3 = vshrl.u32 %v3899_v63, 16  ;;  %v3938_v46 = vld.sshfl [vmem:[#allocation2 + $0x28] sm:$0x5 pattern:$0x75316420]  ;;  %v850_v8 = vunpack.c.h.b16 %v848_v54  ;;  %v3920_v36 = vpack.c.b16 %v125_v12, %v3893_v4  ;;  %v3921_v44 = vpack.c.b16 %v131_v29, %v3895_v55  ;;  %v4457_v35 = vld [vmem:[%s5853_s1 + $0x1b8] sm:$0xff]   ;;  %4213 = vmatpush3.bf16.msra.mxu0 %v4453_v23  ;;  %4276 = vmatprep.subr.bf16.mxu1 %v4456_v2 }
  0x5b   :  { %v694_v14 = vpack.i.b16 %v693_v51, %v692_v43  ;;  %v3939_v16 = vld.sshfl [vmem:[#allocation2 + $0x30] sm:$0x5 pattern:$0x75316420]  ;;  %v529_v45 = vunpack.c.l.b16 %v528_v7  ;;  %v530_v60 = vunpack.c.h.b16 %v528_v7  ;;  %v3922_v26 = vpack.c.b16 %v137_v41, %v3897_v0  ;;  %4342 = vmatprep.subr.bf16.mxu0 %v5039_v42  ;;  %v80_v24 = vld [vmem:[#allocation2 + $0x78] sm:$0x11] }
  0x5c   :  { %v1032_v28 = vcombine.low %v3938_v46, %v3939_v16  ;;  %v851_v19 = vpack.i.b16 %v850_v8, %v849_v34  ;;  %v103_v61 = vld [vmem:[#allocation2 + $0x50] sm:$0xf]  ;;  %v3923_v1 = vpack.c.b16 %v143_v3, %v3899_v63  ;;  %v249_v5 = vshrl.u32 %v3920_v36, 16  ;;  %v83_v63 = vld [vmem:[#allocation2 + $0x80] sm:$0x11]  ;;  %v323_v40 = vld [vmem:[#allocation2 + $0x54] sm:$0xff] }
  0x5d   :  { %3272 = vmatprep.mubr.bf16.mxu0 %v694_v14  ;;  %v531_v4 = vpack.i.b16 %v530_v60, %v529_v45  ;;  %v104_v55 = vsel %vm4663_vm11, 0, %v103_v61  ;;  %v252_v10 = vshll.u32 %v3920_v36, 16  ;;  %v256_v12 = vshrl.u32 %v3921_v44, 16  ;;  %v86_v15 = vld [vmem:[#allocation2 + $0x88] sm:$0x11]  ;;  %4277 = vmatpush3.bf16.msra.mxu1 %v4457_v35  ;;  %v326_v54 = vld [vmem:[#allocation2 + $0x5c] sm:$0xff] }
  0x5e   :  { %v5048_v39 = vrot.slane %v1032_v28, %v4736_v37  ;;  %v852_v0 = vunpack.c.l.b16 %v851_v19  ;;  %v853_v23 = vunpack.c.h.b16 %v851_v19  ;;  %105 = vst [vmem:[#allocation2 + $0x50] sm:$0xf] %v104_v55  ;;  %v5050_v25 = vrot.slane %v249_v5, 7  ;;  %v89_v41 = vld [vmem:[#allocation2 + $0x90] sm:$0x11]  ;;  %4374 = vmatprep.subr.bf16.mxu1 %v5039_v42  ;;  %v329_v45 = vld [vmem:[#allocation2 + $0x64] sm:$0xff] }
  0x5f   :  { %v115_v21 = vld [vmem:[#allocation2 + $0x74] sm:$0xf]  ;;  %3273 = vmatmul.mubr.bf16.gmra.mrb[12].mxu0 %v531_v4  ;;  %v5054_v29 = vrot.slane %v256_v12, 7  ;;  %v259_v2 = vshll.u32 %v3921_v44, 16  ;;  %v263_v32 = vshrl.u32 %v3922_v26, 16  ;;  %v266_v46 = vshll.u32 %v3922_v26, 16 }
  0x60   :  { %v116_v22 = vsel %vm4663_vm11, 0, %v115_v21  ;;  %v92_v43 = vld [vmem:[#allocation2 + $0x98] sm:$0x11]  ;;  %v5059_v7 = vpack.i.b16 %v853_v23, %v852_v0  ;;  %v254_v3 = vor.u32 %v252_v10, %v5050_v25  ;;  %v270_v53 = vshrl.u32 %v3923_v1, 16 }
  0x61   :  { %v5057_v51 = vld.sshfl [vmem:[#allocation2 + $0x38] sm:$0x5 pattern:$0x75316420]  ;;  %117 = vst [vmem:[#allocation2 + $0x74] sm:$0xf] %v116_v22  ;;  %v261_v8 = vor.u32 %v259_v2, %v5054_v29 }
  0x62   :  { %v3941_v34 = vld.sshfl [vmem:[#allocation2 + $0x40] sm:$0x5 pattern:$0x75316420]  ;;  %v5063_v36 = vrot.slane %v263_v32, 7  ;;  %v273_v44 = vshll.u32 %v3923_v1, 16  ;;  %v324_v16 = vsel %vm4671_vm15, %v254_v3, %v323_v40 }
  0x63   :  { %v1033_v35 = vcombine.low %v5057_v51, %v3941_v34  ;;  %v5066_v14 = vrot.slane %v270_v53, 7  ;;  %v81_v60 = vsel %vm4725_vm10, 0, %v80_v24  ;;  %v5072_v28 = vld.sshfl [vmem:[#allocation2] sm:$0xfa pattern:$0x75316420]  ;;  %v327_v61 = vsel %vm4671_vm15, %v261_v8, %v326_v54 }
  0x64   :  { %v5074_v26 = vld.sshfl [vmem:[#allocation2 + $0x8] sm:$0xfa pattern:$0x75316420]  ;;  %v268_v19 = vor.u32 %v266_v46, %v5063_v36  ;;  %325 = vst [vmem:[#allocation2 + $0x54] sm:$0xff] %v324_v16  ;;  %v84_v5 = vsel %vm4725_vm10, 0, %v83_v63 }
  0x65   :  { %v332_v1 = vld [vmem:[#allocation2 + $0x6c] sm:$0xff]  ;;  %82 = vst [vmem:[#allocation2 + $0x78] sm:$0x11] %v81_v60  ;;  %v87_v4 = vsel %vm4725_vm10, 0, %v86_v15  ;;  %v1047_v12 = vrot.slane %v1033_v35, %v4736_v37  ;;  %v275_v24 = vor.u32 %v273_v44, %v5066_v14  ;;  %328 = vst [vmem:[#allocation2 + $0x5c] sm:$0xff] %v327_v61  ;;  %v90_v0 = vsel %vm4725_vm10, 0, %v89_v41 }
  0x66   :  { %v5083_v55 = vld.sshfl [vmem:[#allocation2 + $0x10] sm:$0xfa pattern:$0x75316420]  ;;  %85 = vst [vmem:[#allocation2 + $0x80] sm:$0x11] %v84_v5  ;;  %v330_v63 = vsel %vm4671_vm15, %v268_v19, %v329_v45  ;;  %v1909_v54 = vcombine.high %v5072_v28, %v5074_v26 }
  0x67   :  { %v5085_v10 = vld.sshfl [vmem:[#allocation2 + $0x18] sm:$0xfa pattern:$0x75316420]  ;;  %88 = vst [vmem:[#allocation2 + $0x88] sm:$0x11] %v87_v4  ;;  %v1048_v32 = vcombine.low %v5048_v39, %v1047_v12  ;;  %v333_v31 = vsel %vm4671_vm15, %v275_v24, %v332_v1 }
  0x68   :  { %v93_v23 = vsel %vm4725_vm10, 0, %v92_v43  ;;  %v5093_v21 = vld.sshfl [vmem:[#allocation2 + $0x20] sm:$0xfa pattern:$0x75316420]  ;;  %v276_v15 = vrot.slane %v5050_v25, 4  ;;  %v1911_v25 = vcombine.high %v5083_v55, %v5085_v10  ;;  %v5111_v43 = vrot.slane %v1909_v54, %v4736_v37 }
  0x69   :  { %91 = vst [vmem:[#allocation2 + $0x90] sm:$0x11] %v90_v0  ;;  %94 = vst [vmem:[#allocation2 + $0x98] sm:$0x11] %v93_v23  ;;  %v277_v22 = vrot.slane %v5054_v29, 4  ;;  %v278_v2 = vrot.slane %v5063_v36, 4  ;;  %v2195_v29 = vcombine.high %v5093_v21, %v5093_v21 }
  0x6a   :  { %331 = vst [vmem:[#allocation2 + $0x64] sm:$0xff] %v330_v63  ;;  %334 = vst [vmem:[#allocation2 + $0x6c] sm:$0xff] %v333_v31  ;;  %v1202_v41 = vshll.u32 %v1048_v32, 16  ;;  %v5126_v53 = vrot.slane %v1911_v25, %v4736_v37 }
  0x6b   :  { %v3928_v3 = vld.sshfl [vmem:[#allocation2 + $0x50] sm:$0xff pattern:$0x75316420]  ;;  %v5129_v34 = vrot.slane %v2195_v29, %v4736_v37 }
  0x6c   :  { %v5123_v39 = vsel %vm4809_vm2, %v1197_v49, %v1202_v41  ;;  %v106_v46 = vld [vmem:[#allocation2 + $0x78] sm:$0x1] }
  0x6d   :  { %5884 = vst [vmem:[#allocation9_spill] sm:$0xff] %v5123_v39  ;;  %v1268_v58 = vunpack.c.l.b16 %v5123_v39  ;;  %v1269_v13 = vunpack.c.h.b16 %v5123_v39  ;;  %v3929_v56 = vld.sshfl [vmem:[#allocation2 + $0x58] sm:$0xff pattern:$0x75316420]  ;;  %v107_v49 = vsel %vm4625_vm4, 0, %v106_v46 }
  0x6e   :  { %v457_v36 = vcombine.low %v3928_v3, %v3929_v56  ;;  %v1078_v44 = vcombine.high %v3928_v3, %v3929_v56  ;;  %108 = vst [vmem:[#allocation2 + $0x78] sm:$0x1] %v107_v49  ;;  %v335_v35 = vld [vmem:[#allocation2 + $0x7c] sm:$0x11]  ;;  %v338_v16 = vld [vmem:[#allocation2 + $0x84] sm:$0x11] }
  0x6f   :  { %v1270_v60 = vpack.i.b16 %v1269_v13, %v1268_v58  ;;  %v336_v61 = vsel %vm4632_vm9, %v276_v15, %v335_v35  ;;  %v339_v1 = vsel %vm4632_vm9, %v277_v22, %v338_v16 }
  0x70   :  { %v341_v45 = vld [vmem:[#allocation2 + $0x8c] sm:$0x11]  ;;  %v467_v24 = vrot.slane %v457_v36, %v4736_v37  ;;  %v5148_v0 = vrot.slane %v1078_v44, %v4736_v37  ;;  %337 = vst [vmem:[#allocation2 + $0x7c] sm:$0x11] %v336_v61  ;;  %340 = vst [vmem:[#allocation2 + $0x84] sm:$0x11] %v339_v1 }
  0x71   :  { %v3930_v19 = vld.sshfl [vmem:[#allocation2 + $0x60] sm:$0xff pattern:$0x75316420]  ;;  %v342_v5 = vsel %vm4632_vm9, %v278_v2, %v341_v45  ;;  %v5144_v4 = vld.sshfl [vmem:[#allocation2 + $0x68] sm:$0xff pattern:$0x75316420]  ;;  %v1271_v15 = vunpack.c.l.b16 %v1270_v60  ;;  %v1272_v32 = vunpack.c.h.b16 %v1270_v60 }
  0x72   :  { %5885 = vst [vmem:[#allocation10_spill] sm:$0xff] %v5144_v4  ;;  %v3933_v12 = vld.sshfl [vmem:[#allocation2 + $0x70] sm:$0xff pattern:$0x75316420]  ;;  %v780_v23 = vcombine.low %v3929_v56, %v3930_v19  ;;  %v781_v63 = vcombine.high %v3929_v56, %v3930_v19  ;;  %343 = vst [vmem:[#allocation2 + $0x8c] sm:$0x11] %v342_v5  ;;  %v459_v22 = vcombine.low %v3930_v19, %v5144_v4 }
  0x73   :  { %v5152_v31 = vrot.slane %v3933_v12, %v4736_v37  ;;  %v1080_v2 = vcombine.high %v3930_v19, %v5144_v4  ;;  %v782_v54 = vcombine.low %v5144_v4, %v3933_v12  ;;  %v614_v25 = vcombine.high %v3933_v12, %v3933_v12 }
  0x74   :  { %v5157_v41 = vrot.slane %v780_v23, %v4736_v37  ;;  %v1273_v29 = vpack.i.b16 %v1272_v32, %v1271_v15  ;;  %v481_v3 = vrot.slane %v459_v22, %v4736_v37  ;;  %v783_v58 = vcombine.high %v5144_v4, %v3933_v12 }
  0x75   :  { %v640_v46 = vrot.slane %v5152_v31, 1  ;;  %v5163_v13 = vrot.slane %v1080_v2, %v4736_v37  ;;  %v5166_v56 = vrot.slane %v782_v54, %v4736_v37  ;;  %v5169_v49 = vrot.slane %v614_v25, %v4736_v37 }
  0x76   :  { %v5172_v36 = vrot.slane %v781_v63, %v4736_v37  ;;  %v1274_v44 = vunpack.c.l.b16 %v1273_v29  ;;  %v1275_v35 = vunpack.c.h.b16 %v1273_v29  ;;  %v489_v16 = vcombine.low %v467_v24, %v481_v3 }
  0x77   :  { %v5174_v45 = vcombine.high %v467_v24, %v481_v3  ;;  %v5178_v60 = vcombine.low %v5148_v0, %v5163_v13  ;;  %v812_v19 = vcombine.low %v5157_v41, %v5166_v56  ;;  %v642_v61 = vrot.slane %v5169_v49, 1 }
  0x78   :  { %v5184_v1 = vrot.slane %v783_v58, %v4736_v37  ;;  %v1276_v5 = vpack.i.b16 %v1275_v35, %v1274_v44  ;;  %v639_v12 = vrot.slane %v489_v16, 1  ;;  %v1206_v23 = vshrl.u32 %v489_v16, 16 }
  0x79   :  { %v533_v63 = vunpack.c.l.b16 %v489_v16  ;;  %v1211_v15 = vshll.u32 %v5178_v60, 16  ;;  %v534_v24 = vunpack.c.h.b16 %v489_v16  ;;  %v856_v32 = vunpack.c.l.b16 %v812_v19 }
  0x7a   :  { %v857_v22 = vunpack.c.h.b16 %v812_v19  ;;  %3369 = vmatprep.mubr.bf16.mxu1 %v1276_v5  ;;  %v652_v2 = vsel %vm647_vm3, %v639_v12, %v640_v46  ;;  %v641_v54 = vrot.slane %v5178_v60, 1  ;;  %v1214_v25 = vshrl.u32 %v5178_v60, 16 }
  0x7b   :  { %v1219_v29 = vshll.u32 %v5174_v45, 16  ;;  %3370 = vmatmul.mubr.bf16.gmra.mrb[12].mxu1 %v5059_v7  ;;  %v696_v3 = vunpack.c.l.b16 %v652_v2  ;;  %v697_v58 = vunpack.c.h.b16 %v652_v2  ;;  %v5194_v44 = vsel %vm4809_vm2, %v1206_v23, %v1211_v15 }
  0x7c   :  { %v535_v35 = vpack.i.b16 %v534_v24, %v533_v63  ;;  %v1278_v16 = vunpack.c.l.b16 %v5194_v44  ;;  %v1279_v19 = vunpack.c.h.b16 %v5194_v44  ;;  %v858_v5 = vpack.i.b16 %v857_v22, %v856_v32 }
  0x7d   :  { %v698_v12 = vpack.i.b16 %v697_v58, %v696_v3  ;;  %v653_v57 = vsel %vm647_vm3, %v641_v54, %v642_v61  ;;  %v5202_v46 = vsel %vm4809_vm2, %v1214_v25, %v1219_v29 }
  0x7e   :  { %v536_v18 = vunpack.c.l.b16 %v535_v35  ;;  %v537_v6 = vunpack.c.h.b16 %v535_v35  ;;  %v1280_v7 = vpack.i.b16 %v1279_v19, %v1278_v16  ;;  %v859_v8 = vunpack.c.l.b16 %v858_v5 }
  0x7f   :  { %v860_v2 = vunpack.c.h.b16 %v858_v5  ;;  %v706_v40 = vunpack.c.l.b16 %v653_v57  ;;  %v699_v30 = vunpack.c.l.b16 %v698_v12  ;;  %v700_v23 = vunpack.c.h.b16 %v698_v12 }
  0x80   :  { %v538_v15 = vpack.i.b16 %v537_v6, %v536_v18  ;;  %v707_v63 = vunpack.c.h.b16 %v653_v57  ;;  %v1281_v24 = vunpack.c.l.b16 %v1280_v7  ;;  %v1282_v39 = vunpack.c.h.b16 %v1280_v7 }
  0x81   :  { %v861_v4 = vpack.i.b16 %v860_v2, %v859_v8  ;;  %v701_v32 = vpack.i.b16 %v700_v23, %v699_v30  ;;  %v1288_v16 = vunpack.c.l.b16 %v5202_v46  ;;  %v1289_v25 = vunpack.c.h.b16 %v5202_v46 }
  0x82   :  { %v539_v22 = vunpack.c.l.b16 %v538_v15  ;;  %v540_v3 = vunpack.c.h.b16 %v538_v15  ;;  %v708_v58 = vpack.i.b16 %v707_v63, %v706_v40  ;;  %v1283_v61 = vpack.i.b16 %v1282_v39, %v1281_v24 }
  0x83   :  { %v862_v54 = vunpack.c.l.b16 %v861_v4  ;;  %v863_v35 = vunpack.c.h.b16 %v861_v4  ;;  %v702_v19 = vunpack.c.l.b16 %v701_v32  ;;  %v703_v5 = vunpack.c.h.b16 %v701_v32 }
  0x84   :  { %v541_v6 = vpack.i.b16 %v540_v3, %v539_v22  ;;  %v709_v57 = vunpack.c.l.b16 %v708_v58  ;;  %v1284_v18 = vunpack.c.l.b16 %v1283_v61  ;;  %v1285_v12 = vunpack.c.h.b16 %v1283_v61 }
  0x85   :  { %v864_v8 = vpack.i.b16 %v863_v35, %v862_v54  ;;  %v710_v7 = vunpack.c.h.b16 %v708_v58  ;;  %v704_v2 = vpack.i.b16 %v703_v5, %v702_v19  ;;  %v1482_v30 = vrot.slane %v5202_v46, 1 }
  0x86   :  { %v543_v40 = vunpack.c.l.b16 %v5178_v60  ;;  %v1286_v39 = vpack.i.b16 %v1285_v12, %v1284_v18  ;;  %v544_v4 = vunpack.c.h.b16 %v5178_v60  ;;  %v814_v23 = vcombine.low %v5172_v36, %v5184_v1 }
  0x87   :  { %v711_v29 = vpack.i.b16 %v710_v7, %v709_v57  ;;  %3280 = vmatprep.mubr.bf16.mxu0 %v704_v2  ;;  %v1290_v15 = vpack.i.b16 %v1289_v25, %v1288_v16  ;;  %v629_v63 = vcombine.high %v5152_v31, %v5152_v31  ;;  %v5215_v24 = vcombine.high %v5148_v0, %v5163_v13 }
  0x88   :  { %3377 = vmatprep.mubr.bf16.mxu1 %v1286_v39  ;;  %3281 = vmatmul.mubr.bf16.gmra.mrb[16].mxu0 %v541_v6  ;;  %v545_v3 = vpack.i.b16 %v544_v4, %v543_v40  ;;  %v866_v58 = vunpack.c.l.b16 %v814_v23  ;;  %v867_v54 = vunpack.c.h.b16 %v814_v23  ;;  %v643_v35 = vrot.slane %v5174_v45, 1 }
  0x89   :  { %v712_v32 = vunpack.c.l.b16 %v711_v29  ;;  %v713_v22 = vunpack.c.h.b16 %v711_v29  ;;  %3378 = vmatmul.mubr.bf16.gmra.mrb[16].mxu1 %v864_v8  ;;  %v1291_v60 = vunpack.c.l.b16 %v1290_v15  ;;  %v1292_v61 = vunpack.c.h.b16 %v1290_v15 }
  0x8a   :  { %v546_v19 = vunpack.c.l.b16 %v545_v3  ;;  %v547_v5 = vunpack.c.h.b16 %v545_v3  ;;  %v644_v31 = vrot.slane %v629_v63, 1  ;;  %v868_v18 = vpack.i.b16 %v867_v54, %v866_v58 }
  0x8b   :  { %v714_v16 = vpack.i.b16 %v713_v22, %v712_v32  ;;  %v1293_v57 = vpack.i.b16 %v1292_v61, %v1291_v60  ;;  %v1222_v0 = vshrl.u32 %v5174_v45, 16  ;;  %v1227_v13 = vshll.u32 %v5215_v24, 16 }
  0x8c   :  { %v548_v6 = vpack.i.b16 %v547_v5, %v546_v19  ;;  %v654_v12 = vsel %vm647_vm3, %v643_v35, %v644_v31  ;;  %v553_v8 = vunpack.c.l.b16 %v5174_v45  ;;  %v554_v7 = vunpack.c.h.b16 %v5174_v45 }
  0x8d   :  { %3288 = vmatprep.mubr.bf16.mxu0 %v714_v16  ;;  %v1294_v2 = vunpack.c.l.b16 %v1293_v57  ;;  %v1295_v25 = vunpack.c.h.b16 %v1293_v57  ;;  %v869_v40 = vunpack.c.l.b16 %v868_v18  ;;  %v870_v39 = vunpack.c.h.b16 %v868_v18 }
  0x8e   :  { %v549_v29 = vunpack.c.l.b16 %v548_v6  ;;  %v550_v4 = vunpack.c.h.b16 %v548_v6  ;;  %v716_v23 = vunpack.c.l.b16 %v654_v12  ;;  %v717_v15 = vunpack.c.h.b16 %v654_v12 }
  0x8f   :  { %v1296_v63 = vpack.i.b16 %v1295_v25, %v1294_v2  ;;  %v871_v32 = vpack.i.b16 %v870_v39, %v869_v40  ;;  %v5225_v22 = vsel %vm4809_vm2, %v1222_v0, %v1227_v13  ;;  %v555_v3 = vpack.i.b16 %v554_v7, %v553_v8  ;;  %v344_v0 = vld [vmem:[#allocation2 + $0x94] sm:$0x11] }
  0x90   :  { %v551_v58 = vpack.i.b16 %v550_v4, %v549_v29  ;;  %v718_v60 = vpack.i.b16 %v717_v15, %v716_v23  ;;  %v1298_v61 = vunpack.c.l.b16 %v5225_v22  ;;  %v1299_v45 = vunpack.c.h.b16 %v5225_v22  ;;  %v3946_v7 = vld.sshfl [vmem:[#allocation2 + $0x78] sm:$0x5 pattern:$0x75316420] }
  0x91   :  { %3385 = vmatprep.mubr.bf16.mxu1 %v1296_v63  ;;  %v872_v54 = vunpack.c.l.b16 %v871_v32  ;;  %v873_v35 = vunpack.c.h.b16 %v871_v32  ;;  %v1484_v16 = vrot.slane %v5225_v22, 1  ;;  %v556_v19 = vunpack.c.l.b16 %v555_v3  ;;  %v5235_v29 = vld.sshfl [vmem:[#allocation2 + $0x80] sm:$0x5 pattern:$0x75316420] }
  0x92   :  { %3289 = vmatmul.mubr.bf16.gmra.mrb[20].mxu0 %v551_v58  ;;  %v719_v5 = vunpack.c.l.b16 %v718_v60  ;;  %v720_v31 = vunpack.c.h.b16 %v718_v60  ;;  %v1300_v57 = vpack.i.b16 %v1299_v45, %v1298_v61  ;;  %v557_v18 = vunpack.c.h.b16 %v555_v3 }
  0x93   :  { %v874_v13 = vpack.i.b16 %v873_v35, %v872_v54  ;;  %v813_v6 = vcombine.high %v5157_v41, %v5166_v56  ;;  %v630_v12 = vcombine.high %v5169_v49, %v5169_v49  ;;  %v645_v8 = vrot.slane %v5215_v24, 1 }
  0x94   :  { %v721_v2 = vpack.i.b16 %v720_v31, %v719_v5  ;;  %v1301_v25 = vunpack.c.l.b16 %v1300_v57  ;;  %v1302_v40 = vunpack.c.h.b16 %v1300_v57  ;;  %v558_v39 = vpack.i.b16 %v557_v18, %v556_v19 }
  0x95   :  { %3386 = vmatmul.mubr.bf16.gmra.mrb[20].mxu1 %v874_v13  ;;  %v876_v4 = vunpack.c.l.b16 %v813_v6  ;;  %v877_v23 = vunpack.c.h.b16 %v813_v6  ;;  %v646_v15 = vrot.slane %v630_v12, 1  ;;  %v5886_v63 = vrot.slane %v5066_v14, 4 }
  0x96   :  { %v722_v32 = vunpack.c.l.b16 %v721_v2  ;;  %v723_v49 = vunpack.c.h.b16 %v721_v2  ;;  %v1303_v3 = vpack.i.b16 %v1302_v40, %v1301_v25  ;;  %v559_v58 = vunpack.c.l.b16 %v558_v39 }
  0x97   :  { %v345_v56 = vsel %vm4632_vm9, %v5886_v63, %v344_v0  ;;  %v560_v60 = vunpack.c.h.b16 %v558_v39  ;;  %v878_v61 = vpack.i.b16 %v877_v23, %v876_v4  ;;  %v655_v45 = vsel %vm647_vm3, %v645_v8, %v646_v15 }
  0x98   :  { %346 = vst [vmem:[#allocation2 + $0x94] sm:$0x11] %v345_v56  ;;  %v1141_v54 = vcombine.low %v3946_v7, %v5235_v29  ;;  %v724_v35 = vpack.i.b16 %v723_v49, %v722_v32  ;;  %v1304_v19 = vunpack.c.l.b16 %v1303_v3  ;;  %v1305_v5 = vunpack.c.h.b16 %v1303_v3  ;;  %v5246_v7 = vld.sshfl [vmem:[#allocation2 + $0x88] sm:$0x5 pattern:$0x75316420] }
  0x99   :  { %v726_v31 = vunpack.c.l.b16 %v655_v45  ;;  %v561_v57 = vpack.i.b16 %v560_v60, %v559_v58  ;;  %v879_v14 = vunpack.c.l.b16 %v878_v61  ;;  %v880_v18 = vunpack.c.h.b16 %v878_v61 }
  0x9a   :  { %v727_v38 = vunpack.c.h.b16 %v655_v45  ;;  %3296 = vmatprep.mubr.bf16.mxu0 %v724_v35  ;;  %v1306_v0 = vpack.i.b16 %v1305_v5, %v1304_v19  ;;  %v1149_v13 = vrot.slane %v1141_v54, %v4736_v37  ;;  %v1230_v6 = vshrl.u32 %v5215_v24, 16 }
  0x9b   :  { %v563_v12 = vunpack.c.l.b16 %v5215_v24  ;;  %3297 = vmatmul.mubr.bf16.gmra.mrb[24].mxu0 %v561_v57  ;;  %v881_v8 = vpack.i.b16 %v880_v18, %v879_v14  ;;  %v564_v25 = vunpack.c.h.b16 %v5215_v24  ;;  %v815_v40 = vcombine.high %v5172_v36, %v5184_v1 }
  0x9c   :  { %v728_v2 = vpack.i.b16 %v727_v38, %v726_v31  ;;  %3393 = vmatprep.mubr.bf16.mxu1 %v1306_v0  ;;  %v1691_v39 = vshrl.u32 %v4822_v27, 16  ;;  %v1696_v4 = vshll.u32 %v4876_v50, 16  ;;  %v5255_v23 = vcombine.low %v5111_v43, %v5126_v53 }
  0x9d   :  { %v2265_v15 = vrot.slane %v5129_v34, 1  ;;  %v882_v63 = vunpack.c.l.b16 %v881_v8  ;;  %v883_v56 = vunpack.c.h.b16 %v881_v8  ;;  %v565_v24 = vpack.i.b16 %v564_v25, %v563_v12 }
  0x9e   :  { %v729_v32 = vunpack.c.l.b16 %v728_v2  ;;  %v730_v49 = vunpack.c.h.b16 %v728_v2  ;;  %v886_v58 = vunpack.c.l.b16 %v815_v40  ;;  %v887_v27 = vunpack.c.h.b16 %v815_v40 }
  0x9f   :  { %v5258_v3 = vld.sshfl [vmem:[#allocation2 + $0x90] sm:$0x5 pattern:$0x75316420]  ;;  %v884_v60 = vpack.i.b16 %v883_v56, %v882_v63  ;;  %v1698_v45 = vsel %vm4809_vm2, %v1691_v39, %v1696_v4  ;;  %v2264_v54 = vrot.slane %v5255_v23, 1  ;;  %v566_v19 = vunpack.c.l.b16 %v565_v24 }
  0xa0   :  { %v1142_v1 = vcombine.low %v5246_v7, %v5258_v3  ;;  %v731_v61 = vpack.i.b16 %v730_v49, %v729_v32  ;;  %v567_v5 = vunpack.c.h.b16 %v565_v24  ;;  %v888_v31 = vpack.i.b16 %v887_v27, %v886_v58 }
  0xa1   :  { %3394 = vmatmul.mubr.bf16.gmra.mrb[24].mxu1 %v884_v60  ;;  %v1756_v18 = vunpack.c.l.b16 %v1698_v45  ;;  %v1757_v38 = vunpack.c.h.b16 %v1698_v45  ;;  %v2280_v39 = vsel %vm647_vm3, %v2264_v54, %v2265_v15  ;;  %v1499_v4 = vunpack.c.l.b16 %v5117_v62 }
  0xa2   :  { %v1156_v35 = vrot.slane %v1142_v1, %v4736_v37  ;;  %v732_v57 = vunpack.c.l.b16 %v731_v61  ;;  %v733_v14 = vunpack.c.h.b16 %v731_v61  ;;  %v568_v12 = vpack.i.b16 %v567_v5, %v566_v19 }
  0xa3   :  { %v889_v8 = vunpack.c.l.b16 %v888_v31  ;;  %v890_v2 = vunpack.c.h.b16 %v888_v31  ;;  %v1758_v40 = vpack.i.b16 %v1757_v38, %v1756_v18  ;;  %v2288_v58 = vunpack.c.l.b16 %v2280_v39 }
  0xa4   :  { %v1157_v0 = vcombine.low %v1149_v13, %v1156_v35  ;;  %v734_v25 = vpack.i.b16 %v733_v14, %v732_v57  ;;  %v569_v56 = vunpack.c.l.b16 %v568_v12  ;;  %v570_v32 = vunpack.c.h.b16 %v568_v12 }
  0xa5   :  { %v891_v49 = vpack.i.b16 %v890_v2, %v889_v8  ;;  %v1759_v1 = vunpack.c.l.b16 %v1758_v40  ;;  %v1760_v24 = vunpack.c.h.b16 %v1758_v40  ;;  %v2289_v27 = vunpack.c.h.b16 %v2280_v39 }
  0xa6   :  { %v1235_v63 = vshll.u32 %v1157_v0, 16  ;;  %3304 = vmatprep.mubr.bf16.mxu0 %v734_v25  ;;  %v571_v60 = vpack.i.b16 %v570_v32, %v569_v56  ;;  %v1500_v57 = vunpack.c.h.b16 %v5117_v62  ;;  %v2096_v14 = vunpack.c.l.b16 %v5255_v23 }
  0xa7   :  { %v892_v61 = vunpack.c.l.b16 %v891_v49  ;;  %v893_v45 = vunpack.c.h.b16 %v891_v49  ;;  %v1761_v19 = vpack.i.b16 %v1760_v24, %v1759_v1  ;;  %v2290_v31 = vpack.i.b16 %v2289_v27, %v2288_v58 }
  0xa8   :  { %v5270_v13 = vsel %vm4809_vm2, %v1230_v6, %v1235_v63  ;;  %3305 = vmatmul.mubr.bf16.gmra.mrb[28].mxu0 %v571_v60  ;;  %v2097_v0 = vunpack.c.h.b16 %v5255_v23  ;;  %v1501_v2 = vpack.i.b16 %v1500_v57, %v1499_v4  ;;  %v1699_v1 = vshrl.u32 %v4876_v50, 16 }
  0xa9   :  { %v1308_v15 = vunpack.c.l.b16 %v5270_v13  ;;  %v1309_v54 = vunpack.c.h.b16 %v5270_v13  ;;  %v1486_v35 = vrot.slane %v5270_v13, 1  ;;  %v894_v5 = vpack.i.b16 %v893_v45, %v892_v61  ;;  %v5285_v45 = vld [vmem:[%s5853_s1 + $0x208] sm:$0xff]  }
  0xaa   :  { %v1762_v6 = vunpack.c.l.b16 %v1761_v19  ;;  %v1763_v38 = vunpack.c.h.b16 %v1761_v19  ;;  %v2291_v12 = vunpack.c.l.b16 %v2290_v31  ;;  %v2292_v8 = vunpack.c.h.b16 %v2290_v31 }
  0xab   :  { %v1310_v18 = vpack.i.b16 %v1309_v54, %v1308_v15  ;;  %v2098_v63 = vpack.i.b16 %v2097_v0, %v2096_v14  ;;  %v1502_v32 = vunpack.c.l.b16 %v1501_v2  ;;  %v1503_v49 = vunpack.c.h.b16 %v1501_v2 }
  0xac   :  { %v1764_v39 = vpack.i.b16 %v1763_v38, %v1762_v6  ;;  %v2293_v56 = vpack.i.b16 %v2292_v8, %v2291_v12  ;;  %v1704_v27 = vshll.u32 %v4918_v20, 16  ;;  %v1910_v4 = vcombine.low %v5083_v55, %v5085_v10 }
  0xad   :  { %v1311_v25 = vunpack.c.l.b16 %v1310_v18  ;;  %v1312_v40 = vunpack.c.h.b16 %v1310_v18  ;;  %v2099_v24 = vunpack.c.l.b16 %v2098_v63  ;;  %v2100_v58 = vunpack.c.h.b16 %v2098_v63 }
  0xae   :  { %3442 = vmatprep.mubr.bf16.mxu0 %v1764_v39  ;;  %v2294_v60 = vunpack.c.l.b16 %v2293_v56  ;;  %v2295_v23 = vunpack.c.h.b16 %v2293_v56  ;;  %v1504_v61 = vpack.i.b16 %v1503_v49, %v1502_v32  ;;  %v1706_v19 = vsel %vm4809_vm2, %v1699_v1, %v1704_v27 }
  0xaf   :  { %v1313_v62 = vpack.i.b16 %v1312_v40, %v1311_v25  ;;  %v2101_v50 = vpack.i.b16 %v2100_v58, %v2099_v24  ;;  %v1766_v57 = vunpack.c.l.b16 %v1706_v19  ;;  %v1767_v14 = vunpack.c.h.b16 %v1706_v19 }
  0xb0   :  { %v2296_v31 = vpack.i.b16 %v2295_v23, %v2294_v60  ;;  %3443 = vmatmul.mubr.bf16.vlgmr.msra.gmra.mrb[32].mxu0 %v1504_v61  ;;  %v5887_v18 = vcombine.low %v5072_v28, %v5074_v26  ;;  %v1932_v0 = vrot.slane %v1910_v4, %v4736_v37  ;;  %v2202_v8 = vrot.slane %v5093_v21, %v4736_v37  ;;  %v5302_v28 = vld [vmem:[%s5853_s1 + $0x210] sm:$0xff]  }
  0xb1   :  { %v1314_v15 = vunpack.c.l.b16 %v1313_v62  ;;  %v1315_v54 = vunpack.c.h.b16 %v1313_v62  ;;  %v2102_v6 = vunpack.c.l.b16 %v2101_v50  ;;  %v2103_v38 = vunpack.c.h.b16 %v2101_v50  ;;  %4343 = vmatpush3.bf16.msra.mxu0 %v5039_v42 }
  0xb2   :  { %v1918_v55 = vrot.slane %v5887_v18, %v4736_v37  ;;  %v1768_v12 = vpack.i.b16 %v1767_v14, %v1766_v57  ;;  %4344 = vmatprep.subr.bf16.mxu0 %v5285_v45  ;;  %v1415_v2 = vshrl.u32 %v4795_v11, 16  ;;  %v1707_v40 = vshrl.u32 %v4918_v20, 16 }
  0xb3   :  { %v1316_v10 = vpack.i.b16 %v1315_v54, %v1314_v15  ;;  %v2104_v26 = vpack.i.b16 %v2103_v38, %v2102_v6  ;;  %v2210_v56 = vcombine.high %v2202_v8, %v2202_v8  ;;  %v1420_v21 = vshll.u32 %v4792_v9, 16 }
  0xb4   :  { %v1940_v25 = vcombine.high %v1918_v55, %v1932_v0  ;;  %v1769_v39 = vunpack.c.l.b16 %v1768_v12  ;;  %v1770_v63 = vunpack.c.h.b16 %v1768_v12  ;;  %v1712_v1 = vshll.u32 %v4993_v47, 16 }
  0xb5   :  { %3401 = vmatprep.mubr.bf16.mxu1 %v1316_v10  ;;  %4345 = vmatpush3.bf16.msra.mxu0 %v5285_v45  ;;  %v2267_v24 = vrot.slane %v2210_v56, 1  ;;  %v1422_v58 = vsel %vm4809_vm2, %v1415_v2, %v1420_v21  ;;  %v5312_v20 = vcombine.high %v5111_v43, %v5126_v53  ;;  %v2211_v61 = vcombine.high %v5129_v34, %v5129_v34  ;;  %v5333_v34 = vld [vmem:[%s5853_s1 + $0x220] sm:$0xff]  }
  0xb6   :  { %3402 = vmatmul.mubr.bf16.gmra.mrb[28].mxu1 %v894_v5  ;;  %v2266_v32 = vrot.slane %v1940_v25, 1  ;;  %v2106_v49 = vunpack.c.l.b16 %v1940_v25  ;;  %v2107_v11 = vunpack.c.h.b16 %v1940_v25  ;;  %v1771_v62 = vpack.i.b16 %v1770_v63, %v1769_v39  ;;  %4346 = vmatprep.subr.bf16.mxu0 %v5302_v28  ;;  %v5318_v5 = vld [vmem:[%s5853_s1 + $0x218] sm:$0xff]  }
  0xb7   :  { %3539 = vmatprep.mubr.bf16.mxu1 %v2296_v31  ;;  %v1475_v27 = vrot.slane %v1422_v58, 1  ;;  %v1714_v23 = vsel %vm4809_vm2, %v1707_v40, %v1712_v1  ;;  %v5888_v19 = vrot.slane %v4840_v52, 1  ;;  %v2268_v52 = vrot.slane %v5312_v20, 1 }
  0xb8   :  { %v2108_v60 = vpack.i.b16 %v2107_v11, %v2106_v49  ;;  %v1772_v4 = vunpack.c.l.b16 %v1771_v62  ;;  %v1773_v15 = vunpack.c.h.b16 %v1771_v62  ;;  %v2281_v43 = vsel %vm647_vm3, %v2266_v32, %v2267_v24 }
  0xb9   :  { %v1776_v53 = vunpack.c.l.b16 %v1714_v23  ;;  %v2298_v54 = vunpack.c.l.b16 %v2281_v43  ;;  %v2299_v50 = vunpack.c.h.b16 %v2281_v43  ;;  %v1489_v31 = vsel %vm647_vm3, %v5888_v19, %v1475_v27  ;;  %4347 = vmatpush3.bf16.msra.mxu0 %v5302_v28  ;;  %v3982_v19 = vld.sshfl [vmem:[#allocation2 + $0x28] sm:$0x5 pattern:$0x75316420] }
  0xba   :  { %v2109_v57 = vunpack.c.l.b16 %v2108_v60  ;;  %v1774_v14 = vpack.i.b16 %v1773_v15, %v1772_v4  ;;  %v1506_v18 = vunpack.c.l.b16 %v1489_v31  ;;  %v1507_v55 = vunpack.c.h.b16 %v1489_v31  ;;  %4348 = vmatprep.subr.bf16.mxu0 %v5318_v5  ;;  %v5353_v31 = vld.sshfl [vmem:[#allocation2 + $0x30] sm:$0x5 pattern:$0x75316420] }
  0xbb   :  { %v2110_v10 = vunpack.c.h.b16 %v2108_v60  ;;  %v2300_v6 = vpack.i.b16 %v2299_v50, %v2298_v54  ;;  %v1777_v38 = vunpack.c.h.b16 %v1714_v23  ;;  %v2269_v0 = vrot.slane %v2211_v61, 1  ;;  %v112_v50 = vld [vmem:[#allocation2 + $0x4c] sm:$0x1] }
  0xbc   :  { %3450 = vmatprep.mubr.bf16.mxu0 %v1774_v14  ;;  %v1508_v12 = vpack.i.b16 %v1507_v55, %v1506_v18  ;;  %v1423_v2 = vshrl.u32 %v4792_v9, 16  ;;  %v5345_v9 = vld [vmem:[%s5853_s1 + $0x228] sm:$0xff]   ;;  %v1428_v27 = vshll.u32 %v4945_v48, 16  ;;  %v2116_v4 = vunpack.c.l.b16 %v5312_v20 }
  0xbd   :  { %v2111_v8 = vpack.i.b16 %v2110_v10, %v2109_v57  ;;  %v2301_v25 = vunpack.c.l.b16 %v2300_v6  ;;  %v2302_v40 = vunpack.c.h.b16 %v2300_v6  ;;  %v1778_v39 = vpack.i.b16 %v1777_v38, %v1776_v53  ;;  %4349 = vmatpush3.bf16.msra.mxu0 %v5318_v5  ;;  %v5357_v55 = vld.sshfl [vmem:[#allocation2 + $0x38] sm:$0x5 pattern:$0x75316420] }
  0xbe   :  { %3540 = vmatmul.mubr.bf16.vlgmr.msra.gmra.mrb[32].mxu1 %v2104_v26  ;;  %v2282_v63 = vsel %vm647_vm3, %v2268_v52, %v2269_v0  ;;  %v1509_v56 = vunpack.c.l.b16 %v1508_v12  ;;  %v1510_v21 = vunpack.c.h.b16 %v1508_v12  ;;  %4350 = vmatprep.subr.bf16.mxu0 %v5333_v34  ;;  %v1430_v54 = vsel %vm4809_vm2, %v1423_v2, %v1428_v27  ;;  %v5360_v0 = vld.sshfl [vmem:[#allocation2 + $0x40] sm:$0x5 pattern:$0x75316420] }
  0xbf   :  { %4382 = vmatpush3.bf16.msra.mxu1 %v5039_v42  ;;  %v2112_v32 = vunpack.c.l.b16 %v2111_v8  ;;  %v2113_v49 = vunpack.c.h.b16 %v2111_v8  ;;  %v2303_v26 = vpack.i.b16 %v2302_v40, %v2301_v25  ;;  %v1779_v11 = vunpack.c.l.b16 %v1778_v39  ;;  %v4468_v40 = vld.sshfl [vmem:[#allocation2 + $0x30] sm:$0x5 pattern:$0x75316420] }
  0xc0   :  { %4375 = vmatprep.subr.bf16.mxu1 %v5285_v45  ;;  %v1780_v1 = vunpack.c.h.b16 %v1778_v39  ;;  %v2308_v62 = vunpack.c.l.b16 %v2282_v63  ;;  %v1511_v42 = vpack.i.b16 %v1510_v21, %v1509_v56  ;;  %v2309_v58 = vunpack.c.h.b16 %v2282_v63  ;;  %v5388_v27 = vld.sshfl [vmem:[#allocation2 + $0x60] sm:$0xfa pattern:$0x75316420] }
  0xc1   :  { %v2114_v24 = vpack.i.b16 %v2113_v49, %v2112_v32  ;;  %v2304_v60 = vunpack.c.l.b16 %v2303_v26  ;;  %v2305_v23 = vunpack.c.h.b16 %v2303_v26  ;;  %4351 = vmatpush3.bf16.msra.mxu0 %v5333_v34  ;;  %v2117_v52 = vunpack.c.h.b16 %v5312_v20  ;;  %v5372_v20 = vld [vmem:[%s5853_s1 + $0x230] sm:$0xff]  }
  0xc2   :  { %v1781_v61 = vpack.i.b16 %v1780_v1, %v1779_v11  ;;  %v1512_v15 = vunpack.c.l.b16 %v1511_v42  ;;  %v1513_v43 = vunpack.c.h.b16 %v1511_v42  ;;  %v2310_v53 = vpack.i.b16 %v2309_v58, %v2308_v62  ;;  %4352 = vmatprep.subr.bf16.mxu0 %v5345_v9  ;;  %v5374_v32 = vld.sshfl [vmem:[#allocation2 + $0x70] sm:$0xff pattern:$0x75316420] }
  0xc3   :  { %4383 = vmatpush3.bf16.msra.mxu1 %v5285_v45  ;;  %v2306_v57 = vpack.i.b16 %v2305_v23, %v2304_v60  ;;  %v1477_v45 = vrot.slane %v1430_v54, 1  ;;  %v5889_v8 = vrot.slane %v4913_v59, 1  ;;  %v113_v25 = vsel %vm4625_vm4, 0, %v112_v50  ;;  %v5402_v50 = vld [vmem:[%s5853_s1 + $0x238] sm:$0xff]  }
  0xc4   :  { %4376 = vmatprep.subr.bf16.mxu1 %v5302_v28  ;;  %v1782_v14 = vunpack.c.l.b16 %v1781_v61  ;;  %v1783_v18 = vunpack.c.h.b16 %v1781_v61  ;;  %v1514_v10 = vpack.i.b16 %v1513_v43, %v1512_v15  ;;  %v2311_v6 = vunpack.c.l.b16 %v2310_v53  ;;  %114 = vst [vmem:[#allocation2 + $0x4c] sm:$0x1] %v113_v25  ;;  %v5383_v11 = vld.sshfl [vmem:[#allocation2 + $0x50] sm:$0xfa pattern:$0x75316420] }
  0xc5   :  { %v2312_v38 = vunpack.c.h.b16 %v2310_v53  ;;  %3547 = vmatprep.mubr.bf16.mxu1 %v2306_v57  ;;  %v1490_v2 = vsel %vm647_vm3, %v5889_v8, %v1477_v45  ;;  %v1620_v39 = vcombine.low %v4468_v40, %v5057_v51  ;;  %v2118_v21 = vpack.i.b16 %v2117_v52, %v2116_v4  ;;  %v5385_v1 = vld.sshfl [vmem:[#allocation2 + $0x58] sm:$0xfa pattern:$0x75316420]  ;;  %4353 = vmatpush3.bf16.msra.mxu0 %v5345_v9 }
  0xc6   :  { %v1784_v12 = vpack.i.b16 %v1783_v18, %v1782_v14  ;;  %3451 = vmatmul.mubr.bf16.gmra.mrb[36].mxu0 %v1514_v10  ;;  %3548 = vmatmul.mubr.bf16.gmra.mrb[36].mxu1 %v2114_v24  ;;  %v1516_v56 = vunpack.c.l.b16 %v1490_v2  ;;  %v1517_v59 = vunpack.c.h.b16 %v1490_v2  ;;  %v1715_v51 = vshrl.u32 %v4993_v47, 16  ;;  %v5394_v15 = vld.sshfl [vmem:[#allocation2 + $0x68] sm:$0xfa pattern:$0x75316420] }
  0xc7   :  { %4384 = vmatpush3.bf16.msra.mxu1 %v5302_v28  ;;  %v2313_v63 = vpack.i.b16 %v2312_v38, %v2311_v6  ;;  %v5377_v49 = vrot.slane %v1620_v39, %v4736_v37  ;;  %v1971_v28 = vcombine.low %v3982_v19, %v5353_v31  ;;  %v1972_v26 = vcombine.low %v5357_v55, %v5360_v0  ;;  %v4469_v40 = vld.sshfl [vmem:[#allocation2 + $0x40] sm:$0x5 pattern:$0x75316420] }
  0xc8   :  { %3458 = vmatprep.mubr.bf16.mxu0 %v1784_v12  ;;  %4377 = vmatprep.subr.bf16.mxu1 %v5318_v5  ;;  %v1518_v24 = vpack.i.b16 %v1517_v59, %v1516_v56  ;;  %v2119_v58 = vunpack.c.l.b16 %v2118_v21  ;;  %v2120_v60 = vunpack.c.h.b16 %v2118_v21  ;;  %v1431_v4 = vshrl.u32 %v4945_v48, 16  ;;  %v5890_v48 = vld [vmem:[#allocation10_spill] sm:$0xff] }
  0xc9   :  { %v2314_v62 = vunpack.c.l.b16 %v2313_v63  ;;  %v2315_v42 = vunpack.c.h.b16 %v2313_v63  ;;  %v1979_v23 = vrot.slane %v1971_v28, %v4736_v37  ;;  %v1986_v61 = vrot.slane %v1972_v26, %v4736_v37  ;;  %4354 = vmatprep.subr.bf16.mxu0 %v5372_v20 }
  0xca   :  { %v1519_v53 = vunpack.c.l.b16 %v1518_v24  ;;  %v1520_v54 = vunpack.c.h.b16 %v1518_v24  ;;  %v2121_v19 = vpack.i.b16 %v2120_v60, %v2119_v58  ;;  %v1639_v14 = vcombine.low %v5890_v48, %v5374_v32  ;;  %4355 = vmatpush3.bf16.msra.mxu0 %v5372_v20 }
  0xcb   :  { %4385 = vmatpush3.bf16.msra.mxu1 %v5318_v5  ;;  %v2316_v43 = vpack.i.b16 %v2315_v42, %v2314_v62  ;;  %v1987_v57 = vcombine.low %v1979_v23, %v1986_v61  ;;  %v1640_v5 = vcombine.high %v5890_v48, %v5374_v32  ;;  %v2017_v45 = vcombine.high %v5383_v11, %v5385_v1  ;;  %v5412_v52 = vld.sshfl [vmem:[#allocation2 + $0x48] sm:$0x5 pattern:$0x75316420] }
  0xcc   :  { %4378 = vmatprep.subr.bf16.mxu1 %v5333_v34  ;;  %v1521_v18 = vpack.i.b16 %v1520_v54, %v1519_v53  ;;  %v2019_v10 = vcombine.high %v5388_v27, %v5394_v15  ;;  %v2122_v6 = vunpack.c.l.b16 %v2121_v19  ;;  %v2123_v38 = vunpack.c.h.b16 %v2121_v19  ;;  %4356 = vmatprep.subr.bf16.mxu0 %v5402_v50  ;;  %v5441_v54 = vld.sshfl [vmem:[#allocation2 + $0x70] sm:$0xfa pattern:$0x75316420] }
  0xcd   :  { %3555 = vmatprep.mubr.bf16.mxu1 %v2316_v43  ;;  %v2270_v12 = vrot.slane %v1987_v57, 1  ;;  %v2126_v8 = vunpack.c.l.b16 %v1987_v57  ;;  %v1621_v39 = vcombine.low %v4469_v40, %v5412_v52  ;;  %v2225_v63 = vrot.slane %v5412_v52, %v4736_v37 }
  0xce   :  { %v1522_v2 = vunpack.c.l.b16 %v1521_v18  ;;  %v1523_v25 = vunpack.c.h.b16 %v1521_v18  ;;  %v2124_v56 = vpack.i.b16 %v2123_v38, %v2122_v6  ;;  %v2127_v59 = vunpack.c.h.b16 %v1987_v57  ;;  %4357 = vmatpush3.bf16.msra.mxu0 %v5402_v50  ;;  %v5891_v38 = vld [vmem:[#allocation9_spill] sm:$0xff] }
  0xcf   :  { %4386 = vmatpush3.bf16.msra.mxu1 %v5333_v34  ;;  %v5422_v21 = vrot.slane %v1639_v14, %v4736_v37  ;;  %v5425_v34 = vrot.slane %v1640_v5, %v4736_v37  ;;  %v1635_v26 = vrot.slane %v1621_v39, %v4736_v37  ;;  %v2271_v62 = vrot.slane %v2225_v63, 1 }
  0xd0   :  { %4379 = vmatprep.subr.bf16.mxu1 %v5345_v9  ;;  %v1524_v28 = vpack.i.b16 %v1523_v25, %v1522_v2  ;;  %v1436_v42 = vshll.u32 %v2225_v63, 16  ;;  %3556 = vmatmul.mubr.bf16.gmra.mrb[40].mxu1 %v2124_v56  ;;  %v2128_v24 = vpack.i.b16 %v2127_v59, %v2126_v8  ;;  %v5435_v23 = vrot.slane %v2017_v45, %v4736_v37 }
  0xd1   :  { %v1669_v58 = vcombine.low %v5157_v41, %v5422_v21  ;;  %v5432_v60 = vcombine.low %v5172_v36, %v5425_v34  ;;  %v1636_v61 = vcombine.low %v5377_v49, %v1635_v26  ;;  %v2283_v43 = vsel %vm647_vm3, %v2270_v12, %v2271_v62 }
  0xd2   :  { %3459 = vmatmul.mubr.bf16.gmra.mrb[40].mxu0 %v1524_v28  ;;  %v1438_v53 = vsel %vm4809_vm2, %v1431_v4, %v1436_v42  ;;  %v5444_v19 = vrot.slane %v2019_v10, %v4736_v37  ;;  %v2318_v57 = vunpack.c.l.b16 %v2283_v43  ;;  %v2319_v48 = vunpack.c.h.b16 %v2283_v43 }
  0xd3   :  { %v1479_v14 = vrot.slane %v1438_v53, 1  ;;  %v2129_v5 = vunpack.c.l.b16 %v2128_v24  ;;  %4387 = vmatpush3.bf16.msra.mxu1 %v5345_v9  ;;  %v1720_v18 = vshll.u32 %v1636_v61, 16  ;;  %v2130_v49 = vunpack.c.h.b16 %v2128_v24 }
  0xd4   :  { %v1724_v45 = vshrl.u32 %v1669_v58, 16  ;;  %v1729_v6 = vshll.u32 %v5432_v60, 16  ;;  %4380 = vmatprep.subr.bf16.mxu1 %v5372_v20  ;;  %v2320_v4 = vpack.i.b16 %v2319_v48, %v2318_v57  ;;  %v5892_v12 = vrot.slane %v5891_v38, 1 }
  0xd5   :  { %v5455_v8 = vcombine.low %v5435_v23, %v5444_v19  ;;  %v2233_v9 = vcombine.high %v5441_v54, %v5441_v54  ;;  %v1722_v2 = vsel %vm4809_vm2, %v1715_v51, %v1720_v18  ;;  %v2131_v39 = vpack.i.b16 %v2130_v49, %v2129_v5 }
  0xd6   :  { %v1491_v10 = vsel %vm647_vm3, %v5892_v12, %v1479_v14  ;;  %v1786_v63 = vunpack.c.l.b16 %v1722_v2  ;;  %v1787_v56 = vunpack.c.h.b16 %v1722_v2  ;;  %v2321_v59 = vunpack.c.l.b16 %v2320_v4 }
  0xd7   :  { %v1526_v25 = vunpack.c.l.b16 %v1491_v10  ;;  %v1527_v40 = vunpack.c.h.b16 %v1491_v10  ;;  %v2322_v28 = vunpack.c.h.b16 %v2320_v4  ;;  %4388 = vmatpush3.bf16.msra.mxu1 %v5372_v20  ;;  %v2132_v62 = vunpack.c.l.b16 %v2131_v39 }
  0xd8   :  { %v2133_v42 = vunpack.c.h.b16 %v2131_v39  ;;  %v1731_v24 = vsel %vm4809_vm2, %v1724_v45, %v1729_v6  ;;  %4381 = vmatprep.subr.bf16.mxu1 %v5402_v50  ;;  %v1788_v47 = vpack.i.b16 %v1787_v56, %v1786_v63  ;;  %v5468_v48 = vrot.slane %v2233_v9, %v4736_v37 }
  0xd9   :  { %v1528_v26 = vpack.i.b16 %v1527_v40, %v1526_v25  ;;  %v2323_v58 = vpack.i.b16 %v2322_v28, %v2321_v59  ;;  %v1796_v51 = vunpack.c.l.b16 %v1731_v24  ;;  %v1797_v61 = vunpack.c.h.b16 %v1731_v24 }
  0xda   :  { %v2134_v57 = vpack.i.b16 %v2133_v42, %v2132_v62  ;;  %v1789_v14 = vunpack.c.l.b16 %v1788_v47  ;;  %v1790_v20 = vunpack.c.h.b16 %v1788_v47  ;;  %v2272_v6 = vrot.slane %v5455_v8, 1 }
  0xdb   :  { %v1529_v43 = vunpack.c.l.b16 %v1528_v26  ;;  %v1530_v53 = vunpack.c.h.b16 %v1528_v26  ;;  %v2324_v5 = vunpack.c.l.b16 %v2323_v58  ;;  %v2325_v18 = vunpack.c.h.b16 %v2323_v58  ;;  %4389 = vmatpush3.bf16.msra.mxu1 %v5402_v50 }
  0xdc   :  { %v1798_v45 = vpack.i.b16 %v1797_v61, %v1796_v51  ;;  %v2273_v4 = vrot.slane %v5468_v48, 1  ;;  %v1791_v38 = vpack.i.b16 %v1790_v20, %v1789_v14  ;;  %v1375_v10 = vcombine.high %v5374_v32, %v5374_v32 }
  0xdd   :  { %v1531_v49 = vpack.i.b16 %v1530_v53, %v1529_v43  ;;  %v2326_v12 = vpack.i.b16 %v2325_v18, %v2324_v5  ;;  %v1382_v9 = vrot.slane %v5374_v32, %v4736_v37  ;;  %v2136_v58 = vunpack.c.l.b16 %v5455_v8 }
  0xde   :  { %v1799_v40 = vunpack.c.l.b16 %v1798_v45  ;;  %v1800_v39 = vunpack.c.h.b16 %v1798_v45  ;;  %v1792_v63 = vunpack.c.l.b16 %v1791_v38  ;;  %v1793_v50 = vunpack.c.h.b16 %v1791_v38 }
  0xdf   :  { %v1532_v2 = vunpack.c.l.b16 %v1531_v49  ;;  %v1533_v25 = vunpack.c.h.b16 %v1531_v49  ;;  %3563 = vmatprep.mubr.bf16.mxu1 %v2326_v12  ;;  %v2284_v56 = vsel %vm647_vm3, %v2272_v6, %v2273_v4  ;;  %v5479_v59 = vrot.slane %v1375_v10, %v4736_v37 }
  0xe0   :  { %3564 = vmatmul.mubr.bf16.gmra.mrb[44].mxu1 %v2134_v57  ;;  %v1801_v26 = vpack.i.b16 %v1800_v39, %v1799_v40  ;;  %v2328_v62 = vunpack.c.l.b16 %v2284_v56  ;;  %v2329_v42 = vunpack.c.h.b16 %v2284_v56  ;;  %v1794_v24 = vpack.i.b16 %v1793_v50, %v1792_v63 }
  0xe1   :  { %v1534_v28 = vpack.i.b16 %v1533_v25, %v1532_v2  ;;  %v1440_v47 = vshrl.u32 %v1382_v9, 16  ;;  %v1445_v32 = vshll.u32 %v5479_v59, 16  ;;  %v2137_v53 = vunpack.c.h.b16 %v5455_v8 }
  0xe2   :  { %v1802_v51 = vunpack.c.l.b16 %v1801_v26  ;;  %v1803_v61 = vunpack.c.h.b16 %v1801_v26  ;;  %v2330_v43 = vpack.i.b16 %v2329_v42, %v2328_v62  ;;  %3466 = vmatprep.mubr.bf16.mxu0 %v1794_v24  ;;  %v5488_v57 = vcombine.high %v5157_v41, %v5422_v21 }
  0xe3   :  { %v1447_v14 = vsel %vm4809_vm2, %v1440_v47, %v1445_v32  ;;  %v1732_v20 = vshrl.u32 %v5432_v60, 16  ;;  %v2016_v5 = vcombine.low %v5383_v11, %v5385_v1  ;;  %3467 = vmatmul.mubr.bf16.gmra.mrb[44].mxu0 %v1534_v28  ;;  %v2138_v4 = vpack.i.b16 %v2137_v53, %v2136_v58 }
  0xe4   :  { %v1804_v18 = vpack.i.b16 %v1803_v61, %v1802_v51  ;;  %v2331_v49 = vunpack.c.l.b16 %v2330_v43  ;;  %v2332_v45 = vunpack.c.h.b16 %v2330_v43  ;;  %v1481_v6 = vrot.slane %v1447_v14, 1 }
  0xe5   :  { %v1737_v8 = vshll.u32 %v5488_v57, 16  ;;  %v2018_v38 = vcombine.low %v5388_v27, %v5394_v15  ;;  %v2026_v12 = vrot.slane %v2016_v5, %v4736_v37  ;;  %v5893_v21 = vrot.slane %v5194_v44, 1 }
  0xe6   :  { %3474 = vmatprep.mubr.bf16.mxu0 %v1804_v18  ;;  %v2333_v41 = vpack.i.b16 %v2332_v45, %v2331_v49  ;;  %v2240_v11 = vrot.slane %v5441_v54, %v4736_v37  ;;  %v5502_v10 = vcombine.high %v1382_v9, %v1382_v9  ;;  %v2139_v40 = vunpack.c.l.b16 %v2138_v4 }
  0xe7   :  { %v1492_v60 = vsel %vm647_vm3, %v5893_v21, %v1481_v6  ;;  %v2140_v39 = vunpack.c.h.b16 %v2138_v4  ;;  %v1739_v56 = vsel %vm4809_vm2, %v1732_v20, %v1737_v8  ;;  %v2040_v28 = vrot.slane %v2018_v38, %v4736_v37 }
  0xe8   :  { %v1536_v2 = vunpack.c.l.b16 %v1492_v60  ;;  %v1537_v25 = vunpack.c.h.b16 %v1492_v60  ;;  %v2334_v63 = vunpack.c.l.b16 %v2333_v41  ;;  %v2335_v50 = vunpack.c.h.b16 %v2333_v41 }
  0xe9   :  { %v2141_v44 = vpack.i.b16 %v2140_v39, %v2139_v40  ;;  %v1806_v62 = vunpack.c.l.b16 %v1739_v56  ;;  %v1807_v42 = vunpack.c.h.b16 %v1739_v56  ;;  %v2048_v47 = vcombine.high %v2026_v12, %v2040_v28 }
  0xea   :  { %v1538_v26 = vpack.i.b16 %v1537_v25, %v1536_v2  ;;  %v2336_v24 = vpack.i.b16 %v2335_v50, %v2334_v63  ;;  %v2248_v32 = vcombine.high %v2240_v11, %v2240_v11  ;;  %v1448_v9 = vshrl.u32 %v5479_v59, 16 }
  0xeb   :  { %v2142_v61 = vunpack.c.l.b16 %v2141_v44  ;;  %v2143_v43 = vunpack.c.h.b16 %v2141_v44  ;;  %v1808_v53 = vpack.i.b16 %v1807_v42, %v1806_v62  ;;  %v2274_v14 = vrot.slane %v2048_v47, 1 }
  0xec   :  { %v1539_v58 = vunpack.c.l.b16 %v1538_v26  ;;  %v1540_v51 = vunpack.c.h.b16 %v1538_v26  ;;  %3571 = vmatprep.mubr.bf16.mxu1 %v2336_v24  ;;  %v2275_v5 = vrot.slane %v2248_v32, 1  ;;  %v1453_v20 = vshll.u32 %v5502_v10, 16 }
  0xed   :  { %v2144_v49 = vpack.i.b16 %v2143_v43, %v2142_v61  ;;  %v2146_v45 = vunpack.c.l.b16 %v2048_v47  ;;  %v2147_v6 = vunpack.c.h.b16 %v2048_v47  ;;  %v1809_v4 = vunpack.c.l.b16 %v1808_v53 }
  0xee   :  { %v1541_v18 = vpack.i.b16 %v1540_v51, %v1539_v58  ;;  %v1810_v8 = vunpack.c.h.b16 %v1808_v53  ;;  %v2285_v38 = vsel %vm647_vm3, %v2274_v14, %v2275_v5  ;;  %v1455_v12 = vsel %vm4809_vm2, %v1448_v9, %v1453_v20 }
  0xef   :  { %3572 = vmatmul.mubr.bf16.gmra.mrb[48].mxu1 %v2144_v49  ;;  %v2338_v60 = vunpack.c.l.b16 %v2285_v38  ;;  %v2339_v11 = vunpack.c.h.b16 %v2285_v38  ;;  %v1483_v25 = vrot.slane %v1455_v12, 1  ;;  %v2148_v40 = vpack.i.b16 %v2147_v6, %v2146_v45 }
  0xf0   :  { %v1542_v41 = vunpack.c.l.b16 %v1541_v18  ;;  %v1543_v21 = vunpack.c.h.b16 %v1541_v18  ;;  %v1811_v2 = vpack.i.b16 %v1810_v8, %v1809_v4  ;;  %v5514_v39 = vcombine.high %v5172_v36, %v5425_v34 }
  0xf1   :  { %v2340_v50 = vpack.i.b16 %v2339_v11, %v2338_v60  ;;  %v1740_v56 = vshrl.u32 %v5488_v57, 16  ;;  %v5519_v28 = vcombine.high %v5435_v23, %v5444_v19  ;;  %v1493_v62 = vsel %vm647_vm3, %v1482_v30, %v1483_v25  ;;  %v118_v11 = vld [vmem:[#allocation2 + $0x9c] sm:$0x1] }
  0xf2   :  { %v1544_v63 = vpack.i.b16 %v1543_v21, %v1542_v41  ;;  %v1812_v26 = vunpack.c.l.b16 %v1811_v2  ;;  %v1813_v44 = vunpack.c.h.b16 %v1811_v2  ;;  %v2149_v42 = vunpack.c.l.b16 %v2148_v40 }
  0xf3   :  { %v2341_v24 = vunpack.c.l.b16 %v2340_v50  ;;  %v2342_v47 = vunpack.c.h.b16 %v2340_v50  ;;  %v1546_v36 = vunpack.c.l.b16 %v1493_v62  ;;  %v1547_v34 = vunpack.c.h.b16 %v1493_v62 }
  0xf4   :  { %3475 = vmatmul.mubr.bf16.gmra.mrb[48].mxu0 %v1544_v63  ;;  %v1814_v32 = vpack.i.b16 %v1813_v44, %v1812_v26  ;;  %v2150_v9 = vunpack.c.h.b16 %v2148_v40  ;;  %v1745_v57 = vshll.u32 %v5514_v39, 16  ;;  %v2249_v23 = vcombine.high %v5468_v48, %v5468_v48  ;;  %v3990_v44 = vld.sshfl [vmem:[#allocation2 + $0x78] sm:$0x5 pattern:$0x75316420] }
  0xf5   :  { %v2343_v19 = vpack.i.b16 %v2342_v47, %v2341_v24  ;;  %v1548_v58 = vpack.i.b16 %v1547_v34, %v1546_v36  ;;  %v2276_v51 = vrot.slane %v5519_v28, 1  ;;  %v5530_v46 = vcombine.high %v5479_v59, %v5479_v59  ;;  %v5545_v36 = vld.sshfl [vmem:[#allocation2 + $0x80] sm:$0x5 pattern:$0x75316420] }
  0xf6   :  { %3482 = vmatprep.mubr.bf16.mxu0 %v1814_v32  ;;  %v2151_v30 = vpack.i.b16 %v2150_v9, %v2149_v42  ;;  %v1747_v61 = vsel %vm4809_vm2, %v1740_v56, %v1745_v57  ;;  %v2277_v43 = vrot.slane %v2249_v23, 1  ;;  %v1456_v53 = vshrl.u32 %v5502_v10, 16  ;;  %v5550_v23 = vld.sshfl [vmem:[#allocation2 + $0x88] sm:$0x5 pattern:$0x75316420] }
  0xf7   :  { %v2344_v14 = vunpack.c.l.b16 %v2343_v19  ;;  %v2345_v5 = vunpack.c.h.b16 %v2343_v19  ;;  %v1549_v20 = vunpack.c.l.b16 %v1548_v58  ;;  %v1550_v48 = vunpack.c.h.b16 %v1548_v58 }
  0xf8   :  { %v2152_v18 = vunpack.c.l.b16 %v2151_v30  ;;  %v2153_v49 = vunpack.c.h.b16 %v2151_v30  ;;  %v1816_v45 = vunpack.c.l.b16 %v1747_v61  ;;  %v1817_v6 = vunpack.c.h.b16 %v1747_v61 }
  0xf9   :  { %v2346_v4 = vpack.i.b16 %v2345_v5, %v2344_v14  ;;  %v1551_v8 = vpack.i.b16 %v1550_v48, %v1549_v20  ;;  %v2286_v59 = vsel %vm647_vm3, %v2276_v51, %v2277_v43  ;;  %v1461_v38 = vshll.u32 %v5530_v46, 16  ;;  %v5553_v51 = vld.sshfl [vmem:[#allocation2 + $0x90] sm:$0x5 pattern:$0x75316420] }
  0xfa   :  { %v2154_v12 = vpack.i.b16 %v2153_v49, %v2152_v18  ;;  %v1818_v41 = vpack.i.b16 %v1817_v6, %v1816_v45  ;;  %v2348_v21 = vunpack.c.l.b16 %v2286_v59  ;;  %v2349_v60 = vunpack.c.h.b16 %v2286_v59 }
  0xfb   :  { %3579 = vmatprep.mubr.bf16.mxu1 %v2346_v4  ;;  %v1552_v10 = vunpack.c.l.b16 %v1551_v8  ;;  %v1553_v2 = vunpack.c.h.b16 %v1551_v8  ;;  %v1463_v25 = vsel %vm4809_vm2, %v1456_v53, %v1461_v38  ;;  %v2156_v40 = vunpack.c.l.b16 %v5519_v28  ;;  %v5562_v38 = vld.sshfl [vmem:[#allocation2 + $0x8] sm:$0xfa pattern:$0x75316420] }
  0xfc   :  { %3580 = vmatmul.mubr.bf16.gmra.mrb[52].mxu1 %v2154_v12  ;;  %v1819_v63 = vunpack.c.l.b16 %v1818_v41  ;;  %v1820_v50 = vunpack.c.h.b16 %v1818_v41  ;;  %v2350_v56 = vpack.i.b16 %v2349_v60, %v2348_v21  ;;  %v1485_v26 = vrot.slane %v1463_v25, 1  ;;  %v5564_v12 = vld.sshfl [vmem:[#allocation2 + $0x10] sm:$0xfa pattern:$0x75316420] }
  0xfd   :  { %v1554_v62 = vpack.i.b16 %v1553_v2, %v1552_v10  ;;  %v2157_v42 = vunpack.c.h.b16 %v5519_v28  ;;  %v119_v24 = vsel %vm4625_vm4, 0, %v118_v11  ;;  %v1673_v47 = vcombine.low %v5235_v29, %v5246_v7  ;;  %v5570_v2 = vld.sshfl [vmem:[#allocation2 + $0x18] sm:$0xfa pattern:$0x75316420] }
  0xfe   :  { %v1821_v34 = vpack.i.b16 %v1820_v50, %v1819_v63  ;;  %v2351_v32 = vunpack.c.l.b16 %v2350_v56  ;;  %v2352_v9 = vunpack.c.h.b16 %v2350_v56  ;;  %v1494_v57 = vsel %vm647_vm3, %v1484_v16, %v1485_v26  ;;  %120 = vst [vmem:[#allocation2 + $0x9c] sm:$0x1] %v119_v24  ;;  %v5572_v25 = vld.sshfl [vmem:[#allocation2 + $0x20] sm:$0xfa pattern:$0x75316420] }
  0xff   :  { %3483 = vmatmul.mubr.bf16.gmra.mrb[52].mxu0 %v1554_v62  ;;  %v1556_v28 = vunpack.c.l.b16 %v1494_v57  ;;  %v1557_v19 = vunpack.c.h.b16 %v1494_v57  ;;  %v2158_v33 = vpack.i.b16 %v2157_v42, %v2156_v40  ;;  %v1681_v58 = vrot.slane %v1673_v47, %v4736_v37 }
 0x100   :  { %v1822_v29 = vunpack.c.l.b16 %v1821_v34  ;;  %v1823_v7 = vunpack.c.h.b16 %v1821_v34  ;;  %v2353_v30 = vpack.i.b16 %v2352_v9, %v2351_v32  ;;  %v1748_v61 = vshrl.u32 %v5514_v39, 16 }
 0x101   :  { %v1558_v43 = vpack.i.b16 %v1557_v19, %v1556_v28  ;;  %v2159_v22 = vunpack.c.l.b16 %v2158_v33  ;;  %v2160_v53 = vunpack.c.h.b16 %v2158_v33  ;;  %v2079_v16 = vcombine.low %v3990_v44, %v5545_v36 }
 0x102   :  { %v1824_v14 = vpack.i.b16 %v1823_v7, %v1822_v29  ;;  %v2354_v5 = vunpack.c.l.b16 %v2353_v30  ;;  %v2355_v20 = vunpack.c.h.b16 %v2353_v30  ;;  %v2080_v48 = vcombine.low %v5550_v23, %v5553_v51 }
 0x103   :  { %v1559_v18 = vunpack.c.l.b16 %v1558_v43  ;;  %v1560_v49 = vunpack.c.h.b16 %v1558_v43  ;;  %v2161_v45 = vpack.i.b16 %v2160_v53, %v2159_v22  ;;  %v2087_v6 = vrot.slane %v2079_v16, %v4736_v37 }
 0x104   :  { %3490 = vmatprep.mubr.bf16.mxu0 %v1824_v14  ;;  %v2356_v4 = vpack.i.b16 %v2355_v20, %v2354_v5  ;;  %v2094_v8 = vrot.slane %v2080_v48, %v4736_v37  ;;  %v1464_v59 = vshrl.u32 %v5530_v46, 16  ;;  %v2377_v41 = vcombine.high %v5562_v38, %v5564_v12 }
 0x105   :  { %v1561_v21 = vpack.i.b16 %v1560_v49, %v1559_v18  ;;  %v2162_v60 = vunpack.c.l.b16 %v2161_v45  ;;  %v2163_v11 = vunpack.c.h.b16 %v2161_v45  ;;  %v5568_v10 = vld.sshfl [vmem:[#allocation2 + $0x98] sm:$0x5 pattern:$0x75316420]  ;;  %v2379_v40 = vcombine.high %v5570_v2, %v5572_v25 }
 0x106   :  { %3587 = vmatprep.mubr.bf16.mxu1 %v2356_v4  ;;  %v1674_v46 = vcombine.low %v5258_v3, %v5568_v10  ;;  %v2095_v63 = vcombine.low %v2087_v6, %v2094_v8  ;;  %v2263_v50 = vrot.slane %v5568_v10, %v4736_v37  ;;  %v5581_v56 = vrot.slane %v2377_v41, %v4736_v37 }
 0x107   :  { %v1562_v26 = vunpack.c.l.b16 %v1561_v21  ;;  %v1563_v44 = vunpack.c.h.b16 %v1561_v21  ;;  %v2164_v62 = vpack.i.b16 %v2163_v11, %v2162_v60  ;;  %v5584_v42 = vrot.slane %v2379_v40, %v4736_v37 }
 0x108   :  { %v1688_v24 = vrot.slane %v1674_v46, %v4736_v37  ;;  %v2278_v47 = vrot.slane %v2095_v63, 1  ;;  %v2279_v34 = vrot.slane %v2263_v50, 1  ;;  %v1469_v32 = vshll.u32 %v2263_v50, 16 }
 0x109   :  { %v1564_v9 = vpack.i.b16 %v1563_v44, %v1562_v26  ;;  %3588 = vmatmul.mubr.bf16.gmra.mrb[56].mxu1 %v2164_v62  ;;  %v2166_v3 = vunpack.c.l.b16 %v2095_v63  ;;  %v2167_v57 = vunpack.c.h.b16 %v2095_v63  ;;  %v2409_v28 = vcombine.low %v5581_v56, %v5584_v42 }
 0x10a   :  { %v1689_v19 = vcombine.low %v1681_v58, %v1688_v24  ;;  %v2287_v33 = vsel %vm647_vm3, %v2278_v47, %v2279_v34  ;;  %v1471_v29 = vsel %vm4809_vm2, %v1464_v59, %v1469_v32  ;;  %v2429_v7 = vcombine.high %v5385_v1, %v5388_v27 }
 0x10b   :  { %3491 = vmatmul.mubr.bf16.gmra.mrb[56].mxu0 %v1564_v9  ;;  %v2358_v30 = vunpack.c.l.b16 %v2287_v33  ;;  %v2359_v43 = vunpack.c.h.b16 %v2287_v33  ;;  %v1487_v22 = vrot.slane %v1471_v29, 1  ;;  %v2168_v53 = vpack.i.b16 %v2167_v57, %v2166_v3 }
 0x10c   :  { %v1753_v16 = vshll.u32 %v1689_v19, 16  ;;  %v2480_v14 = vunpack.c.l.b16 %v2409_v28  ;;  %v2481_v5 = vunpack.c.h.b16 %v2409_v28  ;;  %v2431_v20 = vcombine.high %v5394_v15, %v5441_v54 }
 0x10d   :  { %v2360_v58 = vpack.i.b16 %v2359_v43, %v2358_v30  ;;  %v1495_v48 = vsel %vm647_vm3, %v1486_v35, %v1487_v22  ;;  %v2169_v18 = vunpack.c.l.b16 %v2168_v53  ;;  %v2170_v49 = vunpack.c.h.b16 %v2168_v53 }
 0x10e   :  { %v1755_v45 = vsel %vm4809_vm2, %v1748_v61, %v1753_v16  ;;  %v1566_v6 = vunpack.c.l.b16 %v1495_v48  ;;  %v1567_v4 = vunpack.c.h.b16 %v1495_v48  ;;  %v2482_v8 = vpack.i.b16 %v2481_v5, %v2480_v14 }
 0x10f   :  { %v1826_v59 = vunpack.c.l.b16 %v1755_v45  ;;  %v1827_v41 = vunpack.c.h.b16 %v1755_v45  ;;  %v2361_v21 = vunpack.c.l.b16 %v2360_v58  ;;  %v2362_v60 = vunpack.c.h.b16 %v2360_v58  ;;  %v5605_v32 = vpop.f32.mrb[0].mxu0 }
 0x110   :  { %v1568_v11 = vpack.i.b16 %v1567_v4, %v1566_v6  ;;  %v2171_v40 = vpack.i.b16 %v2170_v49, %v2169_v18  ;;  %v2483_v46 = vunpack.c.l.b16 %v2482_v8  ;;  %v2484_v13 = vunpack.c.h.b16 %v2482_v8  ;;  %v5607_v19 = vpop.f32.mrb[1].mxu0 }
 0x111   :  { %v1828_v63 = vpack.i.b16 %v1827_v41, %v1826_v59  ;;  %v2363_v35 = vpack.i.b16 %v2362_v60, %v2361_v21  ;;  %v2445_v50 = vrot.slane %v2429_v7, %v4736_v37  ;;  %v2459_v39 = vrot.slane %v2431_v20, %v4736_v37  ;;  %v5613_v43 = vpop.f32.mrb[0].mxu1  ;;  %v5615_v22 = vpop.f32.mrb[2].mxu0 }
 0x112   :  { %v1569_v26 = vunpack.c.l.b16 %v1568_v11  ;;  %v1570_v17 = vunpack.c.h.b16 %v1568_v11  ;;  %v2172_v61 = vunpack.c.l.b16 %v2171_v40  ;;  %v2173_v44 = vunpack.c.h.b16 %v2171_v40  ;;  %v5617_v20 = vpop.f32.mrb[1].mxu1  ;;  %v5619_v58 = vpop.f32.mrb[3].mxu0 }
 0x113   :  { %v1829_v62 = vunpack.c.l.b16 %v1828_v63  ;;  %v1830_v24 = vunpack.c.h.b16 %v1828_v63  ;;  %v2364_v47 = vunpack.c.l.b16 %v2363_v35  ;;  %v2365_v34 = vunpack.c.h.b16 %v2363_v35 }
 0x114   :  { %v1571_v9 = vpack.i.b16 %v1570_v17, %v1569_v26  ;;  %v2174_v3 = vpack.i.b16 %v2173_v44, %v2172_v61  ;;  %v2485_v57 = vpack.i.b16 %v2484_v13, %v2483_v46  ;;  %v2461_v28 = vcombine.low %v2445_v50, %v2459_v39 }
 0x115   :  { %v1831_v33 = vpack.i.b16 %v1830_v24, %v1829_v62  ;;  %v2366_v29 = vpack.i.b16 %v2365_v34, %v2364_v47  ;;  %v2376_v7 = vcombine.low %v5562_v38, %v5564_v12  ;;  %v2378_v30 = vcombine.low %v5570_v2, %v5572_v25  ;;  %v5621_v12 = vpop.f32.mrb[2].mxu1 }
 0x116   :  { %v1572_v53 = vunpack.c.l.b16 %v1571_v9  ;;  %v1573_v16 = vunpack.c.h.b16 %v1571_v9  ;;  %v2486_v14 = vunpack.c.l.b16 %v2485_v57  ;;  %v2487_v5 = vunpack.c.h.b16 %v2485_v57  ;;  %v5625_v4 = vpop.f32.mrb[3].mxu1 }
 0x117   :  { %v1832_v48 = vunpack.c.l.b16 %v1831_v33  ;;  %v1833_v18 = vunpack.c.h.b16 %v1831_v33  ;;  %3595 = vmatprep.mubr.bf16.mxu1 %v2366_v29  ;;  %v2520_v49 = vunpack.c.l.b16 %v2461_v28  ;;  %v2521_v38 = vunpack.c.h.b16 %v2461_v28 }
 0x118   :  { %v1574_v2 = vpack.i.b16 %v1573_v16, %v1572_v53  ;;  %3596 = vmatmul.mubr.bf16.gmra.mrb[60].mxu1 %v2174_v3  ;;  %v2488_v25 = vpack.i.b16 %v2487_v5, %v2486_v14  ;;  %v2386_v45 = vrot.slane %v2376_v7, %v4736_v37  ;;  %v2400_v6 = vrot.slane %v2378_v30, %v4736_v37 }
 0x119   :  { %v1834_v8 = vpack.i.b16 %v1833_v18, %v1832_v48  ;;  %v2522_v59 = vpack.i.b16 %v2521_v38, %v2520_v49  ;;  %v2428_v41 = vcombine.low %v5385_v1, %v5388_v27  ;;  %v2430_v21 = vcombine.low %v5394_v15, %v5441_v54 }
 0x11a   :  { %v2408_v60 = vcombine.high %v2386_v45, %v2400_v6  ;;  %v2410_v11 = vcombine.high %v5581_v56, %v5584_v42  ;;  %v2462_v40 = vcombine.high %v2445_v50, %v2459_v39  ;;  %v2411_v46 = vcombine.low %v5353_v31, %v5357_v55  ;;  %v5640_v44 = vpop.f32.mrb[4].mxu0 }
 0x11b   :  { %3498 = vmatprep.mubr.bf16.mxu0 %v1834_v8  ;;  %v2523_v13 = vunpack.c.l.b16 %v2522_v59  ;;  %v2524_v63 = vunpack.c.h.b16 %v2522_v59  ;;  %v2438_v35 = vrot.slane %v2428_v41, %v4736_v37  ;;  %v2452_v26 = vrot.slane %v2430_v21, %v4736_v37  ;;  %v4093_v9 = vpop.f32.mrb[5].mxu0 }
 0x11c   :  { %3499 = vmatmul.mubr.bf16.gmra.mrb[60].mxu0 %v1574_v2  ;;  %v2490_v1 = vunpack.c.l.b16 %v2408_v60  ;;  %v2491_v27 = vunpack.c.h.b16 %v2408_v60  ;;  %v2500_v17 = vunpack.c.l.b16 %v2410_v11  ;;  %v2501_v15 = vunpack.c.h.b16 %v2410_v11  ;;  %v4095_v29 = vpop.f32.mrb[6].mxu0 }
 0x11d   :  { %4358 = vmatprep.mubr.bf16.mxu0 %v2488_v25  ;;  %v2525_v54 = vpack.i.b16 %v2524_v63, %v2523_v13  ;;  %v2460_v61 = vcombine.high %v2438_v35, %v2452_v26  ;;  %v2540_v56 = vunpack.c.l.b16 %v2462_v40  ;;  %v2541_v42 = vunpack.c.h.b16 %v2462_v40 }
 0x11e   :  { %v2492_v50 = vpack.i.b16 %v2491_v27, %v2490_v1  ;;  %v2502_v39 = vpack.i.b16 %v2501_v15, %v2500_v17  ;;  %v2412_v31 = vcombine.low %v5360_v0, %v5412_v52  ;;  %v2419_v55 = vrot.slane %v2411_v46, %v4736_v37  ;;  %v4096_v0 = vpop.f32.mrb[7].mxu0 }
 0x11f   :  { %v2526_v62 = vunpack.c.l.b16 %v2525_v54  ;;  %v2527_v24 = vunpack.c.h.b16 %v2525_v54  ;;  %v2530_v47 = vunpack.c.l.b16 %v2460_v61  ;;  %v2531_v34 = vunpack.c.h.b16 %v2460_v61  ;;  %v4156_v25 = vpop.f32.mrb[4].mxu1 }
 0x120   :  { %v2493_v3 = vunpack.c.l.b16 %v2492_v50  ;;  %v2494_v57 = vunpack.c.h.b16 %v2492_v50  ;;  %v2503_v28 = vunpack.c.l.b16 %v2502_v39  ;;  %v2504_v33 = vunpack.c.h.b16 %v2502_v39  ;;  %v4157_v41 = vpop.f32.mrb[5].mxu1 }
 0x121   :  { %v2528_v7 = vpack.i.b16 %v2527_v24, %v2526_v62  ;;  %v2532_v30 = vpack.i.b16 %v2531_v34, %v2530_v47  ;;  %v2542_v53 = vpack.i.b16 %v2541_v42, %v2540_v56  ;;  %v2426_v16 = vrot.slane %v2412_v31, %v4736_v37 }
 0x122   :  { %v2495_v52 = vpack.i.b16 %v2494_v57, %v2493_v3  ;;  %v2505_v14 = vpack.i.b16 %v2504_v33, %v2503_v28  ;;  %v2463_v5 = vcombine.low %v5545_v36, %v5550_v23  ;;  %v2464_v48 = vcombine.low %v5553_v51, %v5568_v10  ;;  %v4159_v36 = vpop.f32.mrb[6].mxu1 }
 0x123   :  { %4366 = vmatprep.mubr.bf16.mxu1 %v2528_v7  ;;  %v2533_v18 = vunpack.c.l.b16 %v2532_v30  ;;  %v2534_v49 = vunpack.c.h.b16 %v2532_v30  ;;  %v2543_v38 = vunpack.c.l.b16 %v2542_v53  ;;  %v2544_v2 = vunpack.c.h.b16 %v2542_v53  ;;  %v4160_v13 = vpop.f32.mrb[7].mxu1 }
 0x124   :  { %v2496_v45 = vunpack.c.l.b16 %v2495_v52  ;;  %v2497_v6 = vunpack.c.h.b16 %v2495_v52  ;;  %v2506_v8 = vunpack.c.l.b16 %v2505_v14  ;;  %v2507_v59 = vunpack.c.h.b16 %v2505_v14  ;;  %v4098_v61 = vpop.f32.mrb[8].mxu0 }
 0x125   :  { %v2535_v21 = vpack.i.b16 %v2534_v49, %v2533_v18  ;;  %v2545_v60 = vpack.i.b16 %v2544_v2, %v2543_v38  ;;  %v2427_v11 = vcombine.low %v2419_v55, %v2426_v16  ;;  %v2471_v40 = vrot.slane %v2463_v5, %v4736_v37 }
 0x126   :  { %v2498_v23 = vpack.i.b16 %v2497_v6, %v2496_v45  ;;  %v2508_v46 = vpack.i.b16 %v2507_v59, %v2506_v8  ;;  %v2478_v51 = vrot.slane %v2464_v48, %v4736_v37  ;;  %v4088_v10 = vadd.f32 %v5607_v19, %v5605_v32  ;;  %v4099_v19 = vpop.f32.mrb[9].mxu0 }
 0x127   :  { %v2536_v63 = vunpack.c.l.b16 %v2535_v21  ;;  %v2537_v35 = vunpack.c.h.b16 %v2535_v21  ;;  %v2546_v26 = vunpack.c.l.b16 %v2545_v60  ;;  %v2547_v1 = vunpack.c.h.b16 %v2545_v60  ;;  %v4101_v62 = vpop.f32.mrb[10].mxu0  ;;  %v4162_v34 = vpop.f32.mrb[8].mxu1 }
 0x128   :  { %4359 = vmatmul.mubr.bf16.vlgmr.msra.gmra.mrb[64].mxu0 %v2498_v23  ;;  %v2510_v27 = vunpack.c.l.b16 %v2427_v11  ;;  %v2511_v17 = vunpack.c.h.b16 %v2427_v11  ;;  %v2479_v15 = vcombine.low %v2471_v40, %v2478_v51  ;;  %v4152_v54 = vadd.f32 %v5617_v20, %v5613_v43  ;;  %v4102_v3 = vpop.f32.mrb[11].mxu0  ;;  %v4163_v57 = vpop.f32.mrb[9].mxu1 }
 0x129   :  { %v2538_v56 = vpack.i.b16 %v2537_v35, %v2536_v63  ;;  %4362 = vmatprep.mubr.bf16.mxu0 %v2508_v46  ;;  %v2548_v42 = vpack.i.b16 %v2547_v1, %v2546_v26  ;;  %v4091_v37 = vadd.f32 %v5619_v58, %v5615_v22  ;;  %v4155_v32 = vadd.f32 %v5625_v4, %v5621_v12  ;;  %v4165_v30 = vpop.f32.mrb[10].mxu1 }
 0x12a   :  { %v2512_v50 = vpack.i.b16 %v2511_v17, %v2510_v27  ;;  %v2550_v39 = vunpack.c.l.b16 %v2479_v15  ;;  %v2551_v31 = vunpack.c.h.b16 %v2479_v15  ;;  %v5657_v55 = vadd.f32 %v4152_v54, %v4088_v10 }
 0x12b   :  { %4367 = vmatmul.mubr.bf16.vlgmr.msra.gmra.mrb[64].mxu1 %v2538_v56  ;;  %v5659_v24 = vadd.f32 %v4155_v32, %v4091_v37  ;;  %v4094_v43 = vadd.f32 %v4093_v9, %v5640_v44  ;;  %v4158_v20 = vadd.f32 %v4157_v41, %v4156_v25  ;;  %v4097_v47 = vadd.f32 %v4096_v0, %v4095_v29  ;;  %v4166_v9 = vpop.f32.mrb[11].mxu1 }
 0x12c   :  { %4370 = vmatprep.mubr.bf16.mxu1 %v2548_v42  ;;  %v2513_v22 = vunpack.c.l.b16 %v2512_v50  ;;  %v2514_v58 = vunpack.c.h.b16 %v2512_v50  ;;  %v2552_v12 = vpack.i.b16 %v2551_v31, %v2550_v39  ;;  %v4161_v4 = vadd.f32 %v4160_v13, %v4159_v36 }
 0x12d   :  { %v5662_v28 = vadd.f32 %v4158_v20, %v4094_v43  ;;  %v4100_v33 = vadd.f32 %v4099_v19, %v4098_v61  ;;  %v4164_v7 = vadd.f32 %v4163_v57, %v4162_v34  ;;  %v4103_v53 = vadd.f32 %v4102_v3, %v4101_v62 }
 0x12e   :  { %v2515_v16 = vpack.i.b16 %v2514_v58, %v2513_v22  ;;  %v2553_v52 = vunpack.c.l.b16 %v2552_v12  ;;  %v2554_v14 = vunpack.c.h.b16 %v2552_v12  ;;  %v5664_v44 = vadd.f32 %v4161_v4, %v4097_v47 }
 0x12f   :  { %v5666_v29 = vadd.f32 %v4164_v7, %v4100_v33  ;;  %v4167_v0 = vadd.f32 %v4166_v9, %v4165_v30 }
 0x130   :  { %v2516_v5 = vunpack.c.l.b16 %v2515_v16  ;;  %v2517_v48 = vunpack.c.h.b16 %v2515_v16  ;;  %v2555_v18 = vpack.i.b16 %v2554_v14, %v2553_v52 }
 0x131   :  { %v5668_v49 = vadd.f32 %v4167_v0, %v4103_v53 }
 0x132   :  { %v2518_v38 = vpack.i.b16 %v2517_v48, %v2516_v5  ;;  %v2556_v2 = vunpack.c.l.b16 %v2555_v18  ;;  %v2557_v25 = vunpack.c.h.b16 %v2555_v18  ;;  %v4104_v6 = vpop.f32.mrb[12].mxu0 }
 0x133   :  { %v4105_v8 = vpop.f32.mrb[13].mxu0 }
 0x134   :  { %4363 = vmatmul.mubr.bf16.gmra.mrb[68].mxu0 %v2518_v38  ;;  %v2558_v45 = vpack.i.b16 %v2557_v25, %v2556_v2  ;;  %v4106_v59 = vadd.f32 %v4105_v8, %v4104_v6  ;;  %v4107_v41 = vpop.f32.mrb[14].mxu0 }
 0x135   :  { %v4108_v21 = vpop.f32.mrb[15].mxu0 }
 0x136   :  { %4371 = vmatmul.mubr.bf16.gmra.mrb[68].mxu1 %v2558_v45  ;;  %v4109_v60 = vadd.f32 %v4108_v21, %v4107_v41 }
 0x14e   :  { %v4168_v11 = vpop.f32.mrb[12].mxu1 }
 0x14f   :  { %v4169_v40 = vpop.f32.mrb[13].mxu1 }
 0x150   :  { %v4170_v36 = vadd.f32 %v4169_v40, %v4168_v11  ;;  %v4171_v23 = vpop.f32.mrb[14].mxu1 }
 0x151   :  { %v4172_v46 = vpop.f32.mrb[15].mxu1 }
 0x152   :  { %v5670_v51 = vadd.f32 %v4170_v36, %v4106_v59  ;;  %v4173_v10 = vadd.f32 %v4172_v46, %v4171_v23 }
 0x154   :  { %v5672_v13 = vadd.f32 %v4173_v10, %v4109_v60 }
 0x15b   :  { %v4110_v63 = vpop.f32.mrb[16].mxu0 }
 0x15c   :  { %v4174_v35 = vpop.f32.mrb[16].mxu1  ;;  %v4111_v26 = vpop.f32.mrb[17].mxu0 }
 0x15d   :  { %v4112_v1 = vadd.f32 %v4111_v26, %v4110_v63  ;;  %v4175_v27 = vpop.f32.mrb[17].mxu1  ;;  %v4113_v17 = vpop.f32.mrb[18].mxu0 }
 0x15e   :  { %v4176_v15 = vadd.f32 %v4175_v27, %v4174_v35  ;;  %v4177_v54 = vpop.f32.mrb[18].mxu1  ;;  %v4114_v61 = vpop.f32.mrb[19].mxu0 }
 0x15f   :  { %v4115_v56 = vadd.f32 %v4114_v61, %v4113_v17  ;;  %v4178_v42 = vpop.f32.mrb[19].mxu1 }
 0x160   :  { %v5674_v37 = vadd.f32 %v4176_v15, %v4112_v1  ;;  %v4179_v32 = vadd.f32 %v4178_v42, %v4177_v54 }
 0x162   :  { %v5676_v19 = vadd.f32 %v4179_v32, %v4115_v56 }
 0x165   :  { %v4116_v50 = vpop.f32.mrb[20].mxu0 }
 0x166   :  { %v4117_v39 = vpop.f32.mrb[21].mxu0 }
 0x167   :  { %v4118_v31 = vadd.f32 %v4117_v39, %v4116_v50  ;;  %v4119_v62 = vpop.f32.mrb[22].mxu0 }
 0x168   :  { %v4180_v43 = vpop.f32.mrb[20].mxu1  ;;  %v4120_v20 = vpop.f32.mrb[23].mxu0 }
 0x169   :  { %v4181_v47 = vpop.f32.mrb[21].mxu1  ;;  %v4121_v34 = vadd.f32 %v4120_v20, %v4119_v62 }
 0x16a   :  { %v4182_v3 = vadd.f32 %v4181_v47, %v4180_v43  ;;  %v4183_v22 = vpop.f32.mrb[22].mxu1 }
 0x16b   :  { %v4184_v58 = vpop.f32.mrb[23].mxu1 }
 0x16c   :  { %v5678_v12 = vadd.f32 %v4182_v3, %v4118_v31  ;;  %v4185_v4 = vadd.f32 %v4184_v58, %v4183_v22 }
 0x16e   :  { %v5680_v57 = vadd.f32 %v4185_v4, %v4121_v34  ;;  %v4122_v33 = vpop.f32.mrb[24].mxu0 }
 0x16f   :  { %v4123_v7 = vpop.f32.mrb[25].mxu0 }
 0x170   :  { %v4124_v30 = vadd.f32 %v4123_v7, %v4122_v33  ;;  %v4125_v53 = vpop.f32.mrb[26].mxu0 }
 0x171   :  { %v4126_v16 = vpop.f32.mrb[27].mxu0 }
 0x172   :  { %v4127_v52 = vadd.f32 %v4126_v16, %v4125_v53 }
 0x174   :  { %v4186_v14 = vpop.f32.mrb[24].mxu1 }
 0x175   :  { %v4187_v9 = vpop.f32.mrb[25].mxu1 }
 0x176   :  { %v4188_v0 = vadd.f32 %v4187_v9, %v4186_v14  ;;  %v4189_v5 = vpop.f32.mrb[26].mxu1 }
 0x177   :  { %v4190_v48 = vpop.f32.mrb[27].mxu1 }
 0x178   :  { %v5682_v18 = vadd.f32 %v4188_v0, %v4124_v30  ;;  %v4191_v38 = vadd.f32 %v4190_v48, %v4189_v5 }
 0x17a   :  { %v5684_v2 = vadd.f32 %v4191_v38, %v4127_v52 }
 0x17b   :  { %v4128_v25 = vpop.f32.mrb[28].mxu0 }
 0x17c   :  { %v4129_v45 = vpop.f32.mrb[29].mxu0 }
 0x17d   :  { %v4130_v6 = vadd.f32 %v4129_v45, %v4128_v25  ;;  %v4131_v8 = vpop.f32.mrb[30].mxu0 }
 0x17e   :  { %v4132_v59 = vpop.f32.mrb[31].mxu0 }
 0x17f   :  { %v4133_v41 = vadd.f32 %v4132_v59, %v4131_v8 }
 0x183   :  { %v4214_v21 = vpop.f32.mrb[32].mxu0 }
 0x184   :  { %v4215_v60 = vpop.f32.mrb[33].mxu0 }
 0x185   :  { %v4216_v11 = vadd.f32 %v4215_v60, %v4214_v21  ;;  %v4217_v40 = vpop.f32.mrb[34].mxu0 }
 0x186   :  { %v4218_v36 = vpop.f32.mrb[35].mxu0 }
 0x187   :  { %v3445_v46 = vadd.f32 %v4216_v11, %v5657_v55  ;;  %v4219_v10 = vadd.f32 %v4218_v36, %v4217_v40 }
 0x189   :  { %v4192_v23 = vpop.f32.mrb[28].mxu1  ;;  %v3448_v1 = vadd.f32 %v4219_v10, %v5659_v24 }
 0x18a   :  { %v4193_v63 = vpop.f32.mrb[29].mxu1 }
 0x18b   :  { %v4194_v35 = vadd.f32 %v4193_v63, %v4192_v23  ;;  %v4195_v26 = vpop.f32.mrb[30].mxu1 }
 0x18c   :  { %v4196_v27 = vpop.f32.mrb[31].mxu1 }
 0x18d   :  { %v5688_v17 = vadd.f32 %v4194_v35, %v4130_v6  ;;  %v4197_v15 = vadd.f32 %v4196_v27, %v4195_v26 }
 0x18f   :  { %v5690_v54 = vadd.f32 %v4197_v15, %v4133_v41 }
 0x191   :  { %v4278_v61 = vpop.f32.mrb[32].mxu1 }
 0x192   :  { %v4279_v56 = vpop.f32.mrb[33].mxu1 }
 0x193   :  { %v4280_v42 = vadd.f32 %v4279_v56, %v4278_v61  ;;  %v4281_v32 = vpop.f32.mrb[34].mxu1 }
 0x194   :  { %v4282_v50 = vpop.f32.mrb[35].mxu1 }
 0x195   :  { %v4283_v39 = vadd.f32 %v4282_v50, %v4281_v32  ;;  %v5692_v31 = vadd.f32 %v4280_v42, %v3445_v46 }
 0x197   :  { %v5694_v55 = vadd.f32 %v4283_v39, %v3448_v1 }
 0x199   :  { %v4220_v62 = vpop.f32.mrb[36].mxu0  ;;  %v4284_v43 = vpop.f32.mrb[36].mxu1 }
 0x19a   :  { %v4221_v20 = vpop.f32.mrb[37].mxu0  ;;  %v4285_v24 = vpop.f32.mrb[37].mxu1 }
 0x19b   :  { %v4222_v47 = vadd.f32 %v4221_v20, %v4220_v62  ;;  %v4223_v34 = vpop.f32.mrb[38].mxu0  ;;  %v4286_v3 = vadd.f32 %v4285_v24, %v4284_v43  ;;  %v4287_v22 = vpop.f32.mrb[38].mxu1 }
 0x19c   :  { %v4224_v58 = vpop.f32.mrb[39].mxu0  ;;  %v4288_v4 = vpop.f32.mrb[39].mxu1 }
 0x19d   :  { %v3453_v33 = vadd.f32 %v4222_v47, %v5662_v28  ;;  %v4225_v7 = vadd.f32 %v4224_v58, %v4223_v34  ;;  %v4289_v30 = vadd.f32 %v4288_v4, %v4287_v22 }
 0x19f   :  { %v3456_v53 = vadd.f32 %v4225_v7, %v5664_v44  ;;  %v5698_v16 = vadd.f32 %v4286_v3, %v3453_v33 }
 0x1a1   :  { %v5700_v52 = vadd.f32 %v4289_v30, %v3456_v53 }
 0x1a3   :  { %v4290_v14 = vpop.f32.mrb[40].mxu1 }
 0x1a4   :  { %v4291_v0 = vpop.f32.mrb[41].mxu1 }
 0x1a5   :  { %v4226_v9 = vpop.f32.mrb[40].mxu0  ;;  %v4292_v48 = vadd.f32 %v4291_v0, %v4290_v14  ;;  %v4293_v38 = vpop.f32.mrb[42].mxu1 }
 0x1a6   :  { %v4227_v5 = vpop.f32.mrb[41].mxu0  ;;  %v4294_v6 = vpop.f32.mrb[43].mxu1 }
 0x1a7   :  { %v4228_v25 = vadd.f32 %v4227_v5, %v4226_v9  ;;  %v4229_v45 = vpop.f32.mrb[42].mxu0  ;;  %v4295_v59 = vadd.f32 %v4294_v6, %v4293_v38 }
 0x1a8   :  { %v4230_v8 = vpop.f32.mrb[43].mxu0 }
 0x1a9   :  { %v3461_v28 = vadd.f32 %v4228_v25, %v5666_v29  ;;  %v4231_v41 = vadd.f32 %v4230_v8, %v4229_v45 }
 0x1ab   :  { %v3464_v44 = vadd.f32 %v4231_v41, %v5668_v49  ;;  %v5704_v21 = vadd.f32 %v4292_v48, %v3461_v28 }
 0x1ad   :  { %v5706_v60 = vadd.f32 %v4295_v59, %v3464_v44 }
 0x1b3   :  { %v4296_v11 = vpop.f32.mrb[44].mxu1 }
 0x1b4   :  { %v4297_v40 = vpop.f32.mrb[45].mxu1 }
 0x1b5   :  { %v4298_v36 = vadd.f32 %v4297_v40, %v4296_v11  ;;  %v4299_v23 = vpop.f32.mrb[46].mxu1 }
 0x1b6   :  { %v4300_v46 = vpop.f32.mrb[47].mxu1  ;;  %v4232_v10 = vpop.f32.mrb[44].mxu0 }
 0x1b7   :  { %v4301_v63 = vadd.f32 %v4300_v46, %v4299_v23  ;;  %v4233_v35 = vpop.f32.mrb[45].mxu0 }
 0x1b8   :  { %v4234_v26 = vadd.f32 %v4233_v35, %v4232_v10  ;;  %v4235_v1 = vpop.f32.mrb[46].mxu0 }
 0x1b9   :  { %v4236_v27 = vpop.f32.mrb[47].mxu0 }
 0x1ba   :  { %v3469_v29 = vadd.f32 %v4234_v26, %v5670_v51  ;;  %v4237_v15 = vadd.f32 %v4236_v27, %v4235_v1 }
 0x1bc   :  { %v3472_v49 = vadd.f32 %v4237_v15, %v5672_v13  ;;  %v5710_v61 = vadd.f32 %v4298_v36, %v3469_v29 }
 0x1be   :  { %v5712_v56 = vadd.f32 %v4301_v63, %v3472_v49 }
 0x1c2   :  { %v4302_v42 = vpop.f32.mrb[48].mxu1 }
 0x1c3   :  { %v4303_v32 = vpop.f32.mrb[49].mxu1 }
 0x1c4   :  { %v4304_v50 = vadd.f32 %v4303_v32, %v4302_v42  ;;  %v4305_v39 = vpop.f32.mrb[50].mxu1 }
 0x1c5   :  { %v4306_v62 = vpop.f32.mrb[51].mxu1 }
 0x1c6   :  { %v4307_v20 = vadd.f32 %v4306_v62, %v4305_v39 }
 0x1c7   :  { %v4238_v43 = vpop.f32.mrb[48].mxu0 }
 0x1c8   :  { %v4239_v24 = vpop.f32.mrb[49].mxu0 }
 0x1c9   :  { %v4240_v47 = vadd.f32 %v4239_v24, %v4238_v43  ;;  %v4241_v34 = vpop.f32.mrb[50].mxu0 }
 0x1ca   :  { %v4242_v3 = vpop.f32.mrb[51].mxu0 }
 0x1cb   :  { %v3477_v51 = vadd.f32 %v4240_v47, %v5674_v37  ;;  %v4243_v22 = vadd.f32 %v4242_v3, %v4241_v34 }
 0x1cd   :  { %v3480_v13 = vadd.f32 %v4243_v22, %v5676_v19  ;;  %v3574_v58 = vadd.f32 %v4304_v50, %v3477_v51 }
 0x1cf   :  { %v5716_v4 = vadd.f32 %v4307_v20, %v3480_v13  ;;  %v4308_v33 = vpop.f32.mrb[52].mxu1 }
 0x1d0   :  { %v4309_v7 = vpop.f32.mrb[53].mxu1 }
 0x1d1   :  { %v4310_v30 = vadd.f32 %v4309_v7, %v4308_v33  ;;  %v4311_v53 = vpop.f32.mrb[54].mxu1 }
 0x1d2   :  { %v4244_v14 = vpop.f32.mrb[52].mxu0  ;;  %v4312_v9 = vpop.f32.mrb[55].mxu1 }
 0x1d3   :  { %v4245_v0 = vpop.f32.mrb[53].mxu0  ;;  %v4313_v5 = vadd.f32 %v4312_v9, %v4311_v53 }
 0x1d4   :  { %v4246_v48 = vadd.f32 %v4245_v0, %v4244_v14  ;;  %v4247_v38 = vpop.f32.mrb[54].mxu0 }
 0x1d5   :  { %v4248_v25 = vpop.f32.mrb[55].mxu0 }
 0x1d6   :  { %v3485_v45 = vadd.f32 %v4246_v48, %v5678_v12  ;;  %v4249_v37 = vadd.f32 %v4248_v25, %v4247_v38 }
 0x1d8   :  { %v3488_v6 = vadd.f32 %v4249_v37, %v5680_v57  ;;  %v3582_v19 = vadd.f32 %v4310_v30, %v3485_v45 }
 0x1da   :  { %v3585_v8 = vadd.f32 %v4313_v5, %v3488_v6 }
 0x1dc   :  { %v4314_v59 = vpop.f32.mrb[56].mxu1 }
 0x1dd   :  { %v4315_v28 = vpop.f32.mrb[57].mxu1 }
 0x1de   :  { %v4250_v41 = vpop.f32.mrb[56].mxu0  ;;  %v4316_v44 = vadd.f32 %v4315_v28, %v4314_v59  ;;  %v4317_v11 = vpop.f32.mrb[58].mxu1 }
 0x1df   :  { %v4251_v40 = vpop.f32.mrb[57].mxu0  ;;  %v4318_v36 = vpop.f32.mrb[59].mxu1 }
 0x1e0   :  { %v4252_v23 = vadd.f32 %v4251_v40, %v4250_v41  ;;  %v4253_v46 = vpop.f32.mrb[58].mxu0  ;;  %v4319_v10 = vadd.f32 %v4318_v36, %v4317_v11 }
 0x1e1   :  { %v4254_v63 = vpop.f32.mrb[59].mxu0 }
 0x1e2   :  { %v3493_v35 = vadd.f32 %v4252_v23, %v5682_v18  ;;  %v4255_v26 = vadd.f32 %v4254_v63, %v4253_v46 }
 0x1e4   :  { %v3496_v12 = vadd.f32 %v4255_v26, %v5684_v2  ;;  %v3590_v1 = vadd.f32 %v4316_v44, %v3493_v35 }
 0x1e6   :  { %v5722_v57 = vadd.f32 %v4319_v10, %v3496_v12 }
 0x1eb   :  { %v4320_v27 = vpop.f32.mrb[60].mxu1 }
 0x1ec   :  { %v4321_v29 = vpop.f32.mrb[61].mxu1 }
 0x1ed   :  { %v4322_v15 = vadd.f32 %v4321_v29, %v4320_v27  ;;  %v4323_v49 = vpop.f32.mrb[62].mxu1 }
 0x1ee   :  { %v4324_v42 = vpop.f32.mrb[63].mxu1 }
 0x1ef   :  { %v4256_v32 = vpop.f32.mrb[60].mxu0  ;;  %v4325_v50 = vadd.f32 %v4324_v42, %v4323_v49 }
 0x1f0   :  { %v4257_v39 = vpop.f32.mrb[61].mxu0 }
 0x1f1   :  { %v4258_v62 = vadd.f32 %v4257_v39, %v4256_v32  ;;  %v4259_v43 = vpop.f32.mrb[62].mxu0 }
 0x1f2   :  { %v4260_v20 = vpop.f32.mrb[63].mxu0 }
 0x1f3   :  { %v3501_v24 = vadd.f32 %v4258_v62, %v5688_v17  ;;  %v4261_v18 = vadd.f32 %v4260_v20, %v4259_v43 }
 0x1f5   :  { %v3504_v47 = vadd.f32 %v4261_v18, %v5690_v54  ;;  %v3598_v2 = vadd.f32 %v4322_v15, %v3501_v24 }
 0x1f7   :  { %v3601_v34 = vadd.f32 %v4325_v50, %v3504_v47 }
 0x1fb   :  { %v4360_v3 = vpop.f32.mrb[64].mxu0 }
 0x1fc   :  { %v5727_v51 = vadd.f32 %v4360_v3, %v5698_v16  ;;  %v3638_v22 = vpop.f32.mrb[65].mxu0 }
 0x1fd   :  { %v5730_v13 = vadd.f32 %v3638_v22, %v5692_v31  ;;  %v4361_v33 = vpop.f32.mrb[66].mxu0 }
 0x1fe   :  { %v4368_v7 = vpop.f32.mrb[64].mxu1  ;;  %v5733_v30 = vadd.f32 %v4361_v33, %v5700_v52  ;;  %v3641_v53 = vpop.f32.mrb[67].mxu0 }
 0x1ff   :  { %v5735_v17 = vadd.f32 %v4368_v7, %v3582_v19  ;;  %v3670_v14 = vpop.f32.mrb[65].mxu1  ;;  %v5738_v54 = vadd.f32 %v3641_v53, %v5694_v55  ;;  %v3754_v0 = vmul.f32 %v5730_v13, %v5730_v13  ;;  %v3756_v55 = vmul.f32 %v5727_v51, %v5727_v51 }
 0x200   :  { %v5740_v9 = vadd.f32 %v3670_v14, %v3574_v58  ;;  %v4369_v16 = vpop.f32.mrb[66].mxu1  ;;  %v3757_v37 = vmul.f32 %v5733_v30, %v5733_v30 }
 0x201   :  { %v5744_v31 = vadd.f32 %v4369_v16, %v3585_v8  ;;  %v3733_v5 = vadd.f32 %v5738_v54, %v5730_v13  ;;  %v3755_v52 = vmul.f32 %v5738_v54, %v5738_v54  ;;  %v3673_v48 = vpop.f32.mrb[67].mxu1  ;;  %v3764_v24 = vmul.f32 %v5735_v17, %v5735_v17 }
 0x202   :  { %v5751_v38 = vadd.f32 %v3673_v48, %v5716_v4  ;;  %v3762_v50 = vmul.f32 %v5740_v9, %v5740_v9 }
 0x203   :  { %v3734_v58 = vadd.f32 %v3733_v5, %v5727_v51  ;;  %v3770_v25 = vadd.f32 %v3755_v52, %v3754_v0 }
 0x205   :  { %v3771_v45 = vadd.f32 %v3770_v25, %v3756_v55  ;;  %v3735_v19 = vadd.f32 %v3734_v58, %v5733_v30 }
 0x207   :  { %v4364_v6 = vpop.f32.mrb[68].mxu0  ;;  %v3772_v41 = vadd.f32 %v3771_v45, %v3757_v37 }
 0x208   :  { %v5760_v8 = vadd.f32 %v4364_v6, %v5710_v61  ;;  %v3654_v59 = vpop.f32.mrb[69].mxu0 }
 0x209   :  { %v4372_v28 = vpop.f32.mrb[68].mxu1  ;;  %v5763_v4 = vadd.f32 %v3654_v59, %v5704_v21  ;;  %v4365_v44 = vpop.f32.mrb[70].mxu0 }
 0x20a   :  { %v5765_v11 = vadd.f32 %v4372_v28, %v3598_v2  ;;  %v3686_v40 = vpop.f32.mrb[69].mxu1  ;;  %v5768_v36 = vadd.f32 %v4365_v44, %v5712_v56  ;;  %v3657_v23 = vpop.f32.mrb[71].mxu0  ;;  %v3760_v15 = vmul.f32 %v5760_v8, %v5760_v8  ;;  %v3765_v2 = vmul.f32 %v5744_v31, %v5744_v31 }
 0x20b   :  { %v3736_v46 = vadd.f32 %v3735_v19, %v5763_v4  ;;  %v3758_v61 = vmul.f32 %v5763_v4, %v5763_v4  ;;  %v5773_v10 = vadd.f32 %v3686_v40, %v3590_v1  ;;  %v4373_v63 = vpop.f32.mrb[70].mxu1  ;;  %v5776_v21 = vadd.f32 %v3657_v23, %v5706_v60 }
 0x20c   :  { %v5778_v35 = vadd.f32 %v4373_v63, %v3601_v34  ;;  %v3689_v26 = vpop.f32.mrb[71].mxu1  ;;  %v3761_v60 = vmul.f32 %v5768_v36, %v5768_v36  ;;  %v3768_v0 = vmul.f32 %v5765_v11, %v5765_v11 }
 0x20d   :  { %v3773_v12 = vadd.f32 %v3772_v41, %v3758_v61  ;;  %v3737_v27 = vadd.f32 %v3736_v46, %v5776_v21  ;;  %v3759_v56 = vmul.f32 %v5776_v21, %v5776_v21  ;;  %v3690_v29 = vadd.f32 %v3689_v26, %v5722_v57 }
 0x20e   :  { %v3763_v57 = vmul.f32 %v5751_v38, %v5751_v38  ;;  %v3766_v22 = vmul.f32 %v5773_v10, %v5773_v10  ;;  %v3769_v48 = vmul.f32 %v5778_v35, %v5778_v35 }
 0x20f   :  { %v3738_v1 = vadd.f32 %v3737_v27, %v5760_v8  ;;  %v3774_v49 = vadd.f32 %v3773_v12, %v3759_v56  ;;  %v3767_v14 = vmul.f32 %v3690_v29, %v3690_v29 }
 0x211   :  { %v3739_v42 = vadd.f32 %v3738_v1, %v5768_v36  ;;  %v3775_v32 = vadd.f32 %v3774_v49, %v3760_v15  ;;  %v3798_v1 = vld [vmem:[%s5854_s2] sm:$0x1]  ;;  %s4499_s2 = smov [#allocation5]  }
 0x212   :  { %v5894_v49 = vld [vmem:[#allocation8_spill] sm:$0xff] }
 0x213   :  { %v3740_v39 = vadd.f32 %v3739_v42, %v5740_v9  ;;  %v3776_v62 = vadd.f32 %v3775_v32, %v3761_v60  ;;  %v3805_v60 = vsub.s32 0, %v5894_v49 }
 0x215   :  { %v3777_v43 = vadd.f32 %v3776_v62, %v3762_v50  ;;  %v3741_v20 = vadd.f32 %v3740_v39, %v5751_v38  ;;  %v3800_v50 = vld [vmem:[%s5855_s3] sm:$0x1]  ;;  %s3882_s3 = sshll.u32 %s4499_s2, 4  ;;  %s5833_s3 = int_to_ptr.vmem [resolvable:$true] %s3882_s3 }
 0x216   :  { %s4474_s21 = scalar_lea.vmem %s5833_s3, 2048  ;;  %p4479_p1 = scmp.lt.s32.totalorder %s5833_s3, %s5833_s3 }
 0x217   :  { %v3742_v18 = vadd.f32 %v3741_v20, %v5735_v17  ;;  %v3778_v47 = vadd.f32 %v3777_v43, %v3763_v57  ;;  %p4475_p0 = scmp.ne.s32.totalorder %s5833_s3, %s4474_s21  ;;  %p4480_p2 = scmp.lt.s32.totalorder %s4474_s21, %s4474_s21 }
 0x219   :  { %v3743_v34 = vadd.f32 %v3742_v18, %v5744_v31  ;;  %v3779_v3 = vadd.f32 %v3778_v47, %v3764_v24  ;;  %p4481_p3 = por %p4480_p2, %p4479_p1 }
 0x21b   :  { %v3744_v33 = vadd.f32 %v3743_v34, %v5773_v10  ;;  %v3780_v7 = vadd.f32 %v3779_v3, %v3765_v2  ;;  %p4482_p4 = pnand %p4481_p3, %p4475_p0 }
 0x21d   :  { %v3745_v53 = vadd.f32 %v3744_v33, %v3690_v29  ;;  %v3781_v16 = vadd.f32 %v3780_v7, %v3766_v22 }
 0x21f   :  { %v3746_v5 = vadd.f32 %v3745_v53, %v5765_v11  ;;  %v3782_v52 = vadd.f32 %v3781_v16, %v3767_v14 }
 0x221   :  { %v3747_v55 = vadd.f32 %v3746_v5, %v5778_v35  ;;  %v3783_v58 = vadd.f32 %v3782_v52, %v3768_v0 }
 0x223   :  { %v3748_v25 = vrot.slane %v3747_v55, 4  ;;  %v3784_v45 = vadd.f32 %v3783_v58, %v3769_v48 }
 0x225   :  { %v3749_v37 = vadd.f32 %v3748_v25, %v3747_v55  ;;  %v3785_v6 = vrot.slane %v3784_v45, 4 }
 0x227   :  { %v3750_v19 = vrot.slane %v3749_v37, 2  ;;  %v3786_v59 = vadd.f32 %v3785_v6, %v3784_v45 }
 0x229   :  { %v3751_v28 = vadd.f32 %v3750_v19, %v3749_v37  ;;  %v3787_v41 = vrot.slane %v3786_v59, 2 }
 0x22b   :  { %v3752_v44 = vrot.slane %v3751_v28, 1  ;;  %v3788_v40 = vadd.f32 %v3787_v41, %v3786_v59 }
 0x22d   :  { %v3753_v23 = vadd.f32 %v3752_v44, %v3751_v28  ;;  %v3789_v46 = vrot.slane %v3788_v40, 1 }
 0x22f   :  { %v3790_v61 = vadd.f32 %v3789_v46, %v3788_v40  ;;  %v3791_v63 = vmul.f32 0.0078125, %v3753_v23 }
 0x231   :  { %v3792_v26 = vmul.f32 0.0078125, %v3790_v61  ;;  %v3793_v12 = vmul.f32 %v3791_v63, %v3791_v63 }
 0x233   :  { %v3794_v27 = vsub.f32 %v3792_v26, %v3793_v12 }
 0x235   :  { %v3795_v56 = vmax.f32 %v3794_v27, 0.0 }
 0x237   :  { %v3796_v15 = vadd.f32 1e-05, %v3795_v56 }
 0x239   :  { %4466 = vrsqrt.f32 %v3796_v15 }
 0x243   :  { %v4467_v42 = vpop.eup %4466 }
 0x244   :  { %v3799_v32 = vmul.f32 %v4467_v42, %v3798_v1 }
 0x246   :  { %v3801_v39 = vmul.f32 %v3799_v32, %v3791_v63  ;;  %v3806_v62 = vrot.slane %v3799_v32, %v3805_v60 }
 0x248   :  { %v3802_v57 = vsub.f32 %v3800_v50, %v3801_v39  ;;  %v3820_v43 = vmul.f32 %v3806_v62, %v3690_v29  ;;  %v3807_v20 = vmul.f32 %v3806_v62, %v5730_v13  ;;  %v3808_v24 = vmul.f32 %v3806_v62, %v5738_v54 }
 0x249   :  { %v3809_v18 = vmul.f32 %v3806_v62, %v5727_v51  ;;  %v3810_v47 = vmul.f32 %v3806_v62, %v5733_v30  ;;  %v3811_v2 = vmul.f32 %v3806_v62, %v5763_v4  ;;  %v3812_v34 = vmul.f32 %v3806_v62, %v5776_v21 }
 0x24a   :  { %v3827_v3 = vrot.slane %v3802_v57, %v3805_v60  ;;  %v3813_v22 = vmul.f32 %v3806_v62, %v5760_v8  ;;  %v3814_v33 = vmul.f32 %v3806_v62, %v5768_v36  ;;  %v3815_v7 = vmul.f32 %v3806_v62, %v5740_v9 }
 0x24b   :  { %v3816_v29 = vmul.f32 %v3806_v62, %v5751_v38  ;;  %v3817_v13 = vmul.f32 %v3806_v62, %v5735_v17  ;;  %v3818_v54 = vmul.f32 %v3806_v62, %v5744_v31  ;;  %v3819_v51 = vmul.f32 %v3806_v62, %v5773_v10 }
 0x24c   :  { %v3842_v30 = vadd.f32 %v3827_v3, %v3820_v43  ;;  %v3821_v4 = vmul.f32 %v3806_v62, %v5765_v11  ;;  %v3822_v21 = vmul.f32 %v3806_v62, %v5778_v35  ;;  %v3829_v53 = vadd.f32 %v3827_v3, %v3807_v20 }
 0x24d   :  { %v3830_v14 = vadd.f32 %v3827_v3, %v3808_v24  ;;  %v3831_v8 = vadd.f32 %v3827_v3, %v3809_v18  ;;  %v3832_v16 = vadd.f32 %v3827_v3, %v3810_v47  ;;  %v3833_v36 = vadd.f32 %v3827_v3, %v3811_v2 }
 0x24e   :  { %v3858_v0 = vmax.f32 %v3842_v30, 0.0  ;;  %v3834_v9 = vadd.f32 %v3827_v3, %v3812_v34  ;;  %v3835_v5 = vadd.f32 %v3827_v3, %v3813_v22  ;;  %v3836_v38 = vadd.f32 %v3827_v3, %v3814_v33 }
 0x24f   :  { %v3837_v52 = vadd.f32 %v3827_v3, %v3815_v7  ;;  %v3838_v17 = vadd.f32 %v3827_v3, %v3816_v29  ;;  %v3839_v48 = vadd.f32 %v3827_v3, %v3817_v13  ;;  %v3840_v31 = vadd.f32 %v3827_v3, %v3818_v54 }
 0x250   :  { %3874 = vst [vmem:[#allocation5 + $0x68] sm:$0xff] %v3858_v0  ;;  %v3841_v10 = vadd.f32 %v3827_v3, %v3819_v51  ;;  %v3843_v55 = vadd.f32 %v3827_v3, %v3821_v4  ;;  %v3844_v58 = vadd.f32 %v3827_v3, %v3822_v21  ;;  %v3845_v11 = vmax.f32 %v3829_v53, 0.0 }
 0x251   :  { %v3846_v35 = vmax.f32 %v3830_v14, 0.0  ;;  %v3847_v25 = vmax.f32 %v3831_v8, 0.0  ;;  %v3848_v45 = vmax.f32 %v3832_v16, 0.0  ;;  %v3849_v37 = vmax.f32 %v3833_v36, 0.0 }
 0x252   :  { %v3850_v6 = vmax.f32 %v3834_v9, 0.0  ;;  %v3851_v19 = vmax.f32 %v3835_v5, 0.0  ;;  %v3852_v59 = vmax.f32 %v3836_v38, 0.0  ;;  %v3853_v28 = vmax.f32 %v3837_v52, 0.0  ;;  %3861 = vst [vmem:[#allocation5] sm:$0xff] %v3845_v11 }
 0x253   :  { %v3854_v41 = vmax.f32 %v3838_v17, 0.0  ;;  %v3855_v44 = vmax.f32 %v3839_v48, 0.0  ;;  %v3856_v40 = vmax.f32 %v3840_v31, 0.0  ;;  %v3857_v23 = vmax.f32 %v3841_v10, 0.0  ;;  %3862 = vst [vmem:[#allocation5 + $0x8] sm:$0xff] %v3846_v35  ;;  %3863 = vst [vmem:[#allocation5 + $0x10] sm:$0xff] %v3847_v25 }
 0x254   :  { %3864 = vst [vmem:[#allocation5 + $0x18] sm:$0xff] %v3848_v45  ;;  %3865 = vst [vmem:[#allocation5 + $0x20] sm:$0xff] %v3849_v37  ;;  %v3859_v46 = vmax.f32 %v3843_v55, 0.0  ;;  %v3860_v61 = vmax.f32 %v3844_v58, 0.0 }
 0x255   :  { %3866 = vst [vmem:[#allocation5 + $0x28] sm:$0xff] %v3850_v6  ;;  %3867 = vst [vmem:[#allocation5 + $0x30] sm:$0xff] %v3851_v19 }
 0x256   :  { %3868 = vst [vmem:[#allocation5 + $0x38] sm:$0xff] %v3852_v59  ;;  %3869 = vst [vmem:[#allocation5 + $0x40] sm:$0xff] %v3853_v28 }
 0x257   :  { %3870 = vst [vmem:[#allocation5 + $0x48] sm:$0xff] %v3854_v41  ;;  %3871 = vst [vmem:[#allocation5 + $0x50] sm:$0xff] %v3855_v44 }
 0x258   :  { %3872 = vst [vmem:[#allocation5 + $0x58] sm:$0xff] %v3856_v40  ;;  %3873 = vst [vmem:[#allocation5 + $0x60] sm:$0xff] %v3857_v23 }
 0x259   :  { %3875 = vst [vmem:[#allocation5 + $0x70] sm:$0xff] %v3859_v46  ;;  %3876 = vst [vmem:[#allocation5 + $0x78] sm:$0xff] %v3860_v61 }
 0x25a   :  { %4485 = shalt.err (!%p4482_p4)
}
 0x25b   :  { %s4486_s24 = scalar_lea.hbm %s5856_s4, 2048 }
 0x25c   :  { %p4487_p5 = scmp.ne.s32.totalorder %s5856_s4, %s4486_s24  ;;  %p4490_p6 = scmp.lt.u32.totalorder %s4486_s24, %s5856_s4 }
 0x25e   :  { %p4492_p7 = pnand %p4490_p6, %p4487_p5 }
 0x260   :  { %4495 = shalt.err (!%p4492_p7)
}
 0x261   :  { %s4500_s28 = smov 128   ;;  %s4501_s29 = smov 8  }
 0x262   :  { %3888 = dma.vmem_to_hbm [thread:$0]  %s5833_s3, 2048, %s5856_s4, [#allocation6], %s4500_s28, %s4500_s28, %s4501_s29  }
 0x263   :  { %4496 = dma.done.wait [#allocation6], 2048  }
 0x264   :  { %4497 = vsyncadd [#allocation6], 4294965248 }
 0x265   :  { %3892 = vsyncpa [#allocation6], 1 }

</bundles_post_ra>
